<compile_context>
chip_gen: v7x
topology: tpu7x:2x2x1
jax: 0.10.0
libtpu: 0.0.40
codegen_flags: <defaults>
</compile_context>

<pallas_src>
import jax
import jax.numpy as jnp
import numpy as np
from jax.experimental import pallas as pl
from jax.experimental.pallas import tpu as pltpu

KH = KW = 4          # Conv2d kernel size in the module
BN_EPS = 1e-5        # nn.BatchNorm2d default eps
GEM_EPS = 1e-6       # GeM eps


def _head_kernel(x_ref, wt_ref, scale_ref, shift_ref, pool_ref,
                 wlin_ref, blin_ref, p_ref, out_ref):
    p = p_ref[0]                                            # GeM p (SMEM scalar)

    # --- Conv2d (VALID 4x4) as ONE MXU matmul against the Toeplitz weight ---
    # result layout: (Nb, P*Cmid), column = spatial_pos * Cmid + out_channel
    y = jnp.dot(x_ref[...], wt_ref[...], preferred_element_type=jnp.float32)

    # --- folded conv-bias + BatchNorm (inference mode), per-channel (tiled) ---
    y = y * scale_ref[...] + shift_ref[...]

    # --- Mish: x * tanh(softplus(x)) (numerically stable softplus), f32 ---
    sp = jnp.maximum(y, 0.0) + jnp.log(1.0 + jnp.exp(-jnp.abs(y)))
    y = y * jnp.tanh(sp)

    # --- GeM pooling: clamp, ^p elementwise, spatial mean on the MXU, ^(1/p) ---
    yc = jnp.maximum(y, GEM_EPS)
    yp = jnp.exp(p * jnp.log(yc))                           # yc ** p
    pooled = jnp.dot(yp, pool_ref[...],
                     preferred_element_type=jnp.float32)    # (Nb, Cmid) mean over P
    pooled = jnp.exp(jnp.log(pooled) / p)                   # ** (1/p)

    # --- final Linear ---
    out = jnp.dot(pooled, wlin_ref[...], preferred_element_type=jnp.float32)
    out_ref[...] = (out + blin_ref[...]).astype(out_ref.dtype)


def _round_up(a, b):
    return (a + b - 1) // b * b


def _conv_as_toeplitz(conv_w, H, W):
    """OIHW conv weight -> dense (H*W*Cin, Ho*Wo*Cmid) matmul weight (im2col folded
    into the weight, so the kernel input stays at raw NHWC size)."""
    Cmid, Cin = conv_w.shape[0], conv_w.shape[1]
    Ho, Wo = H - KH + 1, W - KW + 1
    w_hwio = jnp.transpose(conv_w, (2, 3, 1, 0))            # (KH, KW, Cin, Cmid)
    ho, wo, kh, kw, c, m = [a.ravel()
                            for a in np.indices((Ho, Wo, KH, KW, Cin, Cmid))]
    rows = ((ho + kh) * W + (wo + kw)) * Cin + c            # flattened NHWC input index
    cols = (ho * Wo + wo) * Cmid + m                        # flattened (spatial, ch) index
    vals = w_hwio[kh, kw, c, m]
    wt = jnp.zeros((H * W * Cin, Ho * Wo * Cmid), jnp.float32)
    return wt.at[rows, cols].set(vals)


def adaptive_head_heavy(x_nchw, params, *, block_n=128):
    N, Cin, H, W = x_nchw.shape
    Ho, Wo = H - KH + 1, W - KW + 1
    P = Ho * Wo

    conv_w = params["conv_w"]                               # (Cmid, Cin, KH, KW) OIHW
    Cmid = conv_w.shape[0]
    lin_w = params["lin_w"]                                 # (Cout, Cmid)
    Cout = lin_w.shape[0]

    # --- batch blocking: Nb samples per grid step, Nb a multiple of 8 ---
    bn = min(block_n, _round_up(N, 8))
    n_pad = _round_up(N, bn)

    # --- input: NCHW -> NHWC -> (N, H*W*Cin), bf16, zero-pad the batch ---
    x_flat = jnp.transpose(x_nchw, (0, 2, 3, 1)).reshape(N, H * W * Cin)
    x_flat = jnp.pad(x_flat, ((0, n_pad - N), (0, 0))).astype(jnp.bfloat16)

    # --- conv weight as a constant Toeplitz matmul weight (bf16 for the MXU) ---
    wt = _conv_as_toeplitz(conv_w, H, W).astype(jnp.bfloat16)   # (HWC, P*Cmid)

    # Fold conv bias + BatchNorm running stats into scale/shift, tiled over P.
    # TODO(synk): train-mode BatchNorm (batch statistics) would need a cross-batch
    # reduction pass; inference-mode running-stats BN is implemented here.
    inv_std = 1.0 / jnp.sqrt(params["bn_var"] + BN_EPS)
    scale_c = params["bn_gamma"] * inv_std
    shift_c = (params["conv_b"] - params["bn_mean"]) * scale_c + params["bn_beta"]
    scale = jnp.tile(scale_c, P).reshape(1, P * Cmid).astype(jnp.float32)
    shift = jnp.tile(shift_c, P).reshape(1, P * Cmid).astype(jnp.float32)

    # GeM spatial mean as an MXU matmul: (P*Cmid, Cmid) averaging matrix.
    pool_mat = jnp.tile(jnp.eye(Cmid, dtype=jnp.float32), (P, 1)) / float(P)

    wlin = jnp.transpose(lin_w, (1, 0)).astype(jnp.float32)     # (Cmid, Cout)
    blin = params["lin_b"].reshape(1, Cout).astype(jnp.float32)
    p_gem = params["gem_p"].astype(jnp.float32)                 # (1,)

    hwc = H * W * Cin
    pc = P * Cmid
    cost = pl.CostEstimate(
        flops=2 * n_pad * hwc * pc + 2 * n_pad * pc * Cmid + 2 * n_pad * Cmid * Cout,
        transcendentals=6 * n_pad * pc,
        bytes_accessed=(x_flat.size * 2 + wt.size * 2
                        + (scale.size + shift.size + pool_mat.size
                           + wlin.size + blin.size) * 4
                        + n_pad * Cout * 4),
    )

    out = pl.pallas_call(
        _head_kernel,
        out_shape=jax.ShapeDtypeStruct((n_pad, Cout), jnp.float32),
        grid=(n_pad // bn,),
        in_specs=[
            pl.BlockSpec((bn, hwc), lambda n: (n, 0)),          # raw flattened input
            pl.BlockSpec((hwc, pc), lambda n: (0, 0)),          # Toeplitz conv weight
            pl.BlockSpec((1, pc), lambda n: (0, 0)),            # BN scale (tiled)
            pl.BlockSpec((1, pc), lambda n: (0, 0)),            # BN shift (tiled)
            pl.BlockSpec((pc, Cmid), lambda n: (0, 0)),         # GeM pooling matrix
            pl.BlockSpec((Cmid, Cout), lambda n: (0, 0)),       # linear weight
            pl.BlockSpec((1, Cout), lambda n: (0, 0)),          # linear bias
            pl.BlockSpec(memory_space=pltpu.MemorySpace.SMEM),  # GeM p scalar
        ],
        out_specs=pl.BlockSpec((bn, Cout), lambda n: (n, 0)),
        compiler_params=pltpu.CompilerParams(
            dimension_semantics=("parallel",)),
        cost_estimate=cost,
    )(x_flat, wt, scale, shift, pool_mat, wlin, blin, p_gem)

    return out[:N]


def reference(x_nchw, params):
    """Pure-JAX reference mirroring the PyTorch forward (inference-mode BN)."""
    y = jax.lax.conv_general_dilated(
        x_nchw, params["conv_w"], (1, 1), "VALID",
        dimension_numbers=("NCHW", "OIHW", "NCHW"),
        precision=jax.lax.Precision.HIGHEST)
    y = y + params["conv_b"][None, :, None, None]
    inv_std = 1.0 / jnp.sqrt(params["bn_var"] + BN_EPS)
    y = ((y - params["bn_mean"][None, :, None, None])
         * (params["bn_gamma"] * inv_std)[None, :, None, None]
         + params["bn_beta"][None, :, None, None])
    y = y * jnp.tanh(jax.nn.softplus(y))                    # Mish
    p = params["gem_p"][0]
    y = jnp.clip(y, GEM_EPS, None) ** p
    y = jnp.mean(y, axis=(2, 3)) ** (1.0 / p)               # GeM + flatten
    return y @ params["lin_w"].T + params["lin_b"]


def init_params(key, in_features, out_features, factor):
    mid = in_features // factor
    ks = jax.random.split(key, 8)
    return {
        "conv_w": 0.1 * jax.random.normal(ks[0], (mid, in_features, KH, KW), jnp.float32),
        "conv_b": 0.1 * jax.random.normal(ks[1], (mid,), jnp.float32),
        "bn_gamma": 1.0 + 0.1 * jax.random.normal(ks[2], (mid,), jnp.float32),
        "bn_beta": 0.1 * jax.random.normal(ks[3], (mid,), jnp.float32),
        "bn_mean": 0.1 * jax.random.normal(ks[4], (mid,), jnp.float32),
        "bn_var": 1.0 + 0.1 * jnp.abs(jax.random.normal(ks[5], (mid,), jnp.float32)),
        "gem_p": jnp.full((1,), 3.0, jnp.float32),
        "lin_w": 0.1 * jax.random.normal(ks[6], (out_features, mid), jnp.float32),
        "lin_b": 0.1 * jax.random.normal(ks[7], (out_features,), jnp.float32),
    }


if __name__ == "__main__":
    key = jax.random.PRNGKey(0)
    kx, kp = jax.random.split(key)

    # Small shapes consistent with the module: in_features=8, factor=2, out=16.
    N, Cin, H, W = 2, 8, 16, 16
    out_features, factor = 16, 2

    x = jax.random.normal(kx, (N, Cin, H, W), jnp.float32)
    params = init_params(kp, Cin, out_features, factor)

    out = jax.block_until_ready(adaptive_head_heavy(x, params))
    ref = jax.block_until_ready(reference(x, params))

    # bf16 matmul inputs -> slightly looser tolerance than pure-f32.
    np.testing.assert_allclose(np.asarray(out), np.asarray(ref), rtol=2e-2, atol=2e-2)
    print("KERNEL_OK")
</pallas_src>

<mosaic_0001>
module attributes {stable_mosaic.version = 11 : i64} {
  func.func @_head_kernel(%arg0: i32, %arg1: memref<8x2048xbf16, #tpu.memory_space<vmem>>, %arg2: memref<2048x676xbf16, #tpu.memory_space<vmem>>, %arg3: memref<1x676xf32, #tpu.memory_space<vmem>>, %arg4: memref<1x676xf32, #tpu.memory_space<vmem>>, %arg5: memref<676x4xf32, #tpu.memory_space<vmem>>, %arg6: memref<4x16xf32, #tpu.memory_space<vmem>>, %arg7: memref<1x16xf32, #tpu.memory_space<vmem>>, %arg8: memref<1xf32, #tpu.memory_space<smem>>, %arg9: memref<8x16xf32, #tpu.memory_space<vmem>>) attributes {dimension_semantics = [#tpu.dimension_semantics<parallel>], iteration_bounds = array<i64: 1>, scalar_prefetch = 0 : i64, scratch_operands = 0 : i64, tpu.core_type = #tpu.core_type<tc>, window_params = [{transform_indices = @transform_0, window_bounds = array<i64: 8, 2048>}, {pipeline_mode = #tpu.pipeline_mode<synchronous>, transform_indices = @transform_1, window_bounds = array<i64: 2048, 676>}, {pipeline_mode = #tpu.pipeline_mode<synchronous>, transform_indices = @transform_2, window_bounds = array<i64: 1, 676>}, {pipeline_mode = #tpu.pipeline_mode<synchronous>, transform_indices = @transform_3, window_bounds = array<i64: 1, 676>}, {pipeline_mode = #tpu.pipeline_mode<synchronous>, transform_indices = @transform_4, window_bounds = array<i64: 676, 4>}, {pipeline_mode = #tpu.pipeline_mode<synchronous>, transform_indices = @transform_5, window_bounds = array<i64: 4, 16>}, {pipeline_mode = #tpu.pipeline_mode<synchronous>, transform_indices = @transform_6, window_bounds = array<i64: 1, 16>}, {transform_indices = @transform_7, window_bounds = array<i64: 1>}, {transform_indices = @transform_8, window_bounds = array<i64: 8, 16>}]} {
    %c0 = arith.constant 0 : index
    %0 = memref.load %arg8[%c0] : memref<1xf32, #tpu.memory_space<smem>>
    %c0_0 = arith.constant 0 : index
    %c0_1 = arith.constant 0 : index
    %1 = vector.load %arg1[%c0_0, %c0_1] : memref<8x2048xbf16, #tpu.memory_space<vmem>>, vector<8x2048xbf16>
    %c0_2 = arith.constant 0 : index
    %c0_3 = arith.constant 0 : index
    %2 = vector.load %arg2[%c0_2, %c0_3] : memref<2048x676xbf16, #tpu.memory_space<vmem>>, vector<2048x676xbf16>
    %cst = arith.constant dense<0.000000e+00> : vector<8x676xf32>
    %3 = tpu.matmul %1, %2, %cst {dimension_numbers = #tpu.dot_dimension_numbers<[1], [0], [0], [1], [0, 0, 1, 1], [], []>} : vector<8x2048xbf16>, vector<2048x676xbf16>, vector<8x676xf32> -> vector<8x676xf32>
    %c0_4 = arith.constant 0 : index
    %c0_5 = arith.constant 0 : index
    %4 = vector.load %arg3[%c0_4, %c0_5] : memref<1x676xf32, #tpu.memory_space<vmem>>, vector<1x676xf32>
    %5 = vector.broadcast %4 : vector<1x676xf32> to vector<8x676xf32>
    %6 = arith.mulf %3, %5 : vector<8x676xf32>
    %c0_6 = arith.constant 0 : index
    %c0_7 = arith.constant 0 : index
    %7 = vector.load %arg4[%c0_6, %c0_7] : memref<1x676xf32, #tpu.memory_space<vmem>>, vector<1x676xf32>
    %8 = vector.broadcast %7 : vector<1x676xf32> to vector<8x676xf32>
    %9 = arith.addf %6, %8 : vector<8x676xf32>
    %cst_8 = arith.constant 0.000000e+00 : f32
    %10 = vector.broadcast %cst_8 : f32 to vector<8x676xf32>
    %11 = arith.maximumf %9, %10 : vector<8x676xf32>
    %12 = math.absf %9 : vector<8x676xf32>
    %cst_9 = arith.constant 0.000000e+00 : f32
    %13 = vector.broadcast %cst_9 : f32 to vector<8x676xf32>
    %14 = arith.subf %13, %12 : vector<8x676xf32>
    %15 = math.exp %14 : vector<8x676xf32>
    %cst_10 = arith.constant 1.000000e+00 : f32
    %16 = vector.broadcast %cst_10 : f32 to vector<8x676xf32>
    %17 = arith.addf %16, %15 : vector<8x676xf32>
    %18 = math.log %17 : vector<8x676xf32>
    %19 = arith.addf %11, %18 : vector<8x676xf32>
    %20 = math.tanh %19 : vector<8x676xf32>
    %21 = arith.mulf %9, %20 : vector<8x676xf32>
    %cst_11 = arith.constant 9.99999997E-7 : f32
    %22 = vector.broadcast %cst_11 : f32 to vector<8x676xf32>
    %23 = arith.maximumf %21, %22 : vector<8x676xf32>
    %24 = math.log %23 : vector<8x676xf32>
    %25 = vector.broadcast %0 : f32 to vector<8x676xf32>
    %26 = arith.mulf %25, %24 : vector<8x676xf32>
    %27 = math.exp %26 : vector<8x676xf32>
    %c0_12 = arith.constant 0 : index
    %c0_13 = arith.constant 0 : index
    %28 = vector.load %arg5[%c0_12, %c0_13] : memref<676x4xf32, #tpu.memory_space<vmem>>, vector<676x4xf32>
    %cst_14 = arith.constant dense<0.000000e+00> : vector<8x4xf32>
    %29 = tpu.matmul %27, %28, %cst_14 {dimension_numbers = #tpu.dot_dimension_numbers<[1], [0], [0], [1], [0, 0, 1, 1], [], []>} : vector<8x676xf32>, vector<676x4xf32>, vector<8x4xf32> -> vector<8x4xf32>
    %30 = math.log %29 : vector<8x4xf32>
    %31 = vector.broadcast %0 : f32 to vector<8x4xf32>
    %32 = arith.divf %30, %31 : vector<8x4xf32>
    %33 = math.exp %32 : vector<8x4xf32>
    %c0_15 = arith.constant 0 : index
    %c0_16 = arith.constant 0 : index
    %34 = vector.load %arg6[%c0_15, %c0_16] : memref<4x16xf32, #tpu.memory_space<vmem>>, vector<4x16xf32>
    %cst_17 = arith.constant dense<0.000000e+00> : vector<8x16xf32>
    %35 = tpu.matmul %33, %34, %cst_17 {dimension_numbers = #tpu.dot_dimension_numbers<[1], [0], [0], [1], [0, 0, 1, 1], [], []>} : vector<8x4xf32>, vector<4x16xf32>, vector<8x16xf32> -> vector<8x16xf32>
    %c0_18 = arith.constant 0 : index
    %c0_19 = arith.constant 0 : index
    %36 = vector.load %arg7[%c0_18, %c0_19] : memref<1x16xf32, #tpu.memory_space<vmem>>, vector<1x16xf32>
    %37 = vector.broadcast %36 : vector<1x16xf32> to vector<8x16xf32>
    %38 = arith.addf %35, %37 : vector<8x16xf32>
    %c0_20 = arith.constant 0 : index
    %c0_21 = arith.constant 0 : index
    %39 = vector.load %arg9[%c0_20, %c0_21] : memref<8x16xf32, #tpu.memory_space<vmem>>, vector<8x16xf32>
    tpu.vector_store %arg9[%c0_20, %c0_21], %38 {strides = array<i32>} : memref<8x16xf32, #tpu.memory_space<vmem>>, vector<8x16xf32>,
    return
  }
  func.func @transform_0(%arg0: i32) -> (i32, i32) {
    %c0_i32 = arith.constant 0 : i32
    %c0_i32_0 = arith.constant 0 : i32
    return %arg0, %c0_i32 : i32, i32
  }
  func.func @transform_1(%arg0: i32) -> (i32, i32) {
    %c0_i32 = arith.constant 0 : i32
    %c0_i32_0 = arith.constant 0 : i32
    %c0_i32_1 = arith.constant 0 : i32
    return %c0_i32, %c0_i32_0 : i32, i32
  }
  func.func @transform_2(%arg0: i32) -> (i32, i32) {
    %c0_i32 = arith.constant 0 : i32
    %c0_i32_0 = arith.constant 0 : i32
    %c0_i32_1 = arith.constant 0 : i32
    return %c0_i32, %c0_i32_0 : i32, i32
  }
  func.func @transform_3(%arg0: i32) -> (i32, i32) {
    %c0_i32 = arith.constant 0 : i32
    %c0_i32_0 = arith.constant 0 : i32
    %c0_i32_1 = arith.constant 0 : i32
    return %c0_i32, %c0_i32_0 : i32, i32
  }
  func.func @transform_4(%arg0: i32) -> (i32, i32) {
    %c0_i32 = arith.constant 0 : i32
    %c0_i32_0 = arith.constant 0 : i32
    %c0_i32_1 = arith.constant 0 : i32
    return %c0_i32, %c0_i32_0 : i32, i32
  }
  func.func @transform_5(%arg0: i32) -> (i32, i32) {
    %c0_i32 = arith.constant 0 : i32
    %c0_i32_0 = arith.constant 0 : i32
    %c0_i32_1 = arith.constant 0 : i32
    return %c0_i32, %c0_i32_0 : i32, i32
  }
  func.func @transform_6(%arg0: i32) -> (i32, i32) {
    %c0_i32 = arith.constant 0 : i32
    %c0_i32_0 = arith.constant 0 : i32
    %c0_i32_1 = arith.constant 0 : i32
    return %c0_i32, %c0_i32_0 : i32, i32
  }
  func.func @transform_7(%arg0: i32) -> i32 {
    %c0_i32 = arith.constant 0 : i32
    %c0_i32_0 = arith.constant 0 : i32
    return %c0_i32 : i32
  }
  func.func @transform_8(%arg0: i32) -> (i32, i32) {
    %c0_i32 = arith.constant 0 : i32
    %c0_i32_0 = arith.constant 0 : i32
    return %arg0, %c0_i32 : i32, i32
  }
}

</mosaic_0001>

<bundles_post_ra>
// kernel: tpu_custom_call.1
= control target key start
LH: loop header
LB: loop body
LE: loop exit
PB: predicated region body
PF: predicated region fallthrough
CT: control target
= control target key end

     0   :  { %s11441_s0 = inlined_call_operand.vmem [shape: bf16[8,2048], index: 0, kind: input, shape index: {}]   ;;  %s11442_s1 = inlined_call_operand.vmem [shape: bf16[2048,676], index: 1, kind: input, shape index: {}]   ;;  %s11443_s2 = inlined_call_operand.vmem [shape: f32[1,676], index: 2, kind: input, shape index: {}]   ;;  %s11444_s3 = inlined_call_operand.vmem [shape: f32[1,676], index: 3, kind: input, shape index: {}]   ;;  %s11445_s4 = inlined_call_operand.vmem [shape: f32[676,4], index: 4, kind: input, shape index: {}]   ;;  %s11446_s5 = inlined_call_operand.vmem [shape: f32[4,16], index: 5, kind: input, shape index: {}]   ;;  %s11447_s6 = inlined_call_operand.vmem [shape: f32[1,16], index: 6, kind: input, shape index: {}]   ;;  %s11448_s7 = inlined_call_operand.<no memory space> [shape: f32[1], index: 7, kind: input, shape index: {}]   ;;  %s11449_s8 = inlined_call_operand.hbm [shape: f32[8,16], index: 8, kind: output, shape index: {}]  }
   0x1   :  { %v7323_v0 = vld [vmem:[%s11442_s1 + $0x4] ss:$24 sps:$4 sm:$0xff]   ;;  %v7327_v2 = vld [vmem:[%s11442_s1] ss:$24 sps:$4 sm:$0xff]   ;;  %v7329_v4 = vld [vmem:[%s11442_s1 + $0x34] ss:$24 sps:$4 sm:$0xff]  }
   0x2   :  { %v7325_v1 = vld [vmem:[%s11442_s1 + $0x904] ss:$24 sps:$4 sm:$0xff]   ;;  %4704 = vmatprep.subr.bf16.mxu1 %v7323_v0  ;;  %v7328_v3 = vld [vmem:[%s11442_s1 + $0x900] ss:$24 sps:$4 sm:$0xff]   ;;  %v7331_v5 = vld [vmem:[%s11442_s1 + $0x934] ss:$24 sps:$4 sm:$0xff]  }
   0x3   :  { %4827 = vmatprep.subr.bf16.mxu0 %v7325_v1  ;;  %4705 = vmatpush1.bf16.msra.mxu1 %v7327_v2  ;;  %v7333_v6 = vld [vmem:[%s11442_s1 + $0x30] ss:$24 sps:$4 sm:$0xff]   ;;  %v7335_v8 = vld [vmem:[%s11442_s1 + $0x64] ss:$24 sps:$4 sm:$0xff]   ;;  %v7339_v10 = vld [vmem:[%s11442_s1 + $0x60] ss:$24 sps:$4 sm:$0xff]  }
   0x4   :  { %4828 = vmatpush1.bf16.msra.mxu0 %v7328_v3  ;;  %4706 = vmatprep.subr.bf16.mxu1 %v7329_v4  ;;  %v7334_v7 = vld [vmem:[%s11442_s1 + $0x930] ss:$24 sps:$4 sm:$0xff]   ;;  %v7337_v9 = vld [vmem:[%s11442_s1 + $0x964] ss:$24 sps:$4 sm:$0xff]   ;;  %v7340_v11 = vld [vmem:[%s11442_s1 + $0x960] ss:$24 sps:$4 sm:$0xff]  }
   0x5   :  { %4829 = vmatprep.subr.bf16.mxu0 %v7331_v5  ;;  %v7341_v12 = vld [vmem:[%s11442_s1 + $0x94] ss:$24 sps:$4 sm:$0xff]   ;;  %v7345_v14 = vld [vmem:[%s11442_s1 + $0x90] ss:$24 sps:$4 sm:$0xff]   ;;  %v7347_v16 = vld [vmem:[%s11442_s1 + $0xc4] ss:$24 sps:$4 sm:$0xff]  }
   0x6   :  { %v7343_v13 = vld [vmem:[%s11442_s1 + $0x994] ss:$24 sps:$4 sm:$0xff]   ;;  %v7346_v15 = vld [vmem:[%s11442_s1 + $0x990] ss:$24 sps:$4 sm:$0xff]   ;;  %v7349_v17 = vld [vmem:[%s11442_s1 + $0x9c4] ss:$24 sps:$4 sm:$0xff]  }
   0x7   :  { %4707 = vmatpush1.bf16.msra.mxu1 %v7333_v6  ;;  %v7351_v18 = vld [vmem:[%s11442_s1 + $0xc0] ss:$24 sps:$4 sm:$0xff]   ;;  %v7353_v20 = vld [vmem:[%s11442_s1 + $0xf4] ss:$24 sps:$4 sm:$0xff]   ;;  %v7357_v22 = vld [vmem:[%s11442_s1 + $0xf0] ss:$24 sps:$4 sm:$0xff]  }
   0x8   :  { %4830 = vmatpush1.bf16.msra.mxu0 %v7334_v7  ;;  %4708 = vmatprep.subr.bf16.mxu1 %v7335_v8  ;;  %v7352_v19 = vld [vmem:[%s11442_s1 + $0x9c0] ss:$24 sps:$4 sm:$0xff]   ;;  %v7355_v21 = vld [vmem:[%s11442_s1 + $0x9f4] ss:$24 sps:$4 sm:$0xff]   ;;  %v7358_v23 = vld [vmem:[%s11442_s1 + $0x9f0] ss:$24 sps:$4 sm:$0xff]  }
   0x9   :  { %4831 = vmatprep.subr.bf16.mxu0 %v7337_v9  ;;  %v7359_v24 = vld [vmem:[%s11442_s1 + $0x124] ss:$24 sps:$4 sm:$0xff]   ;;  %v7363_v26 = vld [vmem:[%s11442_s1 + $0x120] ss:$24 sps:$4 sm:$0xff]   ;;  %v7365_v28 = vld [vmem:[%s11442_s1 + $0x154] ss:$24 sps:$4 sm:$0xff]  }
   0xa   :  { %v7361_v25 = vld [vmem:[%s11442_s1 + $0xa24] ss:$24 sps:$4 sm:$0xff]   ;;  %v7364_v27 = vld [vmem:[%s11442_s1 + $0xa20] ss:$24 sps:$4 sm:$0xff]   ;;  %v7367_v29 = vld [vmem:[%s11442_s1 + $0xa54] ss:$24 sps:$4 sm:$0xff]  }
   0xb   :  { %4709 = vmatpush1.bf16.msra.mxu1 %v7339_v10  ;;  %v7369_v30 = vld [vmem:[%s11442_s1 + $0x150] ss:$24 sps:$4 sm:$0xff]   ;;  %v7371_v32 = vld [vmem:[%s11442_s1 + $0x184] ss:$24 sps:$4 sm:$0xff]   ;;  %v7375_v34 = vld [vmem:[%s11442_s1 + $0x180] ss:$24 sps:$4 sm:$0xff]  }
   0xc   :  { %4832 = vmatpush1.bf16.msra.mxu0 %v7340_v11  ;;  %4710 = vmatprep.subr.bf16.mxu1 %v7341_v12  ;;  %v7370_v31 = vld [vmem:[%s11442_s1 + $0xa50] ss:$24 sps:$4 sm:$0xff]   ;;  %v7373_v33 = vld [vmem:[%s11442_s1 + $0xa84] ss:$24 sps:$4 sm:$0xff]   ;;  %v7376_v35 = vld [vmem:[%s11442_s1 + $0xa80] ss:$24 sps:$4 sm:$0xff]  }
   0xd   :  { %4833 = vmatprep.subr.bf16.mxu0 %v7343_v13  ;;  %v7377_v36 = vld [vmem:[%s11442_s1 + $0x1b4] ss:$24 sps:$4 sm:$0xff]   ;;  %v7381_v38 = vld [vmem:[%s11442_s1 + $0x1b0] ss:$24 sps:$4 sm:$0xff]   ;;  %v7383_v40 = vld [vmem:[%s11442_s1 + $0x1e4] ss:$24 sps:$4 sm:$0xff]  }
   0xe   :  { %v7379_v37 = vld [vmem:[%s11442_s1 + $0xab4] ss:$24 sps:$4 sm:$0xff]   ;;  %v7382_v39 = vld [vmem:[%s11442_s1 + $0xab0] ss:$24 sps:$4 sm:$0xff]   ;;  %v7385_v41 = vld [vmem:[%s11442_s1 + $0xae4] ss:$24 sps:$4 sm:$0xff]  }
   0xf   :  { %4711 = vmatpush1.bf16.msra.mxu1 %v7345_v14  ;;  %v7387_v42 = vld [vmem:[%s11442_s1 + $0x1e0] ss:$24 sps:$4 sm:$0xff]   ;;  %v7389_v44 = vld [vmem:[%s11442_s1 + $0x214] ss:$24 sps:$4 sm:$0xff]   ;;  %v7393_v47 = vld [vmem:[%s11442_s1 + $0x210] ss:$24 sps:$4 sm:$0xff]  }
  0x10   :  { %4834 = vmatpush1.bf16.msra.mxu0 %v7346_v15  ;;  %4712 = vmatprep.subr.bf16.mxu1 %v7347_v16  ;;  %v7388_v43 = vld [vmem:[%s11442_s1 + $0xae0] ss:$24 sps:$4 sm:$0xff]   ;;  %v7391_v45 = vld [vmem:[%s11442_s1 + $0xb14] ss:$24 sps:$4 sm:$0xff]   ;;  %v7394_v49 = vld [vmem:[%s11442_s1 + $0xb10] ss:$24 sps:$4 sm:$0xff]  }
  0x11   :  { %4835 = vmatprep.subr.bf16.mxu0 %v7349_v17  ;;  %v32_v46 = vld [vmem:[%s11441_s0] sm:$0xff]  ;;  %v35_v50 = vld [vmem:[%s11441_s0 + $0x18] sm:$0xff]  ;;  %v7401_v56 = vld [vmem:[%s11442_s1 + $0x274] ss:$24 sps:$4 sm:$0xff]  }
  0x12   :  { %v8776_v48 = vcombine.high %v32_v46, %v32_v46  ;;  %v7395_v51 = vld [vmem:[%s11442_s1 + $0x244] ss:$24 sps:$4 sm:$0xff]   ;;  %v8790_v53 = vcombine.high %v35_v50, %v35_v50  ;;  %v7399_v54 = vld [vmem:[%s11442_s1 + $0x240] ss:$24 sps:$4 sm:$0xff]   ;;  %v7403_v57 = vld [vmem:[%s11442_s1 + $0xb74] ss:$24 sps:$4 sm:$0xff]   ;;  %v8842_v6 = vcombine.low %v32_v46, %v32_v46  ;;  %v8844_v7 = vcombine.low %v35_v50, %v35_v50 }
  0x13   :  { %4713 = vmatpush1.bf16.msra.mxu1 %v7351_v18  ;;  %v7397_v52 = vld [vmem:[%s11442_s1 + $0xb44] ss:$24 sps:$4 sm:$0xff]   ;;  %v7400_v55 = vld [vmem:[%s11442_s1 + $0xb40] ss:$24 sps:$4 sm:$0xff]   ;;  %v7405_v58 = vld [vmem:[%s11442_s1 + $0x270] ss:$24 sps:$4 sm:$0xff]  }
  0x14   :  { %4836 = vmatpush1.bf16.msra.mxu0 %v7352_v19  ;;  %4714 = vmatprep.subr.bf16.mxu1 %v7353_v20  ;;  %v7406_v59 = vld [vmem:[%s11442_s1 + $0xb70] ss:$24 sps:$4 sm:$0xff]   ;;  %v7407_v60 = vld [vmem:[%s11442_s1 + $0x2a4] ss:$24 sps:$4 sm:$0xff]   ;;  %v7411_v62 = vld [vmem:[%s11442_s1 + $0x2a0] ss:$24 sps:$4 sm:$0xff]  }
  0x15   :  { %4837 = vmatprep.subr.bf16.mxu0 %v7355_v21  ;;  %4736 = vmatprep.mubr.bf16.mxu1 %v8776_v48  ;;  %v7409_v61 = vld [vmem:[%s11442_s1 + $0xba4] ss:$24 sps:$4 sm:$0xff]   ;;  %v7412_v63 = vld [vmem:[%s11442_s1 + $0xba0] ss:$24 sps:$4 sm:$0xff]   ;;  %v7413_v0 = vld [vmem:[%s11442_s1 + $0x2d4] ss:$24 sps:$4 sm:$0xff]  }
  0x16   :  { %4859 = vmatprep.mubr.bf16.mxu0 %v8790_v53  ;;  %v7415_v1 = vld [vmem:[%s11442_s1 + $0xbd4] ss:$24 sps:$4 sm:$0xff]   ;;  %v7417_v2 = vld [vmem:[%s11442_s1 + $0x2d0] ss:$24 sps:$4 sm:$0xff]   ;;  %v7422_v4 = vld [vmem:[%s11442_s1 + $0x304] ss:$24 sps:$4 sm:$0xff]  }
  0x17   :  { %4715 = vmatpush1.bf16.msra.mxu1 %v7357_v22  ;;  %v7418_v3 = vld [vmem:[%s11442_s1 + $0xbd0] ss:$24 sps:$4 sm:$0xff]   ;;  %v7426_v5 = vld [vmem:[%s11442_s1 + $0xc04] ss:$24 sps:$4 sm:$0xff]   ;;  %v7420_v8 = vld [vmem:[%s11442_s1 + $0x300] ss:$24 sps:$4 sm:$0xff]  }
  0x18   :  { %4838 = vmatpush1.bf16.msra.mxu0 %v7358_v23  ;;  %4716 = vmatprep.subr.bf16.mxu1 %v7359_v24  ;;  %v7424_v9 = vld [vmem:[%s11442_s1 + $0xc00] ss:$24 sps:$4 sm:$0xff]   ;;  %v7431_v10 = vld [vmem:[%s11442_s1 + $0x334] ss:$24 sps:$4 sm:$0xff]   ;;  %v7429_v12 = vld [vmem:[%s11442_s1 + $0x330] ss:$24 sps:$4 sm:$0xff]  }
  0x19   :  { %4839 = vmatprep.subr.bf16.mxu0 %v7361_v25  ;;  %v7434_v11 = vld [vmem:[%s11442_s1 + $0xc34] ss:$24 sps:$4 sm:$0xff]   ;;  %v7432_v13 = vld [vmem:[%s11442_s1 + $0xc30] ss:$24 sps:$4 sm:$0xff]   ;;  %v7437_v14 = vld [vmem:[%s11442_s1 + $0x364] ss:$24 sps:$4 sm:$0xff]  }
  0x1a   :  { %v7440_v15 = vld [vmem:[%s11442_s1 + $0xc64] ss:$24 sps:$4 sm:$0xff]   ;;  %v7435_v16 = vld [vmem:[%s11442_s1 + $0x360] ss:$24 sps:$4 sm:$0xff]   ;;  %v7443_v18 = vld [vmem:[%s11442_s1 + $0x394] ss:$24 sps:$4 sm:$0xff]  }
  0x1b   :  { %4717 = vmatpush1.bf16.msra.mxu1 %v7363_v26  ;;  %v7438_v17 = vld [vmem:[%s11442_s1 + $0xc60] ss:$24 sps:$4 sm:$0xff]   ;;  %v7446_v19 = vld [vmem:[%s11442_s1 + $0xc94] ss:$24 sps:$4 sm:$0xff]   ;;  %v7441_v20 = vld [vmem:[%s11442_s1 + $0x390] ss:$24 sps:$4 sm:$0xff]  }
  0x1c   :  { %4840 = vmatpush1.bf16.msra.mxu0 %v7364_v27  ;;  %4718 = vmatprep.subr.bf16.mxu1 %v7365_v28  ;;  %v7444_v21 = vld [vmem:[%s11442_s1 + $0xc90] ss:$24 sps:$4 sm:$0xff]   ;;  %v7449_v22 = vld [vmem:[%s11442_s1 + $0x3c4] ss:$24 sps:$4 sm:$0xff]   ;;  %v7447_v24 = vld [vmem:[%s11442_s1 + $0x3c0] ss:$24 sps:$4 sm:$0xff]  }
  0x1d   :  { %4841 = vmatprep.subr.bf16.mxu0 %v7367_v29  ;;  %v7452_v23 = vld [vmem:[%s11442_s1 + $0xcc4] ss:$24 sps:$4 sm:$0xff]   ;;  %v7450_v25 = vld [vmem:[%s11442_s1 + $0xcc0] ss:$24 sps:$4 sm:$0xff]   ;;  %v7455_v26 = vld [vmem:[%s11442_s1 + $0x3f4] ss:$24 sps:$4 sm:$0xff]  }
  0x1e   :  { %v7458_v27 = vld [vmem:[%s11442_s1 + $0xcf4] ss:$24 sps:$4 sm:$0xff]   ;;  %v7453_v28 = vld [vmem:[%s11442_s1 + $0x3f0] ss:$24 sps:$4 sm:$0xff]  }
  0x1f   :  { %4719 = vmatpush1.bf16.msra.mxu1 %v7369_v30  ;;  %v7456_v29 = vld [vmem:[%s11442_s1 + $0xcf0] ss:$24 sps:$4 sm:$0xff]   ;;  %v7461_v30 = vld [vmem:[%s11442_s1 + $0x424] ss:$24 sps:$4 sm:$0xff]   ;;  %v7479_v46 = vld [vmem:[%s11442_s1 + $0x4b4] ss:$24 sps:$4 sm:$0xff]  }
  0x20   :  { %4842 = vmatpush1.bf16.msra.mxu0 %v7370_v31  ;;  %4720 = vmatprep.subr.bf16.mxu1 %v7371_v32  ;;  %v7464_v31 = vld [vmem:[%s11442_s1 + $0xd24] ss:$24 sps:$4 sm:$0xff]   ;;  %v8923_v32 = vld [vmem:[%s11441_s0 + $0x8] sm:$0xff] }
  0x21   :  { %4843 = vmatprep.subr.bf16.mxu0 %v7373_v33  ;;  %v7459_v33 = vld [vmem:[%s11442_s1 + $0x420] ss:$24 sps:$4 sm:$0xff]   ;;  %v7480_v50 = vld [vmem:[%s11442_s1 + $0xdb0] ss:$24 sps:$4 sm:$0xff]  }
  0x23   :  { %4721 = vmatpush1.bf16.msra.mxu1 %v7375_v34  ;;  %v7462_v34 = vld [vmem:[%s11442_s1 + $0xd20] ss:$24 sps:$4 sm:$0xff]  }
  0x24   :  { %4844 = vmatpush1.bf16.msra.mxu0 %v7376_v35  ;;  %4722 = vmatprep.subr.bf16.mxu1 %v7377_v36  ;;  %v8933_v35 = vcombine.high %v8923_v32, %v8923_v32  ;;  %v8938_v36 = vld [vmem:[%s11441_s0 + $0x20] sm:$0xff] }
  0x25   :  { %4845 = vmatprep.subr.bf16.mxu0 %v7379_v37  ;;  %v7467_v37 = vld [vmem:[%s11442_s1 + $0x454] ss:$24 sps:$4 sm:$0xff]  }
  0x27   :  { %4723 = vmatpush1.bf16.msra.mxu1 %v7381_v38  ;;  %v8945_v38 = vcombine.high %v8938_v36, %v8938_v36 }
  0x28   :  { %4846 = vmatpush1.bf16.msra.mxu0 %v7382_v39  ;;  %4724 = vmatprep.subr.bf16.mxu1 %v7383_v40  ;;  %v7470_v39 = vld [vmem:[%s11442_s1 + $0xd54] ss:$24 sps:$4 sm:$0xff]   ;;  %v7465_v40 = vld [vmem:[%s11442_s1 + $0x450] ss:$24 sps:$4 sm:$0xff]  }
  0x29   :  { %4847 = vmatprep.subr.bf16.mxu0 %v7385_v41  ;;  %v7468_v41 = vld [vmem:[%s11442_s1 + $0xd50] ss:$24 sps:$4 sm:$0xff]  }
  0x2b   :  { %4725 = vmatpush1.bf16.msra.mxu1 %v7387_v42  ;;  %v7473_v42 = vld [vmem:[%s11442_s1 + $0x484] ss:$24 sps:$4 sm:$0xff]  }
  0x2c   :  { %4848 = vmatpush1.bf16.msra.mxu0 %v7388_v43  ;;  %4726 = vmatprep.subr.bf16.mxu1 %v7389_v44  ;;  %v7476_v43 = vld [vmem:[%s11442_s1 + $0xd84] ss:$24 sps:$4 sm:$0xff]   ;;  %v7471_v44 = vld [vmem:[%s11442_s1 + $0x480] ss:$24 sps:$4 sm:$0xff]  }
  0x2d   :  { %4849 = vmatprep.subr.bf16.mxu0 %v7391_v45  ;;  %v7474_v45 = vld [vmem:[%s11442_s1 + $0xd80] ss:$24 sps:$4 sm:$0xff]  }
  0x2f   :  { %4727 = vmatpush1.bf16.msra.mxu1 %v7393_v47  ;;  %v7482_v47 = vld [vmem:[%s11442_s1 + $0xdb4] ss:$24 sps:$4 sm:$0xff]  }
  0x30   :  { %4850 = vmatpush1.bf16.msra.mxu0 %v7394_v49  ;;  %4728 = vmatprep.subr.bf16.mxu1 %v7395_v51  ;;  %v7477_v49 = vld [vmem:[%s11442_s1 + $0x4b0] ss:$24 sps:$4 sm:$0xff]   ;;  %v7485_v51 = vld [vmem:[%s11442_s1 + $0x4e4] ss:$24 sps:$4 sm:$0xff]  }
  0x31   :  { %4851 = vmatprep.subr.bf16.mxu0 %v7397_v52  ;;  %v7488_v52 = vld [vmem:[%s11442_s1 + $0xde4] ss:$24 sps:$4 sm:$0xff]  }
  0x33   :  { %4729 = vmatpush1.bf16.msra.mxu1 %v7399_v54  ;;  %v7483_v54 = vld [vmem:[%s11442_s1 + $0x4e0] ss:$24 sps:$4 sm:$0xff]  }
  0x34   :  { %4852 = vmatpush1.bf16.msra.mxu0 %v7400_v55  ;;  %4730 = vmatprep.subr.bf16.mxu1 %v7401_v56  ;;  %v7486_v55 = vld [vmem:[%s11442_s1 + $0xde0] ss:$24 sps:$4 sm:$0xff]   ;;  %v7491_v56 = vld [vmem:[%s11442_s1 + $0x514] ss:$24 sps:$4 sm:$0xff]  }
  0x35   :  { %4853 = vmatprep.subr.bf16.mxu0 %v7403_v57  ;;  %v7494_v57 = vld [vmem:[%s11442_s1 + $0xe14] ss:$24 sps:$4 sm:$0xff]  }
  0x37   :  { %4731 = vmatpush1.bf16.msra.mxu1 %v7405_v58  ;;  %v7489_v58 = vld [vmem:[%s11442_s1 + $0x510] ss:$24 sps:$4 sm:$0xff]  }
  0x38   :  { %4854 = vmatpush1.bf16.msra.mxu0 %v7406_v59  ;;  %4732 = vmatprep.subr.bf16.mxu1 %v7407_v60  ;;  %v7492_v59 = vld [vmem:[%s11442_s1 + $0xe10] ss:$24 sps:$4 sm:$0xff]   ;;  %v7497_v60 = vld [vmem:[%s11442_s1 + $0x544] ss:$24 sps:$4 sm:$0xff]  }
  0x39   :  { %4855 = vmatprep.subr.bf16.mxu0 %v7409_v61  ;;  %v7500_v61 = vld [vmem:[%s11442_s1 + $0xe44] ss:$24 sps:$4 sm:$0xff]  }
  0x3b   :  { %4733 = vmatpush1.bf16.msra.mxu1 %v7411_v62  ;;  %v7495_v62 = vld [vmem:[%s11442_s1 + $0x540] ss:$24 sps:$4 sm:$0xff]  }
  0x3c   :  { %4856 = vmatpush1.bf16.msra.mxu0 %v7412_v63  ;;  %4734 = vmatprep.subr.bf16.mxu1 %v7413_v0  ;;  %v7498_v63 = vld [vmem:[%s11442_s1 + $0xe40] ss:$24 sps:$4 sm:$0xff]   ;;  %v7503_v0 = vld [vmem:[%s11442_s1 + $0x574] ss:$24 sps:$4 sm:$0xff]  }
  0x3d   :  { %4857 = vmatprep.subr.bf16.mxu0 %v7415_v1  ;;  %v7506_v1 = vld [vmem:[%s11442_s1 + $0xe74] ss:$24 sps:$4 sm:$0xff]  }
  0x3f   :  { %4735 = vmatpush1.bf16.msra.mxu1 %v7417_v2  ;;  %v7501_v2 = vld [vmem:[%s11442_s1 + $0x570] ss:$24 sps:$4 sm:$0xff]  }
  0x40   :  { %4858 = vmatpush1.bf16.msra.mxu0 %v7418_v3  ;;  %4745 = vmatprep.subr.bf16.mxu1 %v7422_v4  ;;  %v7504_v3 = vld [vmem:[%s11442_s1 + $0xe70] ss:$24 sps:$4 sm:$0xff]   ;;  %v7509_v4 = vld [vmem:[%s11442_s1 + $0x5a4] ss:$24 sps:$4 sm:$0xff]  }
  0x41   :  { %4868 = vmatprep.subr.bf16.mxu0 %v7426_v5  ;;  %v7512_v5 = vld [vmem:[%s11442_s1 + $0xea4] ss:$24 sps:$4 sm:$0xff]  }
  0x42   :  { %4737 = vmatmul.mubr.bf16.vlgmr.msra.gmra.mrb[0].mxu1 %v8842_v6 }
  0x43   :  { %4860 = vmatmul.mubr.bf16.vlgmr.msra.gmra.mrb[0].mxu0 %v8844_v7  ;;  %4746 = vmatpush1.bf16.msra.mxu1 %v7420_v8  ;;  %v7507_v8 = vld [vmem:[%s11442_s1 + $0x5a0] ss:$24 sps:$4 sm:$0xff]  }
  0x44   :  { %4869 = vmatpush1.bf16.msra.mxu0 %v7424_v9  ;;  %4747 = vmatprep.subr.bf16.mxu1 %v7431_v10  ;;  %v7510_v9 = vld [vmem:[%s11442_s1 + $0xea0] ss:$24 sps:$4 sm:$0xff]   ;;  %v7515_v10 = vld [vmem:[%s11442_s1 + $0x5d4] ss:$24 sps:$4 sm:$0xff]  }
  0x45   :  { %4870 = vmatprep.subr.bf16.mxu0 %v7434_v11  ;;  %4777 = vmatprep.mubr.bf16.mxu1 %v8933_v35  ;;  %v7518_v11 = vld [vmem:[%s11442_s1 + $0xed4] ss:$24 sps:$4 sm:$0xff]  }
  0x46   :  { %4900 = vmatprep.mubr.bf16.mxu0 %v8945_v38 }
  0x47   :  { %4748 = vmatpush1.bf16.msra.mxu1 %v7429_v12  ;;  %v7513_v12 = vld [vmem:[%s11442_s1 + $0x5d0] ss:$24 sps:$4 sm:$0xff]  }
  0x48   :  { %4871 = vmatpush1.bf16.msra.mxu0 %v7432_v13  ;;  %4749 = vmatprep.subr.bf16.mxu1 %v7437_v14  ;;  %v7516_v13 = vld [vmem:[%s11442_s1 + $0xed0] ss:$24 sps:$4 sm:$0xff]   ;;  %v7523_v14 = vld [vmem:[%s11442_s1 + $0x604] ss:$24 sps:$4 sm:$0xff]  }
  0x49   :  { %4872 = vmatprep.subr.bf16.mxu0 %v7440_v15  ;;  %v7528_v15 = vld [vmem:[%s11442_s1 + $0xf04] ss:$24 sps:$4 sm:$0xff]  }
  0x4b   :  { %4750 = vmatpush1.bf16.msra.mxu1 %v7435_v16  ;;  %v9062_v16 = vcombine.low %v8923_v32, %v8923_v32  ;;  %v7543_v32 = vld [vmem:[%s11442_s1 + $0x694] ss:$24 sps:$4 sm:$0xff]  }
  0x4c   :  { %4873 = vmatpush1.bf16.msra.mxu0 %v7438_v17  ;;  %4751 = vmatprep.subr.bf16.mxu1 %v7443_v18  ;;  %v7521_v17 = vld [vmem:[%s11442_s1 + $0x600] ss:$24 sps:$4 sm:$0xff]   ;;  %v9069_v18 = vcombine.low %v8938_v36, %v8938_v36  ;;  %v7544_v36 = vld [vmem:[%s11442_s1 + $0xf90] ss:$24 sps:$4 sm:$0xff]  }
  0x4d   :  { %4874 = vmatprep.subr.bf16.mxu0 %v7446_v19  ;;  %v7526_v19 = vld [vmem:[%s11442_s1 + $0xf00] ss:$24 sps:$4 sm:$0xff]  }
  0x4f   :  { %4752 = vmatpush1.bf16.msra.mxu1 %v7441_v20  ;;  %v7531_v20 = vld [vmem:[%s11442_s1 + $0x634] ss:$24 sps:$4 sm:$0xff]  }
  0x50   :  { %4875 = vmatpush1.bf16.msra.mxu0 %v7444_v21  ;;  %4753 = vmatprep.subr.bf16.mxu1 %v7449_v22  ;;  %v7534_v21 = vld [vmem:[%s11442_s1 + $0xf34] ss:$24 sps:$4 sm:$0xff]  }
  0x51   :  { %4876 = vmatprep.subr.bf16.mxu0 %v7452_v23  ;;  %v9083_v22 = vld [vmem:[%s11441_s0 + $0x10] sm:$0xff]  ;;  %v9088_v23 = vld [vmem:[%s11441_s0 + $0x28] sm:$0xff] }
  0x53   :  { %4754 = vmatpush1.bf16.msra.mxu1 %v7447_v24  ;;  %v9092_v24 = vcombine.high %v9083_v22, %v9083_v22 }
  0x54   :  { %4877 = vmatpush1.bf16.msra.mxu0 %v7450_v25  ;;  %4755 = vmatprep.subr.bf16.mxu1 %v7455_v26  ;;  %v9096_v25 = vcombine.high %v9088_v23, %v9088_v23  ;;  %v7529_v26 = vld [vmem:[%s11442_s1 + $0x630] ss:$24 sps:$4 sm:$0xff]  }
  0x55   :  { %4878 = vmatprep.subr.bf16.mxu0 %v7458_v27  ;;  %v7532_v27 = vld [vmem:[%s11442_s1 + $0xf30] ss:$24 sps:$4 sm:$0xff]  }
  0x57   :  { %4756 = vmatpush1.bf16.msra.mxu1 %v7453_v28  ;;  %v7537_v28 = vld [vmem:[%s11442_s1 + $0x664] ss:$24 sps:$4 sm:$0xff]  }
  0x58   :  { %4879 = vmatpush1.bf16.msra.mxu0 %v7456_v29  ;;  %4757 = vmatprep.subr.bf16.mxu1 %v7461_v30  ;;  %v7540_v29 = vld [vmem:[%s11442_s1 + $0xf64] ss:$24 sps:$4 sm:$0xff]   ;;  %v7535_v30 = vld [vmem:[%s11442_s1 + $0x660] ss:$24 sps:$4 sm:$0xff]  }
  0x59   :  { %4880 = vmatprep.subr.bf16.mxu0 %v7464_v31  ;;  %v7538_v31 = vld [vmem:[%s11442_s1 + $0xf60] ss:$24 sps:$4 sm:$0xff]  }
  0x5b   :  { %4758 = vmatpush1.bf16.msra.mxu1 %v7459_v33  ;;  %v7546_v33 = vld [vmem:[%s11442_s1 + $0xf94] ss:$24 sps:$4 sm:$0xff]  }
  0x5c   :  { %4881 = vmatpush1.bf16.msra.mxu0 %v7462_v34  ;;  %4759 = vmatprep.subr.bf16.mxu1 %v7467_v37  ;;  %v7541_v34 = vld [vmem:[%s11442_s1 + $0x690] ss:$24 sps:$4 sm:$0xff]   ;;  %v7549_v37 = vld [vmem:[%s11442_s1 + $0x6c4] ss:$24 sps:$4 sm:$0xff]  }
  0x5d   :  { %4882 = vmatprep.subr.bf16.mxu0 %v7470_v39  ;;  %v7552_v39 = vld [vmem:[%s11442_s1 + $0xfc4] ss:$24 sps:$4 sm:$0xff]  }
  0x5f   :  { %4760 = vmatpush1.bf16.msra.mxu1 %v7465_v40  ;;  %v7547_v40 = vld [vmem:[%s11442_s1 + $0x6c0] ss:$24 sps:$4 sm:$0xff]  }
  0x60   :  { %4883 = vmatpush1.bf16.msra.mxu0 %v7468_v41  ;;  %4761 = vmatprep.subr.bf16.mxu1 %v7473_v42  ;;  %v7550_v41 = vld [vmem:[%s11442_s1 + $0xfc0] ss:$24 sps:$4 sm:$0xff]   ;;  %v7555_v42 = vld [vmem:[%s11442_s1 + $0x6f4] ss:$24 sps:$4 sm:$0xff]  }
  0x61   :  { %4884 = vmatprep.subr.bf16.mxu0 %v7476_v43  ;;  %v7558_v43 = vld [vmem:[%s11442_s1 + $0xff4] ss:$24 sps:$4 sm:$0xff]  }
  0x63   :  { %4762 = vmatpush1.bf16.msra.mxu1 %v7471_v44  ;;  %v7553_v44 = vld [vmem:[%s11442_s1 + $0x6f0] ss:$24 sps:$4 sm:$0xff]  }
  0x64   :  { %4885 = vmatpush1.bf16.msra.mxu0 %v7474_v45  ;;  %4763 = vmatprep.subr.bf16.mxu1 %v7479_v46  ;;  %v7556_v45 = vld [vmem:[%s11442_s1 + $0xff0] ss:$24 sps:$4 sm:$0xff]   ;;  %v7561_v46 = vld [vmem:[%s11442_s1 + $0x724] ss:$24 sps:$4 sm:$0xff]  }
  0x65   :  { %4886 = vmatprep.subr.bf16.mxu0 %v7482_v47  ;;  %v7564_v47 = vld [vmem:[%s11442_s1 + $0x1024] ss:$24 sps:$4 sm:$0xff]  }
  0x67   :  { %4764 = vmatpush1.bf16.msra.mxu1 %v7477_v49  ;;  %v7559_v49 = vld [vmem:[%s11442_s1 + $0x720] ss:$24 sps:$4 sm:$0xff]  }
  0x68   :  { %4887 = vmatpush1.bf16.msra.mxu0 %v7480_v50  ;;  %4765 = vmatprep.subr.bf16.mxu1 %v7485_v51  ;;  %v7562_v50 = vld [vmem:[%s11442_s1 + $0x1020] ss:$24 sps:$4 sm:$0xff]   ;;  %v7567_v51 = vld [vmem:[%s11442_s1 + $0x754] ss:$24 sps:$4 sm:$0xff]  }
  0x69   :  { %4888 = vmatprep.subr.bf16.mxu0 %v7488_v52  ;;  %v7570_v52 = vld [vmem:[%s11442_s1 + $0x1054] ss:$24 sps:$4 sm:$0xff]  }
  0x6b   :  { %4766 = vmatpush1.bf16.msra.mxu1 %v7483_v54  ;;  %v7565_v54 = vld [vmem:[%s11442_s1 + $0x750] ss:$24 sps:$4 sm:$0xff]  }
  0x6c   :  { %4889 = vmatpush1.bf16.msra.mxu0 %v7486_v55  ;;  %4767 = vmatprep.subr.bf16.mxu1 %v7491_v56  ;;  %v7568_v55 = vld [vmem:[%s11442_s1 + $0x1050] ss:$24 sps:$4 sm:$0xff]   ;;  %v7573_v56 = vld [vmem:[%s11442_s1 + $0x784] ss:$24 sps:$4 sm:$0xff]  }
  0x6d   :  { %4890 = vmatprep.subr.bf16.mxu0 %v7494_v57  ;;  %v7576_v57 = vld [vmem:[%s11442_s1 + $0x1084] ss:$24 sps:$4 sm:$0xff]  }
  0x6f   :  { %4768 = vmatpush1.bf16.msra.mxu1 %v7489_v58  ;;  %v7571_v58 = vld [vmem:[%s11442_s1 + $0x780] ss:$24 sps:$4 sm:$0xff]  }
  0x70   :  { %4891 = vmatpush1.bf16.msra.mxu0 %v7492_v59  ;;  %4769 = vmatprep.subr.bf16.mxu1 %v7497_v60  ;;  %v7574_v59 = vld [vmem:[%s11442_s1 + $0x1080] ss:$24 sps:$4 sm:$0xff]   ;;  %v7579_v60 = vld [vmem:[%s11442_s1 + $0x7b4] ss:$24 sps:$4 sm:$0xff]  }
  0x71   :  { %4892 = vmatprep.subr.bf16.mxu0 %v7500_v61  ;;  %v7582_v61 = vld [vmem:[%s11442_s1 + $0x10b4] ss:$24 sps:$4 sm:$0xff]  }
  0x73   :  { %4770 = vmatpush1.bf16.msra.mxu1 %v7495_v62  ;;  %v7577_v62 = vld [vmem:[%s11442_s1 + $0x7b0] ss:$24 sps:$4 sm:$0xff]  }
  0x74   :  { %4893 = vmatpush1.bf16.msra.mxu0 %v7498_v63  ;;  %4771 = vmatprep.subr.bf16.mxu1 %v7503_v0  ;;  %v7580_v63 = vld [vmem:[%s11442_s1 + $0x10b0] ss:$24 sps:$4 sm:$0xff]   ;;  %v7585_v0 = vld [vmem:[%s11442_s1 + $0x7e4] ss:$24 sps:$4 sm:$0xff]  }
  0x75   :  { %4894 = vmatprep.subr.bf16.mxu0 %v7506_v1  ;;  %v7588_v1 = vld [vmem:[%s11442_s1 + $0x10e4] ss:$24 sps:$4 sm:$0xff]  }
  0x77   :  { %4772 = vmatpush1.bf16.msra.mxu1 %v7501_v2  ;;  %v7583_v2 = vld [vmem:[%s11442_s1 + $0x7e0] ss:$24 sps:$4 sm:$0xff]  }
  0x78   :  { %4895 = vmatpush1.bf16.msra.mxu0 %v7504_v3  ;;  %4773 = vmatprep.subr.bf16.mxu1 %v7509_v4  ;;  %v7586_v3 = vld [vmem:[%s11442_s1 + $0x10e0] ss:$24 sps:$4 sm:$0xff]   ;;  %v7591_v4 = vld [vmem:[%s11442_s1 + $0x814] ss:$24 sps:$4 sm:$0xff]  }
  0x79   :  { %4896 = vmatprep.subr.bf16.mxu0 %v7512_v5  ;;  %v7594_v5 = vld [vmem:[%s11442_s1 + $0x1114] ss:$24 sps:$4 sm:$0xff]  }
  0x7b   :  { %4774 = vmatpush1.bf16.msra.mxu1 %v7507_v8  ;;  %v7589_v8 = vld [vmem:[%s11442_s1 + $0x810] ss:$24 sps:$4 sm:$0xff]  }
  0x7c   :  { %4897 = vmatpush1.bf16.msra.mxu0 %v7510_v9  ;;  %4775 = vmatprep.subr.bf16.mxu1 %v7515_v10  ;;  %v7592_v9 = vld [vmem:[%s11442_s1 + $0x1110] ss:$24 sps:$4 sm:$0xff]   ;;  %v7597_v10 = vld [vmem:[%s11442_s1 + $0x844] ss:$24 sps:$4 sm:$0xff]  }
  0x7d   :  { %4898 = vmatprep.subr.bf16.mxu0 %v7518_v11  ;;  %v7600_v11 = vld [vmem:[%s11442_s1 + $0x1144] ss:$24 sps:$4 sm:$0xff]  }
  0x7f   :  { %4776 = vmatpush1.bf16.msra.mxu1 %v7513_v12  ;;  %v7595_v12 = vld [vmem:[%s11442_s1 + $0x840] ss:$24 sps:$4 sm:$0xff]  }
  0x80   :  { %4899 = vmatpush1.bf16.msra.mxu0 %v7516_v13  ;;  %4786 = vmatprep.subr.bf16.mxu1 %v7523_v14  ;;  %v7598_v13 = vld [vmem:[%s11442_s1 + $0x1140] ss:$24 sps:$4 sm:$0xff]   ;;  %v7603_v14 = vld [vmem:[%s11442_s1 + $0x874] ss:$24 sps:$4 sm:$0xff]  }
  0x81   :  { %4909 = vmatprep.subr.bf16.mxu0 %v7528_v15  ;;  %v7606_v15 = vld [vmem:[%s11442_s1 + $0x1174] ss:$24 sps:$4 sm:$0xff]  }
  0x82   :  { %4778 = vmatmul.mubr.bf16.vlgmr.msra.gmra.mrb[0].mxu1 %v9062_v16 }
  0x83   :  { %4901 = vmatmul.mubr.bf16.vlgmr.msra.gmra.mrb[0].mxu0 %v9069_v18  ;;  %4787 = vmatpush1.bf16.msra.mxu1 %v7521_v17  ;;  %v7601_v17 = vld [vmem:[%s11442_s1 + $0x870] ss:$24 sps:$4 sm:$0xff]  }
  0x84   :  { %4910 = vmatpush1.bf16.msra.mxu0 %v7526_v19  ;;  %4788 = vmatprep.subr.bf16.mxu1 %v7531_v20  ;;  %v7604_v19 = vld [vmem:[%s11442_s1 + $0x1170] ss:$24 sps:$4 sm:$0xff]   ;;  %v7609_v20 = vld [vmem:[%s11442_s1 + $0x8a4] ss:$24 sps:$4 sm:$0xff]  }
  0x85   :  { %4911 = vmatprep.subr.bf16.mxu0 %v7534_v21  ;;  %4818 = vmatprep.mubr.bf16.mxu1 %v9092_v24  ;;  %v7612_v21 = vld [vmem:[%s11442_s1 + $0x11a4] ss:$24 sps:$4 sm:$0xff]  }
  0x86   :  { %4941 = vmatprep.mubr.bf16.mxu0 %v9096_v25 }
  0x87   :  { %4789 = vmatpush1.bf16.msra.mxu1 %v7529_v26  ;;  %v7607_v26 = vld [vmem:[%s11442_s1 + $0x8a0] ss:$24 sps:$4 sm:$0xff]  }
  0x88   :  { %4912 = vmatpush1.bf16.msra.mxu0 %v7532_v27  ;;  %4790 = vmatprep.subr.bf16.mxu1 %v7537_v28  ;;  %v7610_v27 = vld [vmem:[%s11442_s1 + $0x11a0] ss:$24 sps:$4 sm:$0xff]   ;;  %v7615_v28 = vld [vmem:[%s11442_s1 + $0x8d4] ss:$24 sps:$4 sm:$0xff]  }
  0x89   :  { %4913 = vmatprep.subr.bf16.mxu0 %v7540_v29  ;;  %v7618_v29 = vld [vmem:[%s11442_s1 + $0x11d4] ss:$24 sps:$4 sm:$0xff]  }
  0x8b   :  { %4791 = vmatpush1.bf16.msra.mxu1 %v7535_v30  ;;  %v7613_v30 = vld [vmem:[%s11442_s1 + $0x8d0] ss:$24 sps:$4 sm:$0xff]  }
  0x8c   :  { %4914 = vmatpush1.bf16.msra.mxu0 %v7538_v31  ;;  %4792 = vmatprep.subr.bf16.mxu1 %v7543_v32  ;;  %v7616_v31 = vld [vmem:[%s11442_s1 + $0x11d0] ss:$24 sps:$4 sm:$0xff]   ;;  %v7625_v32 = vld [vmem:[%s11442_s1 + $0x1204] ss:$24 sps:$4 sm:$0xff]  }
  0x8d   :  { %4915 = vmatprep.subr.bf16.mxu0 %v7546_v33  ;;  %v7628_v33 = vld [vmem:[%s11442_s1 + $0xc] ss:$24 sps:$4 sm:$0xff]  }
  0x8f   :  { %4793 = vmatpush1.bf16.msra.mxu1 %v7541_v34  ;;  %v9284_v34 = vcombine.low %v9083_v22, %v9083_v22  ;;  %v7626_v22 = vld [vmem:[%s11442_s1 + $0x8] ss:$24 sps:$4 sm:$0xff]  }
  0x90   :  { %4916 = vmatpush1.bf16.msra.mxu0 %v7544_v36  ;;  %4794 = vmatprep.subr.bf16.mxu1 %v7549_v37  ;;  %v9288_v36 = vcombine.low %v9088_v23, %v9088_v23  ;;  %v7623_v37 = vld [vmem:[%s11442_s1 + $0x1200] ss:$24 sps:$4 sm:$0xff]   ;;  %v7631_v23 = vld [vmem:[%s11442_s1 + $0x1234] ss:$24 sps:$4 sm:$0xff]  }
  0x91   :  { %4917 = vmatprep.subr.bf16.mxu0 %v7552_v39  ;;  %v9296_v39 = vld [vmem:[%s11441_s0 + $0x30] sm:$0xff] }
  0x93   :  { %4795 = vmatpush1.bf16.msra.mxu1 %v7547_v40  ;;  %v7634_v40 = vld [vmem:[%s11442_s1 + $0x3c] ss:$24 sps:$4 sm:$0xff]  }
  0x94   :  { %4918 = vmatpush1.bf16.msra.mxu0 %v7550_v41  ;;  %4796 = vmatprep.subr.bf16.mxu1 %v7555_v42  ;;  %v9309_v41 = vcombine.high %v9296_v39, %v9296_v39  ;;  %v7629_v42 = vld [vmem:[%s11442_s1 + $0x1230] ss:$24 sps:$4 sm:$0xff]  }
  0x95   :  { %4919 = vmatprep.subr.bf16.mxu0 %v7558_v43  ;;  %v7632_v43 = vld [vmem:[%s11442_s1 + $0x38] ss:$24 sps:$4 sm:$0xff]  }
  0x97   :  { %4797 = vmatpush1.bf16.msra.mxu1 %v7553_v44  ;;  %v7637_v44 = vld [vmem:[%s11442_s1 + $0x1264] ss:$24 sps:$4 sm:$0xff]  }
  0x98   :  { %4920 = vmatpush1.bf16.msra.mxu0 %v7556_v45  ;;  %4798 = vmatprep.subr.bf16.mxu1 %v7561_v46  ;;  %v7640_v45 = vld [vmem:[%s11442_s1 + $0x6c] ss:$24 sps:$4 sm:$0xff]   ;;  %v7635_v46 = vld [vmem:[%s11442_s1 + $0x1260] ss:$24 sps:$4 sm:$0xff]  }
  0x99   :  { %4921 = vmatprep.subr.bf16.mxu0 %v7564_v47  ;;  %v7638_v47 = vld [vmem:[%s11442_s1 + $0x68] ss:$24 sps:$4 sm:$0xff]  }
  0x9b   :  { %4799 = vmatpush1.bf16.msra.mxu1 %v7559_v49  ;;  %v7643_v49 = vld [vmem:[%s11442_s1 + $0x1294] ss:$24 sps:$4 sm:$0xff]  }
  0x9c   :  { %4922 = vmatpush1.bf16.msra.mxu0 %v7562_v50  ;;  %4800 = vmatprep.subr.bf16.mxu1 %v7567_v51  ;;  %v7646_v50 = vld [vmem:[%s11442_s1 + $0x9c] ss:$24 sps:$4 sm:$0xff]   ;;  %v7641_v51 = vld [vmem:[%s11442_s1 + $0x1290] ss:$24 sps:$4 sm:$0xff]  }
  0x9d   :  { %4923 = vmatprep.subr.bf16.mxu0 %v7570_v52  ;;  %v7644_v52 = vld [vmem:[%s11442_s1 + $0x98] ss:$24 sps:$4 sm:$0xff]  }
  0x9f   :  { %4801 = vmatpush1.bf16.msra.mxu1 %v7565_v54  ;;  %v7649_v54 = vld [vmem:[%s11442_s1 + $0x12c4] ss:$24 sps:$4 sm:$0xff]  }
  0xa0   :  { %4924 = vmatpush1.bf16.msra.mxu0 %v7568_v55  ;;  %4802 = vmatprep.subr.bf16.mxu1 %v7573_v56  ;;  %v7652_v55 = vld [vmem:[%s11442_s1 + $0xcc] ss:$24 sps:$4 sm:$0xff]   ;;  %v7647_v56 = vld [vmem:[%s11442_s1 + $0x12c0] ss:$24 sps:$4 sm:$0xff]  }
  0xa1   :  { %4925 = vmatprep.subr.bf16.mxu0 %v7576_v57  ;;  %v7650_v57 = vld [vmem:[%s11442_s1 + $0xc8] ss:$24 sps:$4 sm:$0xff]  }
  0xa3   :  { %4803 = vmatpush1.bf16.msra.mxu1 %v7571_v58  ;;  %v7655_v58 = vld [vmem:[%s11442_s1 + $0x12f4] ss:$24 sps:$4 sm:$0xff]  }
  0xa4   :  { %4926 = vmatpush1.bf16.msra.mxu0 %v7574_v59  ;;  %4804 = vmatprep.subr.bf16.mxu1 %v7579_v60  ;;  %v7658_v59 = vld [vmem:[%s11442_s1 + $0xfc] ss:$24 sps:$4 sm:$0xff]   ;;  %v7653_v60 = vld [vmem:[%s11442_s1 + $0x12f0] ss:$24 sps:$4 sm:$0xff]  }
  0xa5   :  { %4927 = vmatprep.subr.bf16.mxu0 %v7582_v61  ;;  %v7656_v61 = vld [vmem:[%s11442_s1 + $0xf8] ss:$24 sps:$4 sm:$0xff]  }
  0xa7   :  { %4805 = vmatpush1.bf16.msra.mxu1 %v7577_v62  ;;  %v7661_v62 = vld [vmem:[%s11442_s1 + $0x1324] ss:$24 sps:$4 sm:$0xff]  }
  0xa8   :  { %4928 = vmatpush1.bf16.msra.mxu0 %v7580_v63  ;;  %4806 = vmatprep.subr.bf16.mxu1 %v7585_v0  ;;  %v7664_v63 = vld [vmem:[%s11442_s1 + $0x12c] ss:$24 sps:$4 sm:$0xff]   ;;  %v7659_v0 = vld [vmem:[%s11442_s1 + $0x1320] ss:$24 sps:$4 sm:$0xff]  }
  0xa9   :  { %4929 = vmatprep.subr.bf16.mxu0 %v7588_v1  ;;  %v7662_v1 = vld [vmem:[%s11442_s1 + $0x128] ss:$24 sps:$4 sm:$0xff]  }
  0xab   :  { %4807 = vmatpush1.bf16.msra.mxu1 %v7583_v2  ;;  %v7667_v2 = vld [vmem:[%s11442_s1 + $0x1354] ss:$24 sps:$4 sm:$0xff]  }
  0xac   :  { %4930 = vmatpush1.bf16.msra.mxu0 %v7586_v3  ;;  %4808 = vmatprep.subr.bf16.mxu1 %v7591_v4  ;;  %v7670_v3 = vld [vmem:[%s11442_s1 + $0x15c] ss:$24 sps:$4 sm:$0xff]   ;;  %v7665_v4 = vld [vmem:[%s11442_s1 + $0x1350] ss:$24 sps:$4 sm:$0xff]  }
  0xad   :  { %4931 = vmatprep.subr.bf16.mxu0 %v7594_v5  ;;  %v7668_v5 = vld [vmem:[%s11442_s1 + $0x158] ss:$24 sps:$4 sm:$0xff]  }
  0xaf   :  { %4809 = vmatpush1.bf16.msra.mxu1 %v7589_v8  ;;  %v7673_v8 = vld [vmem:[%s11442_s1 + $0x1384] ss:$24 sps:$4 sm:$0xff]  }
  0xb0   :  { %4932 = vmatpush1.bf16.msra.mxu0 %v7592_v9  ;;  %4810 = vmatprep.subr.bf16.mxu1 %v7597_v10  ;;  %v7676_v9 = vld [vmem:[%s11442_s1 + $0x18c] ss:$24 sps:$4 sm:$0xff]   ;;  %v7671_v10 = vld [vmem:[%s11442_s1 + $0x1380] ss:$24 sps:$4 sm:$0xff]  }
  0xb1   :  { %4933 = vmatprep.subr.bf16.mxu0 %v7600_v11  ;;  %v7674_v11 = vld [vmem:[%s11442_s1 + $0x188] ss:$24 sps:$4 sm:$0xff]  }
  0xb3   :  { %4811 = vmatpush1.bf16.msra.mxu1 %v7595_v12  ;;  %v7679_v12 = vld [vmem:[%s11442_s1 + $0x13b4] ss:$24 sps:$4 sm:$0xff]  }
  0xb4   :  { %4934 = vmatpush1.bf16.msra.mxu0 %v7598_v13  ;;  %4812 = vmatprep.subr.bf16.mxu1 %v7603_v14  ;;  %v7682_v13 = vld [vmem:[%s11442_s1 + $0x1bc] ss:$24 sps:$4 sm:$0xff]   ;;  %v7677_v14 = vld [vmem:[%s11442_s1 + $0x13b0] ss:$24 sps:$4 sm:$0xff]  }
  0xb5   :  { %4935 = vmatprep.subr.bf16.mxu0 %v7606_v15  ;;  %v7680_v15 = vld [vmem:[%s11442_s1 + $0x1b8] ss:$24 sps:$4 sm:$0xff]  }
  0xb7   :  { %4813 = vmatpush1.bf16.msra.mxu1 %v7601_v17  ;;  %v7685_v17 = vld [vmem:[%s11442_s1 + $0x13e4] ss:$24 sps:$4 sm:$0xff]  }
  0xb8   :  { %4936 = vmatpush1.bf16.msra.mxu0 %v7604_v19  ;;  %4814 = vmatprep.subr.bf16.mxu1 %v7609_v20  ;;  %v7688_v19 = vld [vmem:[%s11442_s1 + $0x1ec] ss:$24 sps:$4 sm:$0xff]   ;;  %v7683_v20 = vld [vmem:[%s11442_s1 + $0x13e0] ss:$24 sps:$4 sm:$0xff]  }
  0xb9   :  { %4937 = vmatprep.subr.bf16.mxu0 %v7612_v21  ;;  %v7686_v21 = vld [vmem:[%s11442_s1 + $0x1e8] ss:$24 sps:$4 sm:$0xff]  }
  0xbb   :  { %4815 = vmatpush1.bf16.msra.mxu1 %v7607_v26  ;;  %v7691_v26 = vld [vmem:[%s11442_s1 + $0x1414] ss:$24 sps:$4 sm:$0xff]  }
  0xbc   :  { %4938 = vmatpush1.bf16.msra.mxu0 %v7610_v27  ;;  %4816 = vmatprep.subr.bf16.mxu1 %v7615_v28  ;;  %v7694_v27 = vld [vmem:[%s11442_s1 + $0x21c] ss:$24 sps:$4 sm:$0xff]   ;;  %v7689_v28 = vld [vmem:[%s11442_s1 + $0x1410] ss:$24 sps:$4 sm:$0xff]  }
  0xbd   :  { %4939 = vmatprep.subr.bf16.mxu0 %v7618_v29  ;;  %v7692_v29 = vld [vmem:[%s11442_s1 + $0x218] ss:$24 sps:$4 sm:$0xff]  }
  0xbf   :  { %4817 = vmatpush1.bf16.msra.mxu1 %v7613_v30  ;;  %v7697_v30 = vld [vmem:[%s11442_s1 + $0x1444] ss:$24 sps:$4 sm:$0xff]  }
  0xc0   :  { %4940 = vmatpush1.bf16.msra.mxu0 %v7616_v31  ;;  %5032 = vmatprep.subr.bf16.mxu1 %v7628_v33  ;;  %v7700_v31 = vld [vmem:[%s11442_s1 + $0x24c] ss:$24 sps:$4 sm:$0xff]   ;;  %v7698_v33 = vld [vmem:[%s11442_s1 + $0x248] ss:$24 sps:$4 sm:$0xff]  }
  0xc1   :  { %4950 = vmatprep.subr.bf16.mxu0 %v7625_v32  ;;  %v7695_v32 = vld [vmem:[%s11442_s1 + $0x1440] ss:$24 sps:$4 sm:$0xff]  }
  0xc2   :  { %4819 = vmatmul.mubr.bf16.vlgmr.msra.gmra.mrb[0].mxu1 %v9284_v34 }
  0xc3   :  { %4942 = vmatmul.mubr.bf16.vlgmr.msra.gmra.mrb[0].mxu0 %v9288_v36  ;;  %5033 = vmatpush1.bf16.msra.mxu1 %v7626_v22  ;;  %v7706_v22 = vld [vmem:[%s11442_s1 + $0x27c] ss:$24 sps:$4 sm:$0xff]  }
  0xc4   :  { %4951 = vmatpush1.bf16.msra.mxu0 %v7623_v37  ;;  %5034 = vmatprep.subr.bf16.mxu1 %v7634_v40  ;;  %v7703_v37 = vld [vmem:[%s11442_s1 + $0x1474] ss:$24 sps:$4 sm:$0xff]   ;;  %v7704_v40 = vld [vmem:[%s11442_s1 + $0x278] ss:$24 sps:$4 sm:$0xff]  }
  0xc5   :  { %4952 = vmatprep.subr.bf16.mxu0 %v7631_v23  ;;  %4982 = vmatprep.mubr.bf16.mxu0 %v9309_v41  ;;  %v7701_v23 = vld [vmem:[%s11442_s1 + $0x1470] ss:$24 sps:$4 sm:$0xff]  }
  0xc6   :  { %5064 = vmatprep.mubr.bf16.mxu1 %v8776_v48 }
  0xc7   :  { %5035 = vmatpush1.bf16.msra.mxu1 %v7632_v43  ;;  %v7712_v43 = vld [vmem:[%s11442_s1 + $0x2ac] ss:$24 sps:$4 sm:$0xff]  }
  0xc8   :  { %4953 = vmatpush1.bf16.msra.mxu0 %v7629_v42  ;;  %5036 = vmatprep.subr.bf16.mxu1 %v7640_v45  ;;  %v7709_v42 = vld [vmem:[%s11442_s1 + $0x14a4] ss:$24 sps:$4 sm:$0xff]   ;;  %v7710_v45 = vld [vmem:[%s11442_s1 + $0x2a8] ss:$24 sps:$4 sm:$0xff]  }
  0xc9   :  { %4954 = vmatprep.subr.bf16.mxu0 %v7637_v44  ;;  %v7707_v44 = vld [vmem:[%s11442_s1 + $0x14a0] ss:$24 sps:$4 sm:$0xff]  }
  0xcb   :  { %5037 = vmatpush1.bf16.msra.mxu1 %v7638_v47  ;;  %v7718_v47 = vld [vmem:[%s11442_s1 + $0x2dc] ss:$24 sps:$4 sm:$0xff]  }
  0xcc   :  { %4955 = vmatpush1.bf16.msra.mxu0 %v7635_v46  ;;  %5038 = vmatprep.subr.bf16.mxu1 %v7646_v50  ;;  %v7715_v46 = vld [vmem:[%s11442_s1 + $0x14d4] ss:$24 sps:$4 sm:$0xff]   ;;  %v7716_v50 = vld [vmem:[%s11442_s1 + $0x2d8] ss:$24 sps:$4 sm:$0xff]  }
  0xcd   :  { %4956 = vmatprep.subr.bf16.mxu0 %v7643_v49  ;;  %v7713_v49 = vld [vmem:[%s11442_s1 + $0x14d0] ss:$24 sps:$4 sm:$0xff]  }
  0xcf   :  { %5039 = vmatpush1.bf16.msra.mxu1 %v7644_v52  ;;  %v7726_v52 = vld [vmem:[%s11442_s1 + $0x30c] ss:$24 sps:$4 sm:$0xff]  }
  0xd0   :  { %4957 = vmatpush1.bf16.msra.mxu0 %v7641_v51  ;;  %5040 = vmatprep.subr.bf16.mxu1 %v7652_v55  ;;  %v7723_v51 = vld [vmem:[%s11442_s1 + $0x1504] ss:$24 sps:$4 sm:$0xff]   ;;  %v9500_v55 = vcombine.low %v9296_v39, %v9296_v39 }
  0xd1   :  { %4958 = vmatprep.subr.bf16.mxu0 %v7649_v54  ;;  %v7721_v54 = vld [vmem:[%s11442_s1 + $0x1500] ss:$24 sps:$4 sm:$0xff]   ;;  %v7732_v39 = vld [vmem:[%s11442_s1 + $0x33c] ss:$24 sps:$4 sm:$0xff]  }
  0xd3   :  { %5041 = vmatpush1.bf16.msra.mxu1 %v7650_v57  ;;  %v9508_v57 = vld [vmem:[%s11441_s0 + $0x38] sm:$0xff] }
  0xd4   :  { %4959 = vmatpush1.bf16.msra.mxu0 %v7647_v56  ;;  %5042 = vmatprep.subr.bf16.mxu1 %v7658_v59  ;;  %v7724_v56 = vld [vmem:[%s11442_s1 + $0x308] ss:$24 sps:$4 sm:$0xff]   ;;  %v9518_v59 = vcombine.high %v9508_v57, %v9508_v57 }
  0xd5   :  { %4960 = vmatprep.subr.bf16.mxu0 %v7655_v58  ;;  %v7729_v58 = vld [vmem:[%s11442_s1 + $0x1534] ss:$24 sps:$4 sm:$0xff]  }
  0xd7   :  { %5043 = vmatpush1.bf16.msra.mxu1 %v7656_v61  ;;  %v7730_v61 = vld [vmem:[%s11442_s1 + $0x338] ss:$24 sps:$4 sm:$0xff]  }
  0xd8   :  { %4961 = vmatpush1.bf16.msra.mxu0 %v7653_v60  ;;  %5044 = vmatprep.subr.bf16.mxu1 %v7664_v63  ;;  %v7727_v60 = vld [vmem:[%s11442_s1 + $0x1530] ss:$24 sps:$4 sm:$0xff]   ;;  %v7738_v63 = vld [vmem:[%s11442_s1 + $0x36c] ss:$24 sps:$4 sm:$0xff]  }
  0xd9   :  { %4962 = vmatprep.subr.bf16.mxu0 %v7661_v62  ;;  %v7735_v62 = vld [vmem:[%s11442_s1 + $0x1564] ss:$24 sps:$4 sm:$0xff]  }
  0xdb   :  { %5045 = vmatpush1.bf16.msra.mxu1 %v7662_v1  ;;  %v7736_v1 = vld [vmem:[%s11442_s1 + $0x368] ss:$24 sps:$4 sm:$0xff]  }
  0xdc   :  { %4963 = vmatpush1.bf16.msra.mxu0 %v7659_v0  ;;  %5046 = vmatprep.subr.bf16.mxu1 %v7670_v3  ;;  %v7733_v0 = vld [vmem:[%s11442_s1 + $0x1560] ss:$24 sps:$4 sm:$0xff]   ;;  %v7744_v3 = vld [vmem:[%s11442_s1 + $0x39c] ss:$24 sps:$4 sm:$0xff]  }
  0xdd   :  { %4964 = vmatprep.subr.bf16.mxu0 %v7667_v2  ;;  %v7741_v2 = vld [vmem:[%s11442_s1 + $0x1594] ss:$24 sps:$4 sm:$0xff]  }
  0xdf   :  { %5047 = vmatpush1.bf16.msra.mxu1 %v7668_v5  ;;  %v7742_v5 = vld [vmem:[%s11442_s1 + $0x398] ss:$24 sps:$4 sm:$0xff]  }
  0xe0   :  { %4965 = vmatpush1.bf16.msra.mxu0 %v7665_v4  ;;  %5048 = vmatprep.subr.bf16.mxu1 %v7676_v9  ;;  %v7739_v4 = vld [vmem:[%s11442_s1 + $0x1590] ss:$24 sps:$4 sm:$0xff]   ;;  %v7750_v9 = vld [vmem:[%s11442_s1 + $0x3cc] ss:$24 sps:$4 sm:$0xff]  }
  0xe1   :  { %4966 = vmatprep.subr.bf16.mxu0 %v7673_v8  ;;  %v7747_v8 = vld [vmem:[%s11442_s1 + $0x15c4] ss:$24 sps:$4 sm:$0xff]  }
  0xe3   :  { %5049 = vmatpush1.bf16.msra.mxu1 %v7674_v11  ;;  %v7748_v11 = vld [vmem:[%s11442_s1 + $0x3c8] ss:$24 sps:$4 sm:$0xff]  }
  0xe4   :  { %4967 = vmatpush1.bf16.msra.mxu0 %v7671_v10  ;;  %5050 = vmatprep.subr.bf16.mxu1 %v7682_v13  ;;  %v7745_v10 = vld [vmem:[%s11442_s1 + $0x15c0] ss:$24 sps:$4 sm:$0xff]   ;;  %v7756_v13 = vld [vmem:[%s11442_s1 + $0x3fc] ss:$24 sps:$4 sm:$0xff]  }
  0xe5   :  { %4968 = vmatprep.subr.bf16.mxu0 %v7679_v12  ;;  %v7753_v12 = vld [vmem:[%s11442_s1 + $0x15f4] ss:$24 sps:$4 sm:$0xff]  }
  0xe7   :  { %5051 = vmatpush1.bf16.msra.mxu1 %v7680_v15  ;;  %v7754_v15 = vld [vmem:[%s11442_s1 + $0x3f8] ss:$24 sps:$4 sm:$0xff]  }
  0xe8   :  { %4969 = vmatpush1.bf16.msra.mxu0 %v7677_v14  ;;  %5052 = vmatprep.subr.bf16.mxu1 %v7688_v19  ;;  %v7751_v14 = vld [vmem:[%s11442_s1 + $0x15f0] ss:$24 sps:$4 sm:$0xff]   ;;  %v7762_v19 = vld [vmem:[%s11442_s1 + $0x42c] ss:$24 sps:$4 sm:$0xff]  }
  0xe9   :  { %4970 = vmatprep.subr.bf16.mxu0 %v7685_v17  ;;  %v7759_v17 = vld [vmem:[%s11442_s1 + $0x1624] ss:$24 sps:$4 sm:$0xff]  }
  0xeb   :  { %5053 = vmatpush1.bf16.msra.mxu1 %v7686_v21  ;;  %v7760_v21 = vld [vmem:[%s11442_s1 + $0x428] ss:$24 sps:$4 sm:$0xff]  }
  0xec   :  { %4971 = vmatpush1.bf16.msra.mxu0 %v7683_v20  ;;  %5054 = vmatprep.subr.bf16.mxu1 %v7694_v27  ;;  %v7757_v20 = vld [vmem:[%s11442_s1 + $0x1620] ss:$24 sps:$4 sm:$0xff]   ;;  %v7768_v27 = vld [vmem:[%s11442_s1 + $0x45c] ss:$24 sps:$4 sm:$0xff]  }
  0xed   :  { %4972 = vmatprep.subr.bf16.mxu0 %v7691_v26  ;;  %v7765_v26 = vld [vmem:[%s11442_s1 + $0x1654] ss:$24 sps:$4 sm:$0xff]  }
  0xef   :  { %5055 = vmatpush1.bf16.msra.mxu1 %v7692_v29  ;;  %v7766_v29 = vld [vmem:[%s11442_s1 + $0x458] ss:$24 sps:$4 sm:$0xff]  }
  0xf0   :  { %4973 = vmatpush1.bf16.msra.mxu0 %v7689_v28  ;;  %5056 = vmatprep.subr.bf16.mxu1 %v7700_v31  ;;  %v7763_v28 = vld [vmem:[%s11442_s1 + $0x1650] ss:$24 sps:$4 sm:$0xff]   ;;  %v7774_v31 = vld [vmem:[%s11442_s1 + $0x48c] ss:$24 sps:$4 sm:$0xff]  }
  0xf1   :  { %4974 = vmatprep.subr.bf16.mxu0 %v7697_v30  ;;  %v7771_v30 = vld [vmem:[%s11442_s1 + $0x1684] ss:$24 sps:$4 sm:$0xff]  }
  0xf3   :  { %5057 = vmatpush1.bf16.msra.mxu1 %v7698_v33  ;;  %v7772_v33 = vld [vmem:[%s11442_s1 + $0x488] ss:$24 sps:$4 sm:$0xff]  }
  0xf4   :  { %4975 = vmatpush1.bf16.msra.mxu0 %v7695_v32  ;;  %5058 = vmatprep.subr.bf16.mxu1 %v7706_v22  ;;  %v7769_v32 = vld [vmem:[%s11442_s1 + $0x1680] ss:$24 sps:$4 sm:$0xff]   ;;  %v7780_v22 = vld [vmem:[%s11442_s1 + $0x4bc] ss:$24 sps:$4 sm:$0xff]  }
  0xf5   :  { %4976 = vmatprep.subr.bf16.mxu0 %v7703_v37  ;;  %v7777_v37 = vld [vmem:[%s11442_s1 + $0x16b4] ss:$24 sps:$4 sm:$0xff]  }
  0xf7   :  { %5059 = vmatpush1.bf16.msra.mxu1 %v7704_v40  ;;  %v7778_v40 = vld [vmem:[%s11442_s1 + $0x4b8] ss:$24 sps:$4 sm:$0xff]  }
  0xf8   :  { %4977 = vmatpush1.bf16.msra.mxu0 %v7701_v23  ;;  %5060 = vmatprep.subr.bf16.mxu1 %v7712_v43  ;;  %v7775_v23 = vld [vmem:[%s11442_s1 + $0x16b0] ss:$24 sps:$4 sm:$0xff]   ;;  %v7786_v43 = vld [vmem:[%s11442_s1 + $0x4ec] ss:$24 sps:$4 sm:$0xff]  }
  0xf9   :  { %4978 = vmatprep.subr.bf16.mxu0 %v7709_v42  ;;  %v7783_v42 = vld [vmem:[%s11442_s1 + $0x16e4] ss:$24 sps:$4 sm:$0xff]  }
  0xfb   :  { %5061 = vmatpush1.bf16.msra.mxu1 %v7710_v45  ;;  %v7784_v45 = vld [vmem:[%s11442_s1 + $0x4e8] ss:$24 sps:$4 sm:$0xff]  }
  0xfc   :  { %4979 = vmatpush1.bf16.msra.mxu0 %v7707_v44  ;;  %5062 = vmatprep.subr.bf16.mxu1 %v7718_v47  ;;  %v7781_v44 = vld [vmem:[%s11442_s1 + $0x16e0] ss:$24 sps:$4 sm:$0xff]   ;;  %v7792_v47 = vld [vmem:[%s11442_s1 + $0x51c] ss:$24 sps:$4 sm:$0xff]  }
  0xfd   :  { %4980 = vmatprep.subr.bf16.mxu0 %v7715_v46  ;;  %v7789_v46 = vld [vmem:[%s11442_s1 + $0x1714] ss:$24 sps:$4 sm:$0xff]  }
  0xff   :  { %5063 = vmatpush1.bf16.msra.mxu1 %v7716_v50  ;;  %v7790_v50 = vld [vmem:[%s11442_s1 + $0x518] ss:$24 sps:$4 sm:$0xff]  }
 0x100   :  { %4981 = vmatpush1.bf16.msra.mxu0 %v7713_v49  ;;  %5073 = vmatprep.subr.bf16.mxu1 %v7726_v52  ;;  %v7787_v49 = vld [vmem:[%s11442_s1 + $0x1710] ss:$24 sps:$4 sm:$0xff]   ;;  %v7798_v52 = vld [vmem:[%s11442_s1 + $0x54c] ss:$24 sps:$4 sm:$0xff]  }
 0x101   :  { %4991 = vmatprep.subr.bf16.mxu0 %v7723_v51  ;;  %v7795_v51 = vld [vmem:[%s11442_s1 + $0x1744] ss:$24 sps:$4 sm:$0xff]  }
 0x102   :  { %5065 = vmatmul.mubr.bf16.vlgmr.msra.gmra.mrb[4].mxu1 %v8842_v6 }
 0x103   :  { %4983 = vmatmul.mubr.bf16.vlgmr.msra.gmra.mrb[0].mxu0 %v9500_v55  ;;  %5074 = vmatpush1.bf16.msra.mxu1 %v7724_v56  ;;  %v7796_v56 = vld [vmem:[%s11442_s1 + $0x548] ss:$24 sps:$4 sm:$0xff]  }
 0x104   :  { %4992 = vmatpush1.bf16.msra.mxu0 %v7721_v54  ;;  %5075 = vmatprep.subr.bf16.mxu1 %v7732_v39  ;;  %v7793_v54 = vld [vmem:[%s11442_s1 + $0x1740] ss:$24 sps:$4 sm:$0xff]   ;;  %v7804_v39 = vld [vmem:[%s11442_s1 + $0x57c] ss:$24 sps:$4 sm:$0xff]  }
 0x105   :  { %4993 = vmatprep.subr.bf16.mxu0 %v7729_v58  ;;  %5023 = vmatprep.mubr.bf16.mxu0 %v9518_v59  ;;  %v7801_v58 = vld [vmem:[%s11442_s1 + $0x1774] ss:$24 sps:$4 sm:$0xff]  }
 0x106   :  { %5105 = vmatprep.mubr.bf16.mxu1 %v8933_v35 }
 0x107   :  { %5076 = vmatpush1.bf16.msra.mxu1 %v7730_v61  ;;  %v7802_v61 = vld [vmem:[%s11442_s1 + $0x578] ss:$24 sps:$4 sm:$0xff]  }
 0x108   :  { %4994 = vmatpush1.bf16.msra.mxu0 %v7727_v60  ;;  %5077 = vmatprep.subr.bf16.mxu1 %v7738_v63  ;;  %v7799_v60 = vld [vmem:[%s11442_s1 + $0x1770] ss:$24 sps:$4 sm:$0xff]   ;;  %v7810_v63 = vld [vmem:[%s11442_s1 + $0x5ac] ss:$24 sps:$4 sm:$0xff]  }
 0x109   :  { %4995 = vmatprep.subr.bf16.mxu0 %v7735_v62  ;;  %v7807_v62 = vld [vmem:[%s11442_s1 + $0x17a4] ss:$24 sps:$4 sm:$0xff]  }
 0x10b   :  { %5078 = vmatpush1.bf16.msra.mxu1 %v7736_v1  ;;  %v7808_v1 = vld [vmem:[%s11442_s1 + $0x5a8] ss:$24 sps:$4 sm:$0xff]  }
 0x10c   :  { %4996 = vmatpush1.bf16.msra.mxu0 %v7733_v0  ;;  %5079 = vmatprep.subr.bf16.mxu1 %v7744_v3  ;;  %v7805_v0 = vld [vmem:[%s11442_s1 + $0x17a0] ss:$24 sps:$4 sm:$0xff]   ;;  %v7816_v3 = vld [vmem:[%s11442_s1 + $0x5dc] ss:$24 sps:$4 sm:$0xff]  }
 0x10d   :  { %4997 = vmatprep.subr.bf16.mxu0 %v7741_v2  ;;  %v7813_v2 = vld [vmem:[%s11442_s1 + $0x17d4] ss:$24 sps:$4 sm:$0xff]  }
 0x10f   :  { %5080 = vmatpush1.bf16.msra.mxu1 %v7742_v5  ;;  %v7814_v5 = vld [vmem:[%s11442_s1 + $0x5d8] ss:$24 sps:$4 sm:$0xff]  }
 0x110   :  { %4998 = vmatpush1.bf16.msra.mxu0 %v7739_v4  ;;  %5081 = vmatprep.subr.bf16.mxu1 %v7750_v9  ;;  %v7811_v4 = vld [vmem:[%s11442_s1 + $0x17d0] ss:$24 sps:$4 sm:$0xff]   ;;  %v7824_v9 = vld [vmem:[%s11442_s1 + $0x14] ss:$24 sps:$4 sm:$0xff]  }
 0x111   :  { %4999 = vmatprep.subr.bf16.mxu0 %v7747_v8  ;;  %v7821_v8 = vld [vmem:[%s11442_s1 + $0x60c] ss:$24 sps:$4 sm:$0xff]  }
 0x113   :  { %5082 = vmatpush1.bf16.msra.mxu1 %v7748_v11  ;;  %v7819_v11 = vld [vmem:[%s11442_s1 + $0x608] ss:$24 sps:$4 sm:$0xff]  }
 0x114   :  { %5000 = vmatpush1.bf16.msra.mxu0 %v7745_v10  ;;  %5083 = vmatprep.subr.bf16.mxu1 %v7756_v13  ;;  %v9706_v10 = vcombine.low %v9508_v57, %v9508_v57  ;;  %v7827_v13 = vld [vmem:[%s11442_s1 + $0x63c] ss:$24 sps:$4 sm:$0xff]  }
 0x115   :  { %5001 = vmatprep.subr.bf16.mxu0 %v7753_v12  ;;  %v7822_v12 = vld [vmem:[%s11442_s1 + $0x10] ss:$24 sps:$4 sm:$0xff]   ;;  %v7830_v57 = vld [vmem:[%s11442_s1 + $0x44] ss:$24 sps:$4 sm:$0xff]  }
 0x117   :  { %5084 = vmatpush1.bf16.msra.mxu1 %v7754_v15  ;;  %v7828_v15 = vld [vmem:[%s11442_s1 + $0x40] ss:$24 sps:$4 sm:$0xff]  }
 0x118   :  { %5002 = vmatpush1.bf16.msra.mxu0 %v7751_v14  ;;  %5085 = vmatprep.subr.bf16.mxu1 %v7762_v19  ;;  %v7825_v14 = vld [vmem:[%s11442_s1 + $0x638] ss:$24 sps:$4 sm:$0xff]   ;;  %v7836_v19 = vld [vmem:[%s11442_s1 + $0x74] ss:$24 sps:$4 sm:$0xff]  }
 0x119   :  { %5003 = vmatprep.subr.bf16.mxu0 %v7759_v17  ;;  %v7833_v17 = vld [vmem:[%s11442_s1 + $0x66c] ss:$24 sps:$4 sm:$0xff]  }
 0x11b   :  { %5086 = vmatpush1.bf16.msra.mxu1 %v7760_v21  ;;  %v7834_v21 = vld [vmem:[%s11442_s1 + $0x70] ss:$24 sps:$4 sm:$0xff]  }
 0x11c   :  { %5004 = vmatpush1.bf16.msra.mxu0 %v7757_v20  ;;  %5087 = vmatprep.subr.bf16.mxu1 %v7768_v27  ;;  %v7831_v20 = vld [vmem:[%s11442_s1 + $0x668] ss:$24 sps:$4 sm:$0xff]   ;;  %v7837_v27 = vld [vmem:[%s11442_s1 + $0x698] ss:$24 sps:$4 sm:$0xff]  }
 0x11d   :  { %5005 = vmatprep.subr.bf16.mxu0 %v7765_v26  ;;  %v7839_v26 = vld [vmem:[%s11442_s1 + $0x69c] ss:$24 sps:$4 sm:$0xff]  }
 0x11f   :  { %5088 = vmatpush1.bf16.msra.mxu1 %v7766_v29  ;;  %v7845_v29 = vld [vmem:[%s11442_s1 + $0x6cc] ss:$24 sps:$4 sm:$0xff]  }
 0x120   :  { %5006 = vmatpush1.bf16.msra.mxu0 %v7763_v28  ;;  %5089 = vmatprep.subr.bf16.mxu1 %v7774_v31  ;;  %v7840_v28 = vld [vmem:[%s11442_s1 + $0xa0] ss:$24 sps:$4 sm:$0xff]  }
 0x121   :  { %5007 = vmatprep.subr.bf16.mxu0 %v7771_v30  ;;  %v7848_v30 = vld [vmem:[%s11442_s1 + $0xd4] ss:$24 sps:$4 sm:$0xff]   ;;  %v7843_v31 = vld [vmem:[%s11442_s1 + $0x6c8] ss:$24 sps:$4 sm:$0xff]  }
 0x123   :  { %5090 = vmatpush1.bf16.msra.mxu1 %v7772_v33  ;;  %v7851_v33 = vld [vmem:[%s11442_s1 + $0x6fc] ss:$24 sps:$4 sm:$0xff]  }
 0x124   :  { %5008 = vmatpush1.bf16.msra.mxu0 %v7769_v32  ;;  %5091 = vmatprep.subr.bf16.mxu1 %v7780_v22  ;;  %v7846_v32 = vld [vmem:[%s11442_s1 + $0xd0] ss:$24 sps:$4 sm:$0xff]  }
 0x125   :  { %5009 = vmatprep.subr.bf16.mxu0 %v7777_v37  ;;  %v7854_v37 = vld [vmem:[%s11442_s1 + $0x104] ss:$24 sps:$4 sm:$0xff]   ;;  %v7849_v22 = vld [vmem:[%s11442_s1 + $0x6f8] ss:$24 sps:$4 sm:$0xff]  }
 0x127   :  { %5092 = vmatpush1.bf16.msra.mxu1 %v7778_v40  ;;  %v7857_v40 = vld [vmem:[%s11442_s1 + $0x72c] ss:$24 sps:$4 sm:$0xff]  }
 0x128   :  { %5010 = vmatpush1.bf16.msra.mxu0 %v7775_v23  ;;  %5093 = vmatprep.subr.bf16.mxu1 %v7786_v43  ;;  %v7852_v23 = vld [vmem:[%s11442_s1 + $0x100] ss:$24 sps:$4 sm:$0xff]  }
 0x129   :  { %5011 = vmatprep.subr.bf16.mxu0 %v7783_v42  ;;  %v7860_v42 = vld [vmem:[%s11442_s1 + $0x134] ss:$24 sps:$4 sm:$0xff]   ;;  %v7855_v43 = vld [vmem:[%s11442_s1 + $0x728] ss:$24 sps:$4 sm:$0xff]  }
 0x12b   :  { %5094 = vmatpush1.bf16.msra.mxu1 %v7784_v45  ;;  %v7863_v45 = vld [vmem:[%s11442_s1 + $0x75c] ss:$24 sps:$4 sm:$0xff]  }
 0x12c   :  { %5012 = vmatpush1.bf16.msra.mxu0 %v7781_v44  ;;  %5095 = vmatprep.subr.bf16.mxu1 %v7792_v47  ;;  %v7858_v44 = vld [vmem:[%s11442_s1 + $0x130] ss:$24 sps:$4 sm:$0xff]  }
 0x12d   :  { %5013 = vmatprep.subr.bf16.mxu0 %v7789_v46  ;;  %v7866_v46 = vld [vmem:[%s11442_s1 + $0x164] ss:$24 sps:$4 sm:$0xff]   ;;  %v7861_v47 = vld [vmem:[%s11442_s1 + $0x758] ss:$24 sps:$4 sm:$0xff]  }
 0x12f   :  { %5096 = vmatpush1.bf16.msra.mxu1 %v7790_v50  ;;  %v7869_v50 = vld [vmem:[%s11442_s1 + $0x78c] ss:$24 sps:$4 sm:$0xff]  }
 0x130   :  { %5014 = vmatpush1.bf16.msra.mxu0 %v7787_v49  ;;  %5097 = vmatprep.subr.bf16.mxu1 %v7798_v52  ;;  %v7864_v49 = vld [vmem:[%s11442_s1 + $0x160] ss:$24 sps:$4 sm:$0xff]  }
 0x131   :  { %5015 = vmatprep.subr.bf16.mxu0 %v7795_v51  ;;  %v7872_v51 = vld [vmem:[%s11442_s1 + $0x194] ss:$24 sps:$4 sm:$0xff]   ;;  %v7867_v52 = vld [vmem:[%s11442_s1 + $0x788] ss:$24 sps:$4 sm:$0xff]  }
 0x133   :  { %5098 = vmatpush1.bf16.msra.mxu1 %v7796_v56  ;;  %v7875_v56 = vld [vmem:[%s11442_s1 + $0x7bc] ss:$24 sps:$4 sm:$0xff]  }
 0x134   :  { %5016 = vmatpush1.bf16.msra.mxu0 %v7793_v54  ;;  %5099 = vmatprep.subr.bf16.mxu1 %v7804_v39  ;;  %v7870_v54 = vld [vmem:[%s11442_s1 + $0x190] ss:$24 sps:$4 sm:$0xff]  }
 0x135   :  { %5017 = vmatprep.subr.bf16.mxu0 %v7801_v58  ;;  %v7878_v58 = vld [vmem:[%s11442_s1 + $0x1c4] ss:$24 sps:$4 sm:$0xff]   ;;  %v7873_v39 = vld [vmem:[%s11442_s1 + $0x7b8] ss:$24 sps:$4 sm:$0xff]  }
 0x137   :  { %5100 = vmatpush1.bf16.msra.mxu1 %v7802_v61  ;;  %v7881_v61 = vld [vmem:[%s11442_s1 + $0x7ec] ss:$24 sps:$4 sm:$0xff]  }
 0x138   :  { %5018 = vmatpush1.bf16.msra.mxu0 %v7799_v60  ;;  %5101 = vmatprep.subr.bf16.mxu1 %v7810_v63  ;;  %v7876_v60 = vld [vmem:[%s11442_s1 + $0x1c0] ss:$24 sps:$4 sm:$0xff]  }
 0x139   :  { %5019 = vmatprep.subr.bf16.mxu0 %v7807_v62  ;;  %v7884_v62 = vld [vmem:[%s11442_s1 + $0x1f4] ss:$24 sps:$4 sm:$0xff]   ;;  %v7879_v63 = vld [vmem:[%s11442_s1 + $0x7e8] ss:$24 sps:$4 sm:$0xff]  }
 0x13b   :  { %5102 = vmatpush1.bf16.msra.mxu1 %v7808_v1  ;;  %v7887_v1 = vld [vmem:[%s11442_s1 + $0x81c] ss:$24 sps:$4 sm:$0xff]  }
 0x13c   :  { %5020 = vmatpush1.bf16.msra.mxu0 %v7805_v0  ;;  %5103 = vmatprep.subr.bf16.mxu1 %v7816_v3  ;;  %v7882_v0 = vld [vmem:[%s11442_s1 + $0x1f0] ss:$24 sps:$4 sm:$0xff]  }
 0x13d   :  { %5021 = vmatprep.subr.bf16.mxu0 %v7813_v2  ;;  %v7890_v2 = vld [vmem:[%s11442_s1 + $0x224] ss:$24 sps:$4 sm:$0xff]   ;;  %v7885_v3 = vld [vmem:[%s11442_s1 + $0x818] ss:$24 sps:$4 sm:$0xff]  }
 0x13f   :  { %5104 = vmatpush1.bf16.msra.mxu1 %v7814_v5  ;;  %v7893_v5 = vld [vmem:[%s11442_s1 + $0x84c] ss:$24 sps:$4 sm:$0xff]  }
 0x140   :  { %5022 = vmatpush1.bf16.msra.mxu0 %v7811_v4  ;;  %5114 = vmatprep.subr.bf16.mxu1 %v7821_v8  ;;  %v7888_v4 = vld [vmem:[%s11442_s1 + $0x220] ss:$24 sps:$4 sm:$0xff]   ;;  %v7896_v8 = vld [vmem:[%s11442_s1 + $0x254] ss:$24 sps:$4 sm:$0xff]  }
 0x141   :  { %5360 = vmatprep.subr.bf16.mxu0 %v7824_v9  ;;  %v7891_v9 = vld [vmem:[%s11442_s1 + $0x848] ss:$24 sps:$4 sm:$0xff]  }
 0x142   :  { %5106 = vmatmul.mubr.bf16.vlgmr.msra.gmra.mrb[4].mxu1 %v9062_v16 }
 0x143   :  { %5024 = vmatmul.mubr.bf16.vlgmr.msra.gmra.mrb[0].mxu0 %v9706_v10  ;;  %5115 = vmatpush1.bf16.msra.mxu1 %v7819_v11  ;;  %v7894_v11 = vld [vmem:[%s11442_s1 + $0x250] ss:$24 sps:$4 sm:$0xff]  }
 0x144   :  { %5361 = vmatpush1.bf16.msra.mxu0 %v7822_v12  ;;  %5116 = vmatprep.subr.bf16.mxu1 %v7827_v13  ;;  %v7899_v12 = vld [vmem:[%s11442_s1 + $0x87c] ss:$24 sps:$4 sm:$0xff]  }
 0x145   :  { %5362 = vmatprep.subr.bf16.mxu0 %v7830_v57  ;;  %5146 = vmatprep.mubr.bf16.mxu1 %v9092_v24  ;;  %v7902_v13 = vld [vmem:[%s11442_s1 + $0x284] ss:$24 sps:$4 sm:$0xff]   ;;  %v7897_v57 = vld [vmem:[%s11442_s1 + $0x878] ss:$24 sps:$4 sm:$0xff]  }
 0x146   :  { %5392 = vmatprep.mubr.bf16.mxu0 %v8776_v48  ;;  %v7842_v48 = vld [vmem:[%s11442_s1 + $0xa4] ss:$24 sps:$4 sm:$0xff]  }
 0x147   :  { %5117 = vmatpush1.bf16.msra.mxu1 %v7825_v14  ;;  %v7900_v14 = vld [vmem:[%s11442_s1 + $0x280] ss:$24 sps:$4 sm:$0xff]  }
 0x148   :  { %5363 = vmatpush1.bf16.msra.mxu0 %v7828_v15  ;;  %5118 = vmatprep.subr.bf16.mxu1 %v7833_v17  ;;  %v7905_v15 = vld [vmem:[%s11442_s1 + $0x8ac] ss:$24 sps:$4 sm:$0xff]  }
 0x149   :  { %5364 = vmatprep.subr.bf16.mxu0 %v7836_v19  ;;  %v7908_v17 = vld [vmem:[%s11442_s1 + $0x2b4] ss:$24 sps:$4 sm:$0xff]   ;;  %v7903_v19 = vld [vmem:[%s11442_s1 + $0x8a8] ss:$24 sps:$4 sm:$0xff]  }
 0x14b   :  { %5119 = vmatpush1.bf16.msra.mxu1 %v7831_v20  ;;  %v7906_v20 = vld [vmem:[%s11442_s1 + $0x2b0] ss:$24 sps:$4 sm:$0xff]  }
 0x14c   :  { %5365 = vmatpush1.bf16.msra.mxu0 %v7834_v21  ;;  %5120 = vmatprep.subr.bf16.mxu1 %v7839_v26  ;;  %v7911_v21 = vld [vmem:[%s11442_s1 + $0x8dc] ss:$24 sps:$4 sm:$0xff]  }
 0x14d   :  { %5366 = vmatprep.subr.bf16.mxu0 %v7842_v48  ;;  %v7914_v26 = vld [vmem:[%s11442_s1 + $0x2e4] ss:$24 sps:$4 sm:$0xff]   ;;  %v7909_v48 = vld [vmem:[%s11442_s1 + $0x8d8] ss:$24 sps:$4 sm:$0xff]  }
 0x14f   :  { %5121 = vmatpush1.bf16.msra.mxu1 %v7837_v27  ;;  %v7912_v27 = vld [vmem:[%s11442_s1 + $0x2e0] ss:$24 sps:$4 sm:$0xff]  }
 0x150   :  { %5367 = vmatpush1.bf16.msra.mxu0 %v7840_v28  ;;  %5122 = vmatprep.subr.bf16.mxu1 %v7845_v29  ;;  %v7917_v28 = vld [vmem:[%s11442_s1 + $0x90c] ss:$24 sps:$4 sm:$0xff]  }
 0x151   :  { %5368 = vmatprep.subr.bf16.mxu0 %v7848_v30  ;;  %v7920_v29 = vld [vmem:[%s11442_s1 + $0x314] ss:$24 sps:$4 sm:$0xff]   ;;  %v7915_v30 = vld [vmem:[%s11442_s1 + $0x908] ss:$24 sps:$4 sm:$0xff]  }
 0x153   :  { %5123 = vmatpush1.bf16.msra.mxu1 %v7843_v31  ;;  %v7918_v31 = vld [vmem:[%s11442_s1 + $0x310] ss:$24 sps:$4 sm:$0xff]  }
 0x154   :  { %5369 = vmatpush1.bf16.msra.mxu0 %v7846_v32  ;;  %5124 = vmatprep.subr.bf16.mxu1 %v7851_v33  ;;  %v7923_v32 = vld [vmem:[%s11442_s1 + $0x93c] ss:$24 sps:$4 sm:$0xff]  }
 0x155   :  { %5370 = vmatprep.subr.bf16.mxu0 %v7854_v37  ;;  %v7926_v33 = vld [vmem:[%s11442_s1 + $0x344] ss:$24 sps:$4 sm:$0xff]   ;;  %v7921_v37 = vld [vmem:[%s11442_s1 + $0x938] ss:$24 sps:$4 sm:$0xff]  }
 0x157   :  { %5125 = vmatpush1.bf16.msra.mxu1 %v7849_v22  ;;  %v7924_v22 = vld [vmem:[%s11442_s1 + $0x340] ss:$24 sps:$4 sm:$0xff]  }
 0x158   :  { %5371 = vmatpush1.bf16.msra.mxu0 %v7852_v23  ;;  %5126 = vmatprep.subr.bf16.mxu1 %v7857_v40  ;;  %v7929_v23 = vld [vmem:[%s11442_s1 + $0x96c] ss:$24 sps:$4 sm:$0xff]   ;;  %v7927_v40 = vld [vmem:[%s11442_s1 + $0x968] ss:$24 sps:$4 sm:$0xff]  }
 0x159   :  { %5372 = vmatprep.subr.bf16.mxu0 %v7860_v42  ;;  %v7930_v42 = vld [vmem:[%s11442_s1 + $0x370] ss:$24 sps:$4 sm:$0xff]  }
 0x15b   :  { %5127 = vmatpush1.bf16.msra.mxu1 %v7855_v43  ;;  %v7935_v43 = vld [vmem:[%s11442_s1 + $0x99c] ss:$24 sps:$4 sm:$0xff]  }
 0x15c   :  { %5373 = vmatpush1.bf16.msra.mxu0 %v7858_v44  ;;  %5128 = vmatprep.subr.bf16.mxu1 %v7863_v45  ;;  %v7933_v44 = vld [vmem:[%s11442_s1 + $0x998] ss:$24 sps:$4 sm:$0xff]  }
 0x15d   :  { %5374 = vmatprep.subr.bf16.mxu0 %v7866_v46  ;;  %v7936_v45 = vld [vmem:[%s11442_s1 + $0x3a0] ss:$24 sps:$4 sm:$0xff]   ;;  %v7941_v46 = vld [vmem:[%s11442_s1 + $0x9cc] ss:$24 sps:$4 sm:$0xff]  }
 0x15f   :  { %5129 = vmatpush1.bf16.msra.mxu1 %v7861_v47  ;;  %v7944_v47 = vld [vmem:[%s11442_s1 + $0x3d4] ss:$24 sps:$4 sm:$0xff]  }
 0x160   :  { %5375 = vmatpush1.bf16.msra.mxu0 %v7864_v49  ;;  %5130 = vmatprep.subr.bf16.mxu1 %v7869_v50  ;;  %v7939_v49 = vld [vmem:[%s11442_s1 + $0x9c8] ss:$24 sps:$4 sm:$0xff]  }
 0x161   :  { %5376 = vmatprep.subr.bf16.mxu0 %v7872_v51  ;;  %v7942_v50 = vld [vmem:[%s11442_s1 + $0x3d0] ss:$24 sps:$4 sm:$0xff]   ;;  %v7947_v51 = vld [vmem:[%s11442_s1 + $0x9fc] ss:$24 sps:$4 sm:$0xff]  }
 0x163   :  { %5131 = vmatpush1.bf16.msra.mxu1 %v7867_v52  ;;  %v7950_v52 = vld [vmem:[%s11442_s1 + $0x404] ss:$24 sps:$4 sm:$0xff]  }
 0x164   :  { %5377 = vmatpush1.bf16.msra.mxu0 %v7870_v54  ;;  %5132 = vmatprep.subr.bf16.mxu1 %v7875_v56  ;;  %v7945_v54 = vld [vmem:[%s11442_s1 + $0x9f8] ss:$24 sps:$4 sm:$0xff]  }
 0x165   :  { %5378 = vmatprep.subr.bf16.mxu0 %v7878_v58  ;;  %v7948_v56 = vld [vmem:[%s11442_s1 + $0x400] ss:$24 sps:$4 sm:$0xff]   ;;  %v7953_v58 = vld [vmem:[%s11442_s1 + $0xa2c] ss:$24 sps:$4 sm:$0xff]  }
 0x167   :  { %5133 = vmatpush1.bf16.msra.mxu1 %v7873_v39  ;;  %v7956_v39 = vld [vmem:[%s11442_s1 + $0x434] ss:$24 sps:$4 sm:$0xff]  }
 0x168   :  { %5379 = vmatpush1.bf16.msra.mxu0 %v7876_v60  ;;  %5134 = vmatprep.subr.bf16.mxu1 %v7881_v61 }
 0x169   :  { %5380 = vmatprep.subr.bf16.mxu0 %v7884_v62  ;;  %v7951_v62 = vld [vmem:[%s11442_s1 + $0xa28] ss:$24 sps:$4 sm:$0xff]  }
 0x16b   :  { %5135 = vmatpush1.bf16.msra.mxu1 %v7879_v63 }
 0x16c   :  { %5381 = vmatpush1.bf16.msra.mxu0 %v7882_v0  ;;  %5136 = vmatprep.subr.bf16.mxu1 %v7887_v1  ;;  %v7954_v0 = vld [vmem:[%s11442_s1 + $0x430] ss:$24 sps:$4 sm:$0xff]  }
 0x16d   :  { %5382 = vmatprep.subr.bf16.mxu0 %v7890_v2  ;;  %v7959_v2 = vld [vmem:[%s11442_s1 + $0xa5c] ss:$24 sps:$4 sm:$0xff]  }
 0x16f   :  { %5137 = vmatpush1.bf16.msra.mxu1 %v7885_v3  ;;  %v7962_v3 = vld [vmem:[%s11442_s1 + $0x464] ss:$24 sps:$4 sm:$0xff]  }
 0x170   :  { %5383 = vmatpush1.bf16.msra.mxu0 %v7888_v4  ;;  %5138 = vmatprep.subr.bf16.mxu1 %v7893_v5  ;;  %v7957_v4 = vld [vmem:[%s11442_s1 + $0xa58] ss:$24 sps:$4 sm:$0xff]  }
 0x171   :  { %5384 = vmatprep.subr.bf16.mxu0 %v7896_v8  ;;  %v7960_v5 = vld [vmem:[%s11442_s1 + $0x460] ss:$24 sps:$4 sm:$0xff]   ;;  %v7965_v8 = vld [vmem:[%s11442_s1 + $0xa8c] ss:$24 sps:$4 sm:$0xff]  }
 0x173   :  { %5139 = vmatpush1.bf16.msra.mxu1 %v7891_v9  ;;  %v7968_v9 = vld [vmem:[%s11442_s1 + $0x494] ss:$24 sps:$4 sm:$0xff]  }
 0x174   :  { %5385 = vmatpush1.bf16.msra.mxu0 %v7894_v11  ;;  %5140 = vmatprep.subr.bf16.mxu1 %v7899_v12  ;;  %v7963_v11 = vld [vmem:[%s11442_s1 + $0xa88] ss:$24 sps:$4 sm:$0xff]  }
 0x175   :  { %5386 = vmatprep.subr.bf16.mxu0 %v7902_v13  ;;  %v7966_v12 = vld [vmem:[%s11442_s1 + $0x490] ss:$24 sps:$4 sm:$0xff]   ;;  %v7971_v13 = vld [vmem:[%s11442_s1 + $0xabc] ss:$24 sps:$4 sm:$0xff]  }
 0x177   :  { %5141 = vmatpush1.bf16.msra.mxu1 %v7897_v57  ;;  %v7974_v57 = vld [vmem:[%s11442_s1 + $0x4c4] ss:$24 sps:$4 sm:$0xff]  }
 0x178   :  { %5387 = vmatpush1.bf16.msra.mxu0 %v7900_v14  ;;  %5142 = vmatprep.subr.bf16.mxu1 %v7905_v15  ;;  %v7969_v14 = vld [vmem:[%s11442_s1 + $0xab8] ss:$24 sps:$4 sm:$0xff]  }
 0x179   :  { %5388 = vmatprep.subr.bf16.mxu0 %v7908_v17  ;;  %v7972_v15 = vld [vmem:[%s11442_s1 + $0x4c0] ss:$24 sps:$4 sm:$0xff]   ;;  %v7977_v17 = vld [vmem:[%s11442_s1 + $0xaec] ss:$24 sps:$4 sm:$0xff]  }
 0x17b   :  { %5143 = vmatpush1.bf16.msra.mxu1 %v7903_v19  ;;  %v7980_v19 = vld [vmem:[%s11442_s1 + $0x4f4] ss:$24 sps:$4 sm:$0xff]  }
 0x17c   :  { %5389 = vmatpush1.bf16.msra.mxu0 %v7906_v20  ;;  %5144 = vmatprep.subr.bf16.mxu1 %v7911_v21  ;;  %v7975_v20 = vld [vmem:[%s11442_s1 + $0xae8] ss:$24 sps:$4 sm:$0xff]  }
 0x17d   :  { %5390 = vmatprep.subr.bf16.mxu0 %v7914_v26  ;;  %v7978_v21 = vld [vmem:[%s11442_s1 + $0x4f0] ss:$24 sps:$4 sm:$0xff]   ;;  %v7983_v26 = vld [vmem:[%s11442_s1 + $0xb1c] ss:$24 sps:$4 sm:$0xff]  }
 0x17f   :  { %5145 = vmatpush1.bf16.msra.mxu1 %v7909_v48  ;;  %v7986_v48 = vld [vmem:[%s11442_s1 + $0x524] ss:$24 sps:$4 sm:$0xff]  }
 0x180   :  { %5391 = vmatpush1.bf16.msra.mxu0 %v7912_v27  ;;  %5155 = vmatprep.subr.bf16.mxu1 %v7917_v28  ;;  %v7981_v27 = vld [vmem:[%s11442_s1 + $0xb18] ss:$24 sps:$4 sm:$0xff]  }
 0x181   :  { %5401 = vmatprep.subr.bf16.mxu0 %v7920_v29  ;;  %v7984_v28 = vld [vmem:[%s11442_s1 + $0x520] ss:$24 sps:$4 sm:$0xff]   ;;  %v7989_v29 = vld [vmem:[%s11442_s1 + $0xb4c] ss:$24 sps:$4 sm:$0xff]  }
 0x182   :  { %5147 = vmatmul.mubr.bf16.vlgmr.msra.gmra.mrb[4].mxu1 %v9284_v34 }
 0x183   :  { %5393 = vmatmul.mubr.bf16.vlgmr.msra.gmra.mrb[4].mxu0 %v8842_v6  ;;  %5156 = vmatpush1.bf16.msra.mxu1 %v7915_v30  ;;  %v7932_v6 = vld [vmem:[%s11442_s1 + $0x374] ss:$24 sps:$4 sm:$0xff]  }
 0x184   :  { %5402 = vmatpush1.bf16.msra.mxu0 %v7918_v31  ;;  %5157 = vmatprep.subr.bf16.mxu1 %v7923_v32  ;;  %v7992_v30 = vld [vmem:[%s11442_s1 + $0x554] ss:$24 sps:$4 sm:$0xff]   ;;  %v7987_v31 = vld [vmem:[%s11442_s1 + $0xb48] ss:$24 sps:$4 sm:$0xff]  }
 0x185   :  { %5403 = vmatprep.subr.bf16.mxu0 %v7926_v33  ;;  %5187 = vmatprep.mubr.bf16.mxu1 %v8790_v53  ;;  %v7990_v32 = vld [vmem:[%s11442_s1 + $0x550] ss:$24 sps:$4 sm:$0xff]   ;;  %v7995_v33 = vld [vmem:[%s11442_s1 + $0xb7c] ss:$24 sps:$4 sm:$0xff]  }
 0x186   :  { %5433 = vmatprep.mubr.bf16.mxu0 %v8933_v35  ;;  %v7938_v35 = vld [vmem:[%s11442_s1 + $0x3a4] ss:$24 sps:$4 sm:$0xff]  }
 0x187   :  { %5158 = vmatpush1.bf16.msra.mxu1 %v7921_v37  ;;  %v7998_v37 = vld [vmem:[%s11442_s1 + $0x584] ss:$24 sps:$4 sm:$0xff]  }
 0x188   :  { %5404 = vmatpush1.bf16.msra.mxu0 %v7924_v22  ;;  %5159 = vmatprep.subr.bf16.mxu1 %v7929_v23  ;;  %v7993_v22 = vld [vmem:[%s11442_s1 + $0xb78] ss:$24 sps:$4 sm:$0xff]  }
 0x189   :  { %5405 = vmatprep.subr.bf16.mxu0 %v7932_v6  ;;  %v7996_v23 = vld [vmem:[%s11442_s1 + $0x580] ss:$24 sps:$4 sm:$0xff]   ;;  %v8001_v6 = vld [vmem:[%s11442_s1 + $0xbac] ss:$24 sps:$4 sm:$0xff]  }
 0x18b   :  { %5160 = vmatpush1.bf16.msra.mxu1 %v7927_v40  ;;  %v8004_v40 = vld [vmem:[%s11442_s1 + $0x5b4] ss:$24 sps:$4 sm:$0xff]  }
 0x18c   :  { %5406 = vmatpush1.bf16.msra.mxu0 %v7930_v42  ;;  %5161 = vmatprep.subr.bf16.mxu1 %v7935_v43  ;;  %v7999_v42 = vld [vmem:[%s11442_s1 + $0xba8] ss:$24 sps:$4 sm:$0xff]  }
 0x18d   :  { %5407 = vmatprep.subr.bf16.mxu0 %v7938_v35  ;;  %v8002_v43 = vld [vmem:[%s11442_s1 + $0x5b0] ss:$24 sps:$4 sm:$0xff]   ;;  %v8007_v35 = vld [vmem:[%s11442_s1 + $0xbdc] ss:$24 sps:$4 sm:$0xff]  }
 0x18f   :  { %5162 = vmatpush1.bf16.msra.mxu1 %v7933_v44  ;;  %v8010_v44 = vld [vmem:[%s11442_s1 + $0x5e4] ss:$24 sps:$4 sm:$0xff]  }
 0x190   :  { %5408 = vmatpush1.bf16.msra.mxu0 %v7936_v45  ;;  %5163 = vmatprep.subr.bf16.mxu1 %v7941_v46  ;;  %v8005_v45 = vld [vmem:[%s11442_s1 + $0xbd8] ss:$24 sps:$4 sm:$0xff]  }
 0x191   :  { %5409 = vmatprep.subr.bf16.mxu0 %v7944_v47  ;;  %v8008_v46 = vld [vmem:[%s11442_s1 + $0x5e0] ss:$24 sps:$4 sm:$0xff]   ;;  %v8013_v47 = vld [vmem:[%s11442_s1 + $0xc0c] ss:$24 sps:$4 sm:$0xff]  }
 0x193   :  { %5164 = vmatpush1.bf16.msra.mxu1 %v7939_v49  ;;  %v8016_v49 = vld [vmem:[%s11442_s1 + $0x614] ss:$24 sps:$4 sm:$0xff]  }
 0x194   :  { %5410 = vmatpush1.bf16.msra.mxu0 %v7942_v50  ;;  %5165 = vmatprep.subr.bf16.mxu1 %v7947_v51  ;;  %v8011_v50 = vld [vmem:[%s11442_s1 + $0xc08] ss:$24 sps:$4 sm:$0xff]  }
 0x195   :  { %5411 = vmatprep.subr.bf16.mxu0 %v7950_v52  ;;  %v9980_v60 = vpop.f32.mrb[0].mxu1  ;;  %v8014_v51 = vld [vmem:[%s11442_s1 + $0x610] ss:$24 sps:$4 sm:$0xff]   ;;  %v8019_v52 = vld [vmem:[%s11442_s1 + $0xc3c] ss:$24 sps:$4 sm:$0xff]  }
 0x196   :  { %v9982_v61 = vpop.f32.mrb[1].mxu1 }
 0x197   :  { %v4824_v63 = vpop.f32.mrb[2].mxu1  ;;  %5166 = vmatpush1.bf16.msra.mxu1 %v7945_v54  ;;  %v8022_v54 = vld [vmem:[%s11442_s1 + $0x644] ss:$24 sps:$4 sm:$0xff]  }
 0x198   :  { %5412 = vmatpush1.bf16.msra.mxu0 %v7948_v56  ;;  %v4825_v1 = vpop.f32.mrb[3].mxu1  ;;  %5167 = vmatprep.subr.bf16.mxu1 %v7953_v58  ;;  %v8017_v56 = vld [vmem:[%s11442_s1 + $0xc38] ss:$24 sps:$4 sm:$0xff]  }
 0x199   :  { %5413 = vmatprep.subr.bf16.mxu0 %v7956_v39  ;;  %v8020_v58 = vld [vmem:[%s11442_s1 + $0x640] ss:$24 sps:$4 sm:$0xff]   ;;  %v8025_v39 = vld [vmem:[%s11442_s1 + $0xc6c] ss:$24 sps:$4 sm:$0xff]  }
 0x19b   :  { %5168 = vmatpush1.bf16.msra.mxu1 %v7951_v62  ;;  %v8028_v62 = vld [vmem:[%s11442_s1 + $0x674] ss:$24 sps:$4 sm:$0xff]  }
 0x19c   :  { %5414 = vmatpush1.bf16.msra.mxu0 %v7954_v0  ;;  %5169 = vmatprep.subr.bf16.mxu1 %v7959_v2 }
 0x19d   :  { %5415 = vmatprep.subr.bf16.mxu0 %v7962_v3 }
 0x19f   :  { %5170 = vmatpush1.bf16.msra.mxu1 %v7957_v4 }
 0x1a0   :  { %5416 = vmatpush1.bf16.msra.mxu0 %v7960_v5  ;;  %5171 = vmatprep.subr.bf16.mxu1 %v7965_v8 }
 0x1a1   :  { %5417 = vmatprep.subr.bf16.mxu0 %v7968_v9 }
 0x1a3   :  { %5172 = vmatpush1.bf16.msra.mxu1 %v7963_v11 }
 0x1a4   :  { %5418 = vmatpush1.bf16.msra.mxu0 %v7966_v12  ;;  %5173 = vmatprep.subr.bf16.mxu1 %v7971_v13 }
 0x1a5   :  { %5419 = vmatprep.subr.bf16.mxu0 %v7974_v57 }
 0x1a7   :  { %5174 = vmatpush1.bf16.msra.mxu1 %v7969_v14 }
 0x1a8   :  { %5420 = vmatpush1.bf16.msra.mxu0 %v7972_v15  ;;  %5175 = vmatprep.subr.bf16.mxu1 %v7977_v17 }
 0x1a9   :  { %5421 = vmatprep.subr.bf16.mxu0 %v7980_v19 }
 0x1ab   :  { %5176 = vmatpush1.bf16.msra.mxu1 %v7975_v20 }
 0x1ac   :  { %5422 = vmatpush1.bf16.msra.mxu0 %v7978_v21  ;;  %5177 = vmatprep.subr.bf16.mxu1 %v7983_v26 }
 0x1ad   :  { %5423 = vmatprep.subr.bf16.mxu0 %v7986_v48 }
 0x1af   :  { %5178 = vmatpush1.bf16.msra.mxu1 %v7981_v27 }
 0x1b0   :  { %5424 = vmatpush1.bf16.msra.mxu0 %v7984_v28  ;;  %5179 = vmatprep.subr.bf16.mxu1 %v7989_v29 }
 0x1b1   :  { %5425 = vmatprep.subr.bf16.mxu0 %v7992_v30 }
 0x1b3   :  { %5180 = vmatpush1.bf16.msra.mxu1 %v7987_v31 }
 0x1b4   :  { %5426 = vmatpush1.bf16.msra.mxu0 %v7990_v32  ;;  %5181 = vmatprep.subr.bf16.mxu1 %v7995_v33 }
 0x1b5   :  { %5427 = vmatprep.subr.bf16.mxu0 %v7998_v37 }
 0x1b7   :  { %5182 = vmatpush1.bf16.msra.mxu1 %v7993_v22 }
 0x1b8   :  { %5428 = vmatpush1.bf16.msra.mxu0 %v7996_v23  ;;  %5183 = vmatprep.subr.bf16.mxu1 %v8001_v6 }
 0x1b9   :  { %5429 = vmatprep.subr.bf16.mxu0 %v8004_v40 }
 0x1bb   :  { %5184 = vmatpush1.bf16.msra.mxu1 %v7999_v42 }
 0x1bc   :  { %5430 = vmatpush1.bf16.msra.mxu0 %v8002_v43  ;;  %5185 = vmatprep.subr.bf16.mxu1 %v8007_v35 }
 0x1bd   :  { %5431 = vmatprep.subr.bf16.mxu0 %v8010_v44 }
 0x1bf   :  { %5186 = vmatpush1.bf16.msra.mxu1 %v8005_v45 }
 0x1c0   :  { %5432 = vmatpush1.bf16.msra.mxu0 %v8008_v46  ;;  %5196 = vmatprep.subr.bf16.mxu1 %v8013_v47 }
 0x1c1   :  { %5442 = vmatprep.subr.bf16.mxu0 %v8016_v49 }
 0x1c2   :  { %5188 = vmatmul.mubr.bf16.vlgmr.msra.gmra.mrb[4].mxu1 %v8844_v7 }
 0x1c3   :  { %5434 = vmatmul.mubr.bf16.vlgmr.msra.gmra.mrb[4].mxu0 %v9062_v16  ;;  %5197 = vmatpush1.bf16.msra.mxu1 %v8011_v50 }
 0x1c4   :  { %5443 = vmatpush1.bf16.msra.mxu0 %v8014_v51  ;;  %5198 = vmatprep.subr.bf16.mxu1 %v8019_v52 }
 0x1c5   :  { %5444 = vmatprep.subr.bf16.mxu0 %v8022_v54 }
 0x1c6   :  { %14 = vsyncpa [#allocation4], 0  ;;  %5228 = vmatprep.mubr.bf16.mxu1 %v8945_v38  ;;  %5474 = vmatprep.mubr.bf16.mxu0 %v9092_v24  ;;  %v8023_v16 = vld [vmem:[%s11442_s1 + $0xc68] ss:$24 sps:$4 sm:$0xff]   ;;  %v8031_v0 = vld [vmem:[%s11442_s1 + $0xc9c] ss:$24 sps:$4 sm:$0xff]  }
 0x1c7   :  { %5199 = vmatpush1.bf16.msra.mxu1 %v8017_v56  ;;  %v8026_v63 = vld [vmem:[%s11442_s1 + $0x670] ss:$24 sps:$4 sm:$0xff]   ;;  %v8034_v24 = vld [vmem:[%s11442_s1 + $0x6a4] ss:$24 sps:$4 sm:$0xff]   ;;  %v8032_v2 = vld [vmem:[%s11442_s1 + $0x6a0] ss:$24 sps:$4 sm:$0xff]  }
 0x1c8   :  { %5445 = vmatpush1.bf16.msra.mxu0 %v8020_v58  ;;  %5200 = vmatprep.subr.bf16.mxu1 %v8025_v39  ;;  %v8029_v1 = vld [vmem:[%s11442_s1 + $0xc98] ss:$24 sps:$4 sm:$0xff]   ;;  %v8037_v3 = vld [vmem:[%s11442_s1 + $0xccc] ss:$24 sps:$4 sm:$0xff]   ;;  %v8035_v5 = vld [vmem:[%s11442_s1 + $0xcc8] ss:$24 sps:$4 sm:$0xff]  }
 0x1c9   :  { %5446 = vmatprep.subr.bf16.mxu0 %v8028_v62  ;;  %v8040_v4 = vld [vmem:[%s11442_s1 + $0x6d4] ss:$24 sps:$4 sm:$0xff]   ;;  %v8038_v8 = vld [vmem:[%s11442_s1 + $0x6d0] ss:$24 sps:$4 sm:$0xff]   ;;  %v8046_v11 = vld [vmem:[%s11442_s1 + $0x704] ss:$24 sps:$4 sm:$0xff]  }
 0x1ca   :  { %v8043_v9 = vld [vmem:[%s11442_s1 + $0xcfc] ss:$24 sps:$4 sm:$0xff]   ;;  %v8041_v12 = vld [vmem:[%s11442_s1 + $0xcf8] ss:$24 sps:$4 sm:$0xff]   ;;  %v8049_v57 = vld [vmem:[%s11442_s1 + $0xd2c] ss:$24 sps:$4 sm:$0xff]  }
 0x1cb   :  { %5201 = vmatpush1.bf16.msra.mxu1 %v8023_v16  ;;  %v8044_v13 = vld [vmem:[%s11442_s1 + $0x700] ss:$24 sps:$4 sm:$0xff]   ;;  %v8052_v14 = vld [vmem:[%s11442_s1 + $0x734] ss:$24 sps:$4 sm:$0xff]   ;;  %v8050_v17 = vld [vmem:[%s11442_s1 + $0x730] ss:$24 sps:$4 sm:$0xff]  }
 0x1cc   :  { %5447 = vmatpush1.bf16.msra.mxu0 %v8026_v63  ;;  %5202 = vmatprep.subr.bf16.mxu1 %v8031_v0  ;;  %v8047_v15 = vld [vmem:[%s11442_s1 + $0xd28] ss:$24 sps:$4 sm:$0xff]   ;;  %v8055_v19 = vld [vmem:[%s11442_s1 + $0xd5c] ss:$24 sps:$4 sm:$0xff]   ;;  %v8053_v21 = vld [vmem:[%s11442_s1 + $0xd58] ss:$24 sps:$4 sm:$0xff]  }
 0x1cd   :  { %5448 = vmatprep.subr.bf16.mxu0 %v8034_v24  ;;  %v8058_v20 = vld [vmem:[%s11442_s1 + $0x764] ss:$24 sps:$4 sm:$0xff]   ;;  %v8056_v26 = vld [vmem:[%s11442_s1 + $0x760] ss:$24 sps:$4 sm:$0xff]   ;;  %v8064_v27 = vld [vmem:[%s11442_s1 + $0x794] ss:$24 sps:$4 sm:$0xff]  }
 0x1ce   :  { %v8061_v48 = vld [vmem:[%s11442_s1 + $0xd8c] ss:$24 sps:$4 sm:$0xff]   ;;  %v8059_v28 = vld [vmem:[%s11442_s1 + $0xd88] ss:$24 sps:$4 sm:$0xff]   ;;  %v8067_v30 = vld [vmem:[%s11442_s1 + $0xdbc] ss:$24 sps:$4 sm:$0xff]  }
 0x1cf   :  { %5203 = vmatpush1.bf16.msra.mxu1 %v8029_v1  ;;  %v8062_v29 = vld [vmem:[%s11442_s1 + $0x790] ss:$24 sps:$4 sm:$0xff]   ;;  %v8070_v31 = vld [vmem:[%s11442_s1 + $0x7c4] ss:$24 sps:$4 sm:$0xff]   ;;  %v8068_v33 = vld [vmem:[%s11442_s1 + $0x7c0] ss:$24 sps:$4 sm:$0xff]  }
 0x1d0   :  { %5449 = vmatpush1.bf16.msra.mxu0 %v8032_v2  ;;  %5204 = vmatprep.subr.bf16.mxu1 %v8037_v3  ;;  %v8065_v32 = vld [vmem:[%s11442_s1 + $0xdb8] ss:$24 sps:$4 sm:$0xff]   ;;  %v8073_v37 = vld [vmem:[%s11442_s1 + $0xdec] ss:$24 sps:$4 sm:$0xff]   ;;  %v8071_v23 = vld [vmem:[%s11442_s1 + $0xde8] ss:$24 sps:$4 sm:$0xff]  }
 0x1d1   :  { %5450 = vmatprep.subr.bf16.mxu0 %v8040_v4  ;;  %v8076_v22 = vld [vmem:[%s11442_s1 + $0x7f4] ss:$24 sps:$4 sm:$0xff]   ;;  %v8074_v6 = vld [vmem:[%s11442_s1 + $0x7f0] ss:$24 sps:$4 sm:$0xff]   ;;  %v8082_v42 = vld [vmem:[%s11442_s1 + $0x824] ss:$24 sps:$4 sm:$0xff]  }
 0x1d2   :  { %v8079_v40 = vld [vmem:[%s11442_s1 + $0xe1c] ss:$24 sps:$4 sm:$0xff]   ;;  %v8077_v43 = vld [vmem:[%s11442_s1 + $0xe18] ss:$24 sps:$4 sm:$0xff]   ;;  %v8085_v44 = vld [vmem:[%s11442_s1 + $0xe4c] ss:$24 sps:$4 sm:$0xff]  }
 0x1d3   :  { %5205 = vmatpush1.bf16.msra.mxu1 %v8035_v5  ;;  %v8080_v35 = vld [vmem:[%s11442_s1 + $0x820] ss:$24 sps:$4 sm:$0xff]   ;;  %v8088_v45 = vld [vmem:[%s11442_s1 + $0x854] ss:$24 sps:$4 sm:$0xff]   ;;  %v8086_v47 = vld [vmem:[%s11442_s1 + $0x850] ss:$24 sps:$4 sm:$0xff]  }
 0x1d4   :  { %5451 = vmatpush1.bf16.msra.mxu0 %v8038_v8  ;;  %5206 = vmatprep.subr.bf16.mxu1 %v8043_v9  ;;  %v8083_v46 = vld [vmem:[%s11442_s1 + $0xe48] ss:$24 sps:$4 sm:$0xff]   ;;  %v8091_v49 = vld [vmem:[%s11442_s1 + $0xe7c] ss:$24 sps:$4 sm:$0xff]   ;;  %v8089_v51 = vld [vmem:[%s11442_s1 + $0xe78] ss:$24 sps:$4 sm:$0xff]  }
 0x1d5   :  { %5452 = vmatprep.subr.bf16.mxu0 %v8046_v11  ;;  %v8094_v50 = vld [vmem:[%s11442_s1 + $0x884] ss:$24 sps:$4 sm:$0xff]   ;;  %v8092_v52 = vld [vmem:[%s11442_s1 + $0x880] ss:$24 sps:$4 sm:$0xff]   ;;  %v8100_v56 = vld [vmem:[%s11442_s1 + $0x8b4] ss:$24 sps:$4 sm:$0xff]  }
 0x1d6   :  { %v8097_v54 = vld [vmem:[%s11442_s1 + $0xeac] ss:$24 sps:$4 sm:$0xff]   ;;  %v8095_v58 = vld [vmem:[%s11442_s1 + $0xea8] ss:$24 sps:$4 sm:$0xff]   ;;  %v8103_v62 = vld [vmem:[%s11442_s1 + $0xedc] ss:$24 sps:$4 sm:$0xff]  }
 0x1d7   :  { %5207 = vmatpush1.bf16.msra.mxu1 %v8041_v12  ;;  %v8098_v39 = vld [vmem:[%s11442_s1 + $0x8b0] ss:$24 sps:$4 sm:$0xff]   ;;  %v8106_v16 = vld [vmem:[%s11442_s1 + $0x8e4] ss:$24 sps:$4 sm:$0xff]   ;;  %v8104_v0 = vld [vmem:[%s11442_s1 + $0x8e0] ss:$24 sps:$4 sm:$0xff]  }
 0x1d8   :  { %5453 = vmatpush1.bf16.msra.mxu0 %v8044_v13  ;;  %5208 = vmatprep.subr.bf16.mxu1 %v8049_v57  ;;  %v8101_v63 = vld [vmem:[%s11442_s1 + $0xed8] ss:$24 sps:$4 sm:$0xff]   ;;  %v8109_v24 = vld [vmem:[%s11442_s1 + $0xf0c] ss:$24 sps:$4 sm:$0xff]   ;;  %v8107_v2 = vld [vmem:[%s11442_s1 + $0xf08] ss:$24 sps:$4 sm:$0xff]  }
 0x1d9   :  { %5454 = vmatprep.subr.bf16.mxu0 %v8052_v14  ;;  %v8112_v1 = vld [vmem:[%s11442_s1 + $0x914] ss:$24 sps:$4 sm:$0xff]   ;;  %v8110_v3 = vld [vmem:[%s11442_s1 + $0x910] ss:$24 sps:$4 sm:$0xff]   ;;  %v8118_v5 = vld [vmem:[%s11442_s1 + $0x944] ss:$24 sps:$4 sm:$0xff]  }
 0x1da   :  { %v8115_v4 = vld [vmem:[%s11442_s1 + $0xf3c] ss:$24 sps:$4 sm:$0xff]   ;;  %v8113_v8 = vld [vmem:[%s11442_s1 + $0xf38] ss:$24 sps:$4 sm:$0xff]   ;;  %v8121_v11 = vld [vmem:[%s11442_s1 + $0xf6c] ss:$24 sps:$4 sm:$0xff]  }
 0x1db   :  { %5209 = vmatpush1.bf16.msra.mxu1 %v8047_v15  ;;  %v8116_v9 = vld [vmem:[%s11442_s1 + $0x940] ss:$24 sps:$4 sm:$0xff]   ;;  %v8122_v13 = vld [vmem:[%s11442_s1 + $0x970] ss:$24 sps:$4 sm:$0xff]   ;;  %v8127_v57 = vld [vmem:[%s11442_s1 + $0xf9c] ss:$24 sps:$4 sm:$0xff]  }
 0x1dc   :  { %5455 = vmatpush1.bf16.msra.mxu0 %v8050_v17  ;;  %5210 = vmatprep.subr.bf16.mxu1 %v8055_v19  ;;  %v8119_v12 = vld [vmem:[%s11442_s1 + $0xf68] ss:$24 sps:$4 sm:$0xff]   ;;  %v8125_v14 = vld [vmem:[%s11442_s1 + $0xf98] ss:$24 sps:$4 sm:$0xff]   ;;  %v8133_v17 = vld [vmem:[%s11442_s1 + $0xfcc] ss:$24 sps:$4 sm:$0xff]  }
 0x1dd   :  { %5456 = vmatprep.subr.bf16.mxu0 %v8058_v20  ;;  %v8128_v15 = vld [vmem:[%s11442_s1 + $0x9a0] ss:$24 sps:$4 sm:$0xff]   ;;  %v8136_v19 = vld [vmem:[%s11442_s1 + $0x9d4] ss:$24 sps:$4 sm:$0xff]   ;;  %vm5956_vm0 = vcmask 1043456   ;;  %vm5952_vm1 = vcmask 293888  }
 0x1de   :  { %v8131_v20 = vld [vmem:[%s11442_s1 + $0xfc8] ss:$24 sps:$4 sm:$0xff]   ;;  %vm8585_vm2 = vmmov 0   ;;  %vm6184_vm3 = vcmask 31744   ;;  %vm6261_vm4 = vcmask 130048  }
 0x1df   :  { %5211 = vmatpush1.bf16.msra.mxu1 %v8053_v21  ;;  %v8134_v21 = vld [vmem:[%s11442_s1 + $0x9d0] ss:$24 sps:$4 sm:$0xff]  }
 0x1e0   :  { %5457 = vmatpush1.bf16.msra.mxu0 %v8056_v26  ;;  %5212 = vmatprep.subr.bf16.mxu1 %v8061_v48  ;;  %v8139_v26 = vld [vmem:[%s11442_s1 + $0xffc] ss:$24 sps:$4 sm:$0xff]  }
 0x1e1   :  { %5458 = vmatprep.subr.bf16.mxu0 %v8064_v27  ;;  %v8142_v48 = vld [vmem:[%s11442_s1 + $0xa04] ss:$24 sps:$4 sm:$0xff]   ;;  %v8137_v27 = vld [vmem:[%s11442_s1 + $0xff8] ss:$24 sps:$4 sm:$0xff]  }
 0x1e3   :  { %5213 = vmatpush1.bf16.msra.mxu1 %v8059_v28  ;;  %v8140_v28 = vld [vmem:[%s11442_s1 + $0xa00] ss:$24 sps:$4 sm:$0xff]  }
 0x1e4   :  { %5459 = vmatpush1.bf16.msra.mxu0 %v8062_v29  ;;  %5214 = vmatprep.subr.bf16.mxu1 %v8067_v30  ;;  %v8145_v29 = vld [vmem:[%s11442_s1 + $0x102c] ss:$24 sps:$4 sm:$0xff]  }
 0x1e5   :  { %5460 = vmatprep.subr.bf16.mxu0 %v8070_v31  ;;  %v8148_v30 = vld [vmem:[%s11442_s1 + $0xa34] ss:$24 sps:$4 sm:$0xff]  }
 0x1e7   :  { %5215 = vmatpush1.bf16.msra.mxu1 %v8065_v32 }
 0x1e8   :  { %5461 = vmatpush1.bf16.msra.mxu0 %v8068_v33  ;;  %5216 = vmatprep.subr.bf16.mxu1 %v8073_v37 }
 0x1e9   :  { %5462 = vmatprep.subr.bf16.mxu0 %v8076_v22 }
 0x1eb   :  { %5217 = vmatpush1.bf16.msra.mxu1 %v8071_v23  ;;  %v8143_v23 = vld [vmem:[%s11442_s1 + $0x1028] ss:$24 sps:$4 sm:$0xff]  }
 0x1ec   :  { %5463 = vmatpush1.bf16.msra.mxu0 %v8074_v6  ;;  %5218 = vmatprep.subr.bf16.mxu1 %v8079_v40  ;;  %v8146_v6 = vld [vmem:[%s11442_s1 + $0xa30] ss:$24 sps:$4 sm:$0xff]  }
 0x1ed   :  { %5464 = vmatprep.subr.bf16.mxu0 %v8082_v42  ;;  %v8149_v42 = vld [vmem:[%s11442_s1 + $0x1058] ss:$24 sps:$4 sm:$0xff]  }
 0x1ef   :  { %5219 = vmatpush1.bf16.msra.mxu1 %v8077_v43  ;;  %v8152_v43 = vld [vmem:[%s11442_s1 + $0xa60] ss:$24 sps:$4 sm:$0xff]  }
 0x1f0   :  { %5465 = vmatpush1.bf16.msra.mxu0 %v8080_v35  ;;  %5220 = vmatprep.subr.bf16.mxu1 %v8085_v44  ;;  %v8157_v35 = vld [vmem:[%s11442_s1 + $0x108c] ss:$24 sps:$4 sm:$0xff]  }
 0x1f1   :  { %5466 = vmatprep.subr.bf16.mxu0 %v8088_v45  ;;  %v8160_v44 = vld [vmem:[%s11442_s1 + $0xa94] ss:$24 sps:$4 sm:$0xff]   ;;  %v8155_v45 = vld [vmem:[%s11442_s1 + $0x1088] ss:$24 sps:$4 sm:$0xff]  }
 0x1f3   :  { %5221 = vmatpush1.bf16.msra.mxu1 %v8083_v46  ;;  %v8158_v46 = vld [vmem:[%s11442_s1 + $0xa90] ss:$24 sps:$4 sm:$0xff]  }
 0x1f4   :  { %5467 = vmatpush1.bf16.msra.mxu0 %v8086_v47  ;;  %5222 = vmatprep.subr.bf16.mxu1 %v8091_v49  ;;  %v8163_v47 = vld [vmem:[%s11442_s1 + $0x10bc] ss:$24 sps:$4 sm:$0xff]  }
 0x1f5   :  { %5468 = vmatprep.subr.bf16.mxu0 %v8094_v50  ;;  %v8166_v49 = vld [vmem:[%s11442_s1 + $0xac4] ss:$24 sps:$4 sm:$0xff]   ;;  %v8161_v50 = vld [vmem:[%s11442_s1 + $0x10b8] ss:$24 sps:$4 sm:$0xff]  }
 0x1f7   :  { %5223 = vmatpush1.bf16.msra.mxu1 %v8089_v51  ;;  %v8164_v51 = vld [vmem:[%s11442_s1 + $0xac0] ss:$24 sps:$4 sm:$0xff]  }
 0x1f8   :  { %5469 = vmatpush1.bf16.msra.mxu0 %v8092_v52  ;;  %5224 = vmatprep.subr.bf16.mxu1 %v8097_v54  ;;  %v8169_v52 = vld [vmem:[%s11442_s1 + $0x10ec] ss:$24 sps:$4 sm:$0xff]  }
 0x1f9   :  { %5470 = vmatprep.subr.bf16.mxu0 %v8100_v56  ;;  %v8172_v54 = vld [vmem:[%s11442_s1 + $0xaf4] ss:$24 sps:$4 sm:$0xff]   ;;  %v8167_v56 = vld [vmem:[%s11442_s1 + $0x10e8] ss:$24 sps:$4 sm:$0xff]  }
 0x1fb   :  { %5225 = vmatpush1.bf16.msra.mxu1 %v8095_v58  ;;  %v8170_v58 = vld [vmem:[%s11442_s1 + $0xaf0] ss:$24 sps:$4 sm:$0xff]  }
 0x1fc   :  { %5471 = vmatpush1.bf16.msra.mxu0 %v8098_v39  ;;  %5226 = vmatprep.subr.bf16.mxu1 %v8103_v62  ;;  %v8175_v39 = vld [vmem:[%s11442_s1 + $0x111c] ss:$24 sps:$4 sm:$0xff]  }
 0x1fd   :  { %5472 = vmatprep.subr.bf16.mxu0 %v8106_v16  ;;  %v8178_v62 = vld [vmem:[%s11442_s1 + $0xb24] ss:$24 sps:$4 sm:$0xff]   ;;  %v8173_v16 = vld [vmem:[%s11442_s1 + $0x1118] ss:$24 sps:$4 sm:$0xff]  }
 0x1ff   :  { %5227 = vmatpush1.bf16.msra.mxu1 %v8101_v63  ;;  %v8176_v63 = vld [vmem:[%s11442_s1 + $0xb20] ss:$24 sps:$4 sm:$0xff]  }
 0x200   :  { %5473 = vmatpush1.bf16.msra.mxu0 %v8104_v0  ;;  %5237 = vmatprep.subr.bf16.mxu1 %v8109_v24  ;;  %v8181_v0 = vld [vmem:[%s11442_s1 + $0x114c] ss:$24 sps:$4 sm:$0xff]  }
 0x201   :  { %5483 = vmatprep.subr.bf16.mxu0 %v8112_v1  ;;  %v8184_v24 = vld [vmem:[%s11442_s1 + $0xb54] ss:$24 sps:$4 sm:$0xff]   ;;  %v8179_v1 = vld [vmem:[%s11442_s1 + $0x1148] ss:$24 sps:$4 sm:$0xff]  }
 0x202   :  { %5229 = vmatmul.mubr.bf16.vlgmr.msra.gmra.mrb[4].mxu1 %v9069_v18 }
 0x203   :  { %5475 = vmatmul.mubr.bf16.vlgmr.msra.gmra.mrb[4].mxu0 %v9284_v34  ;;  %5238 = vmatpush1.bf16.msra.mxu1 %v8107_v2  ;;  %v8124_v34 = vld [vmem:[%s11442_s1 + $0x974] ss:$24 sps:$4 sm:$0xff]   ;;  %v8182_v2 = vld [vmem:[%s11442_s1 + $0xb50] ss:$24 sps:$4 sm:$0xff]  }
 0x204   :  { %5484 = vmatpush1.bf16.msra.mxu0 %v8110_v3  ;;  %5239 = vmatprep.subr.bf16.mxu1 %v8115_v4  ;;  %v8187_v3 = vld [vmem:[%s11442_s1 + $0x117c] ss:$24 sps:$4 sm:$0xff]  }
 0x205   :  { %5485 = vmatprep.subr.bf16.mxu0 %v8118_v5  ;;  %5269 = vmatprep.mubr.bf16.mxu1 %v9096_v25  ;;  %v8190_v4 = vld [vmem:[%s11442_s1 + $0xb84] ss:$24 sps:$4 sm:$0xff]   ;;  %v8185_v5 = vld [vmem:[%s11442_s1 + $0x1178] ss:$24 sps:$4 sm:$0xff]  }
 0x206   :  { %5515 = vmatprep.mubr.bf16.mxu0 %v8790_v53  ;;  %v8130_v53 = vld [vmem:[%s11442_s1 + $0x9a4] ss:$24 sps:$4 sm:$0xff]  }
 0x207   :  { %5240 = vmatpush1.bf16.msra.mxu1 %v8113_v8  ;;  %v8188_v8 = vld [vmem:[%s11442_s1 + $0xb80] ss:$24 sps:$4 sm:$0xff]  }
 0x208   :  { %5486 = vmatpush1.bf16.msra.mxu0 %v8116_v9  ;;  %5241 = vmatprep.subr.bf16.mxu1 %v8121_v11  ;;  %v8193_v9 = vld [vmem:[%s11442_s1 + $0x11ac] ss:$24 sps:$4 sm:$0xff]  }
 0x209   :  { %5487 = vmatprep.subr.bf16.mxu0 %v8124_v34  ;;  %v8196_v11 = vld [vmem:[%s11442_s1 + $0xbb4] ss:$24 sps:$4 sm:$0xff]   ;;  %v8191_v34 = vld [vmem:[%s11442_s1 + $0x11a8] ss:$24 sps:$4 sm:$0xff]  }
 0x20b   :  { %5242 = vmatpush1.bf16.msra.mxu1 %v8119_v12  ;;  %v8194_v12 = vld [vmem:[%s11442_s1 + $0xbb0] ss:$24 sps:$4 sm:$0xff]  }
 0x20c   :  { %5488 = vmatpush1.bf16.msra.mxu0 %v8122_v13  ;;  %5243 = vmatprep.subr.bf16.mxu1 %v8127_v57  ;;  %v8199_v13 = vld [vmem:[%s11442_s1 + $0x11dc] ss:$24 sps:$4 sm:$0xff]  }
 0x20d   :  { %5489 = vmatprep.subr.bf16.mxu0 %v8130_v53  ;;  %v8202_v57 = vld [vmem:[%s11442_s1 + $0xbe4] ss:$24 sps:$4 sm:$0xff]   ;;  %v8197_v53 = vld [vmem:[%s11442_s1 + $0x11d8] ss:$24 sps:$4 sm:$0xff]  }
 0x20f   :  { %5244 = vmatpush1.bf16.msra.mxu1 %v8125_v14  ;;  %v8200_v14 = vld [vmem:[%s11442_s1 + $0xbe0] ss:$24 sps:$4 sm:$0xff]  }
 0x210   :  { %5490 = vmatpush1.bf16.msra.mxu0 %v8128_v15  ;;  %5245 = vmatprep.subr.bf16.mxu1 %v8133_v17  ;;  %v8205_v15 = vld [vmem:[%s11442_s1 + $0x120c] ss:$24 sps:$4 sm:$0xff]  }
 0x211   :  { %5491 = vmatprep.subr.bf16.mxu0 %v8136_v19  ;;  %v8208_v17 = vld [vmem:[%s11442_s1 + $0xc14] ss:$24 sps:$4 sm:$0xff]   ;;  %v8203_v19 = vld [vmem:[%s11442_s1 + $0x1208] ss:$24 sps:$4 sm:$0xff]  }
 0x213   :  { %5246 = vmatpush1.bf16.msra.mxu1 %v8131_v20  ;;  %v8206_v20 = vld [vmem:[%s11442_s1 + $0xc10] ss:$24 sps:$4 sm:$0xff]  }
 0x214   :  { %5492 = vmatpush1.bf16.msra.mxu0 %v8134_v21  ;;  %5247 = vmatprep.subr.bf16.mxu1 %v8139_v26  ;;  %v8211_v21 = vld [vmem:[%s11442_s1 + $0x123c] ss:$24 sps:$4 sm:$0xff]  }
 0x215   :  { %5493 = vmatprep.subr.bf16.mxu0 %v8142_v48  ;;  %v8214_v26 = vld [vmem:[%s11442_s1 + $0xc44] ss:$24 sps:$4 sm:$0xff]   ;;  %v5690_v48 = vlaneseq }
 0x216   :  { %v5025_v31 = vpop.f32.mrb[0].mxu0 }
 0x217   :  { %v10377_v32 = vadd.f32 %v5025_v31, %v9980_v60  ;;  %v5027_v33 = vpop.f32.mrb[1].mxu0  ;;  %5248 = vmatpush1.bf16.msra.mxu1 %v8137_v27  ;;  %v8151_v60 = vld [vmem:[%s11442_s1 + $0x105c] ss:$24 sps:$4 sm:$0xff]   ;;  %v8209_v27 = vld [vmem:[%s11442_s1 + $0x1238] ss:$24 sps:$4 sm:$0xff]  }
 0x218   :  { %v10380_v37 = vadd.f32 %v5027_v33, %v9982_v61  ;;  %v5029_v22 = vpop.f32.mrb[2].mxu0  ;;  %5494 = vmatpush1.bf16.msra.mxu0 %v8140_v28  ;;  %5249 = vmatprep.subr.bf16.mxu1 %v8145_v29  ;;  %v8154_v61 = vld [vmem:[%s11442_s1 + $0xa64] ss:$24 sps:$4 sm:$0xff]   ;;  %v8212_v28 = vld [vmem:[%s11442_s1 + $0xc40] ss:$24 sps:$4 sm:$0xff]  }
 0x219   :  { %v5030_v40 = vpop.f32.mrb[3].mxu0  ;;  %5495 = vmatprep.subr.bf16.mxu0 %v8148_v30  ;;  %v8217_v29 = vld [vmem:[%s11442_s1 + $0x126c] ss:$24 sps:$4 sm:$0xff]   ;;  %v10528_v30 = vshrl.u32 %v5690_v48, 7  ;;  %v8215_v31 = vld [vmem:[%s11442_s1 + $0x1268] ss:$24 sps:$4 sm:$0xff]  }
 0x21a   :  { %v8218_v33 = vld [vmem:[%s11442_s1 + $0xc70] ss:$24 sps:$4 sm:$0xff]   ;;  %v8223_v22 = vld [vmem:[%s11442_s1 + $0x129c] ss:$24 sps:$4 sm:$0xff]   ;;  %v8277_v48 = vld [vmem:[%s11442_s1 + $0x144c] ss:$24 sps:$4 sm:$0xff]  }
 0x21b   :  { %5250 = vmatpush1.bf16.msra.mxu1 %v8143_v23  ;;  %v5696_v23 = vsub.s32 1, %v10528_v30  ;;  %v8221_v40 = vld [vmem:[%s11442_s1 + $0x1298] ss:$24 sps:$4 sm:$0xff]  }
 0x21c   :  { %5496 = vmatpush1.bf16.msra.mxu0 %v8146_v6  ;;  %5251 = vmatprep.subr.bf16.mxu1 %v8151_v60  ;;  %v10548_v6 = vld [vmem:[%s11443_s2] sm:$0x3f] }
 0x21d   :  { %5497 = vmatprep.subr.bf16.mxu0 %v8154_v61  ;;  %v8224_v60 = vld [vmem:[%s11442_s1 + $0xca0] ss:$24 sps:$4 sm:$0xff]   ;;  %v8229_v61 = vld [vmem:[%s11442_s1 + $0x12cc] ss:$24 sps:$4 sm:$0xff]  }
 0x21f   :  { %5252 = vmatpush1.bf16.msra.mxu1 %v8149_v42  ;;  %v8232_v42 = vld [vmem:[%s11442_s1 + $0xcd4] ss:$24 sps:$4 sm:$0xff]  }
 0x220   :  { %5498 = vmatpush1.bf16.msra.mxu0 %v8152_v43  ;;  %5253 = vmatprep.subr.bf16.mxu1 %v8157_v35  ;;  %v5697_v43 = vrot.slane %v10548_v6, %v5696_v23  ;;  %v10566_v35 = vld [vmem:[%s11444_s3] sm:$0x3f] }
 0x221   :  { %5499 = vmatprep.subr.bf16.mxu0 %v8160_v44  ;;  %v8227_v44 = vld [vmem:[%s11442_s1 + $0x12c8] ss:$24 sps:$4 sm:$0xff]  }
 0x223   :  { %5254 = vmatpush1.bf16.msra.mxu1 %v8155_v45  ;;  %v8230_v45 = vld [vmem:[%s11442_s1 + $0xcd0] ss:$24 sps:$4 sm:$0xff]  }
 0x224   :  { %5500 = vmatpush1.bf16.msra.mxu0 %v8158_v46  ;;  %5255 = vmatprep.subr.bf16.mxu1 %v8163_v47  ;;  %v8235_v46 = vld [vmem:[%s11442_s1 + $0x12fc] ss:$24 sps:$4 sm:$0xff]  }
 0x225   :  { %5501 = vmatprep.subr.bf16.mxu0 %v8166_v49  ;;  %v8238_v47 = vld [vmem:[%s11442_s1 + $0xd04] ss:$24 sps:$4 sm:$0xff]   ;;  %v5721_v49 = vmul.f32 %v10380_v37, %v5697_v43  ;;  %v8244_v37 = vld [vmem:[%s11442_s1 + $0xd34] ss:$24 sps:$4 sm:$0xff]   ;;  %v8287_v43 = vld [vmem:[%s11442_s1 + $0x14a8] ss:$24 sps:$4 sm:$0xff]  }
 0x227   :  { %5256 = vmatpush1.bf16.msra.mxu1 %v8161_v50  ;;  %v5735_v50 = vrot.slane %v10566_v35, %v5696_v23 }
 0x228   :  { %5502 = vmatpush1.bf16.msra.mxu0 %v8164_v51  ;;  %5257 = vmatprep.subr.bf16.mxu1 %v8169_v52  ;;  %v8233_v51 = vld [vmem:[%s11442_s1 + $0x12f8] ss:$24 sps:$4 sm:$0xff]  }
 0x229   :  { %5503 = vmatprep.subr.bf16.mxu0 %v8172_v54  ;;  %v8236_v52 = vld [vmem:[%s11442_s1 + $0xd00] ss:$24 sps:$4 sm:$0xff]   ;;  %v8241_v54 = vld [vmem:[%s11442_s1 + $0x132c] ss:$24 sps:$4 sm:$0xff]  }
 0x22b   :  { %5258 = vmatpush1.bf16.msra.mxu1 %v8167_v56  ;;  %v10594_v56 = vadd.f32 %v5735_v50, %v5721_v49  ;;  %v8296_v49 = vld [vmem:[%s11442_s1 + $0xee0] ss:$24 sps:$4 sm:$0xff]   ;;  %v8301_v50 = vld [vmem:[%s11442_s1 + $0x150c] ss:$24 sps:$4 sm:$0xff]  }
 0x22c   :  { %5504 = vmatpush1.bf16.msra.mxu0 %v8170_v58  ;;  %5259 = vmatprep.subr.bf16.mxu1 %v8175_v39  ;;  %v8239_v58 = vld [vmem:[%s11442_s1 + $0x1328] ss:$24 sps:$4 sm:$0xff]  }
 0x22d   :  { %5505 = vmatprep.subr.bf16.mxu0 %v8178_v62  ;;  %v8242_v39 = vld [vmem:[%s11442_s1 + $0xd30] ss:$24 sps:$4 sm:$0xff]   ;;  %v8247_v62 = vld [vmem:[%s11442_s1 + $0x135c] ss:$24 sps:$4 sm:$0xff]  }
 0x22f   :  { %5260 = vmatpush1.bf16.msra.mxu1 %v8173_v16  ;;  %v8250_v16 = vld [vmem:[%s11442_s1 + $0xd64] ss:$24 sps:$4 sm:$0xff]  }
 0x230   :  { %5506 = vmatpush1.bf16.msra.mxu0 %v8176_v63  ;;  %5261 = vmatprep.subr.bf16.mxu1 %v8181_v0  ;;  %v5771_v63 = vand.u32 2147483647, %v10594_v56  ;;  %v8245_v0 = vld [vmem:[%s11442_s1 + $0x1358] ss:$24 sps:$4 sm:$0xff]  }
 0x231   :  { %5507 = vmatprep.subr.bf16.mxu0 %v8184_v24  ;;  %v8248_v24 = vld [vmem:[%s11442_s1 + $0xd60] ss:$24 sps:$4 sm:$0xff]  }
 0x233   :  { %5262 = vmatpush1.bf16.msra.mxu1 %v8179_v1  ;;  %v8253_v1 = vld [vmem:[%s11442_s1 + $0x138c] ss:$24 sps:$4 sm:$0xff]  }
 0x234   :  { %5508 = vmatpush1.bf16.msra.mxu0 %v8182_v2  ;;  %5263 = vmatprep.subr.bf16.mxu1 %v8187_v3  ;;  %v8256_v2 = vld [vmem:[%s11442_s1 + $0xd94] ss:$24 sps:$4 sm:$0xff]   ;;  %v5777_v3 = vsub.f32 0.0, %v5771_v63  ;;  %v8305_v63 = vld [vmem:[%s11442_s1 + $0x1538] ss:$24 sps:$4 sm:$0xff]  }
 0x235   :  { %5509 = vmatprep.subr.bf16.mxu0 %v8190_v4  ;;  %v8251_v4 = vld [vmem:[%s11442_s1 + $0x1388] ss:$24 sps:$4 sm:$0xff]  }
 0x237   :  { %5264 = vmatpush1.bf16.msra.mxu1 %v8185_v5  ;;  %v8254_v5 = vld [vmem:[%s11442_s1 + $0xd90] ss:$24 sps:$4 sm:$0xff]  }
 0x238   :  { %5510 = vmatpush1.bf16.msra.mxu0 %v8188_v8  ;;  %5265 = vmatprep.subr.bf16.mxu1 %v8193_v9  ;;  %v8259_v8 = vld [vmem:[%s11442_s1 + $0x13bc] ss:$24 sps:$4 sm:$0xff]  }
 0x239   :  { %5511 = vmatprep.subr.bf16.mxu0 %v8196_v11  ;;  %v8262_v9 = vld [vmem:[%s11442_s1 + $0xdc4] ss:$24 sps:$4 sm:$0xff]   ;;  %v5784_v11 = vmul.f32 1.442695, %v5777_v3  ;;  %v8311_v3 = vld [vmem:[%s11442_s1 + $0x1568] ss:$24 sps:$4 sm:$0xff]  }
 0x23b   :  { %5266 = vmatpush1.bf16.msra.mxu1 %v8191_v34  ;;  %v8257_v34 = vld [vmem:[%s11442_s1 + $0x13b8] ss:$24 sps:$4 sm:$0xff]   ;;  %8491 = vpow2.f32 %v5784_v11  ;;  %v8325_v11 = vld [vmem:[%s11442_s1 + $0x15cc] ss:$24 sps:$4 sm:$0xff]  }
 0x23c   :  { %5512 = vmatpush1.bf16.msra.mxu0 %v8194_v12  ;;  %5267 = vmatprep.subr.bf16.mxu1 %v8199_v13  ;;  %v8260_v12 = vld [vmem:[%s11442_s1 + $0xdc0] ss:$24 sps:$4 sm:$0xff]   ;;  %v8265_v13 = vld [vmem:[%s11442_s1 + $0x13ec] ss:$24 sps:$4 sm:$0xff]  }
 0x23d   :  { %5513 = vmatprep.subr.bf16.mxu0 %v8202_v57  ;;  %v8268_v57 = vld [vmem:[%s11442_s1 + $0xdf4] ss:$24 sps:$4 sm:$0xff]  }
 0x23f   :  { %5268 = vmatpush1.bf16.msra.mxu1 %v8197_v53  ;;  %v5692_v53 = vsub.s32 0, %v10528_v30 }
 0x240   :  { %5514 = vmatpush1.bf16.msra.mxu0 %v8200_v14  ;;  %5278 = vmatprep.subr.bf16.mxu1 %v8205_v15  ;;  %v8263_v14 = vld [vmem:[%s11442_s1 + $0x13e8] ss:$24 sps:$4 sm:$0xff]  }
 0x241   :  { %5524 = vmatprep.subr.bf16.mxu0 %v8208_v17  ;;  %v8266_v15 = vld [vmem:[%s11442_s1 + $0xdf0] ss:$24 sps:$4 sm:$0xff]   ;;  %v8271_v17 = vld [vmem:[%s11442_s1 + $0x141c] ss:$24 sps:$4 sm:$0xff]  }
 0x242   :  { %5270 = vmatmul.mubr.bf16.vlgmr.msra.gmra.mrb[4].mxu1 %v9288_v36 }
 0x243   :  { %5516 = vmatmul.mubr.bf16.vlgmr.msra.gmra.mrb[4].mxu0 %v8844_v7  ;;  %5279 = vmatpush1.bf16.msra.mxu1 %v8203_v19  ;;  %v8220_v7 = vld [vmem:[%s11442_s1 + $0xc74] ss:$24 sps:$4 sm:$0xff]   ;;  %v8274_v19 = vld [vmem:[%s11442_s1 + $0xe24] ss:$24 sps:$4 sm:$0xff]  }
 0x244   :  { %5525 = vmatpush1.bf16.msra.mxu0 %v8206_v20  ;;  %5280 = vmatprep.subr.bf16.mxu1 %v8211_v21  ;;  %v5693_v20 = vrot.slane %v10548_v6, %v5692_v53  ;;  %v8269_v21 = vld [vmem:[%s11442_s1 + $0x1418] ss:$24 sps:$4 sm:$0xff]  }
 0x245   :  { %5526 = vmatprep.subr.bf16.mxu0 %v8214_v26  ;;  %5310 = vmatprep.mubr.bf16.mxu1 %v9309_v41  ;;  %v8272_v26 = vld [vmem:[%s11442_s1 + $0xe20] ss:$24 sps:$4 sm:$0xff]  }
 0x246   :  { %5556 = vmatprep.mubr.bf16.mxu0 %v8945_v38  ;;  %v8226_v38 = vld [vmem:[%s11442_s1 + $0xca4] ss:$24 sps:$4 sm:$0xff]   ;;  %v8281_v6 = vld [vmem:[%s11442_s1 + $0x1478] ss:$24 sps:$4 sm:$0xff]  }
 0x247   :  { %5281 = vmatpush1.bf16.msra.mxu1 %v8209_v27  ;;  %v8280_v27 = vld [vmem:[%s11442_s1 + $0xe54] ss:$24 sps:$4 sm:$0xff]  }
 0x248   :  { %5527 = vmatpush1.bf16.msra.mxu0 %v8212_v28  ;;  %5282 = vmatprep.subr.bf16.mxu1 %v8217_v29  ;;  %v8492_v28 = vpop.eup %8491  ;;  %v5720_v29 = vmul.f32 %v10377_v32, %v5693_v20  ;;  %v8286_v32 = vld [vmem:[%s11442_s1 + $0xe84] ss:$24 sps:$4 sm:$0xff]  }
 0x249   :  { %5528 = vmatprep.subr.bf16.mxu0 %v8220_v7  ;;  %v5731_v7 = vrot.slane %v10566_v35, %v5692_v53  ;;  %v8290_v35 = vld [vmem:[%s11442_s1 + $0xeb0] ss:$24 sps:$4 sm:$0xff]   ;;  %v8337_v20 = vld [vmem:[%s11442_s1 + $0x162c] ss:$24 sps:$4 sm:$0xff]  }
 0x24b   :  { %5283 = vmatpush1.bf16.msra.mxu1 %v8215_v31  ;;  %v8275_v31 = vld [vmem:[%s11442_s1 + $0x1448] ss:$24 sps:$4 sm:$0xff]   ;;  %v10685_v23 = vadd.f32 %v5731_v7, %v5720_v29  ;;  %v8343_v29 = vld [vmem:[%s11442_s1 + $0x165c] ss:$24 sps:$4 sm:$0xff]  }
 0x24c   :  { %5529 = vmatpush1.bf16.msra.mxu0 %v8218_v33  ;;  %5284 = vmatprep.subr.bf16.mxu1 %v8223_v22  ;;  %v8278_v33 = vld [vmem:[%s11442_s1 + $0xe50] ss:$24 sps:$4 sm:$0xff]   ;;  %v8283_v22 = vld [vmem:[%s11442_s1 + $0x147c] ss:$24 sps:$4 sm:$0xff]  }
 0x24d   :  { %5530 = vmatprep.subr.bf16.mxu0 %v8226_v38  ;;  %v5795_v38 = vadd.f32 1.0, %v8492_v28  ;;  %v8346_v7 = vld [vmem:[%s11442_s1 + $0x1064] ss:$24 sps:$4 sm:$0xff]  }
 0x24f   :  { %5285 = vmatpush1.bf16.msra.mxu1 %v8221_v40  ;;  %v8284_v40 = vld [vmem:[%s11442_s1 + $0xe80] ss:$24 sps:$4 sm:$0xff]   ;;  %8493 = vlog2.f32 %v5795_v38 }
 0x250   :  { %5531 = vmatpush1.bf16.msra.mxu0 %v8224_v60  ;;  %5286 = vmatprep.subr.bf16.mxu1 %v8229_v61  ;;  %v8289_v60 = vld [vmem:[%s11442_s1 + $0x14ac] ss:$24 sps:$4 sm:$0xff]  }
 0x251   :  { %5532 = vmatprep.subr.bf16.mxu0 %v8232_v42  ;;  %v8292_v61 = vld [vmem:[%s11442_s1 + $0xeb4] ss:$24 sps:$4 sm:$0xff]   ;;  %v5770_v42 = vand.u32 2147483647, %v10685_v23 }
 0x253   :  { %5287 = vmatpush1.bf16.msra.mxu1 %v8227_v44  ;;  %v8295_v44 = vld [vmem:[%s11442_s1 + $0x14dc] ss:$24 sps:$4 sm:$0xff]  }
 0x254   :  { %5533 = vmatpush1.bf16.msra.mxu0 %v8230_v45  ;;  %5288 = vmatprep.subr.bf16.mxu1 %v8235_v46  ;;  %v8298_v45 = vld [vmem:[%s11442_s1 + $0xee4] ss:$24 sps:$4 sm:$0xff]   ;;  %v5776_v46 = vsub.f32 0.0, %v5770_v42 }
 0x255   :  { %5534 = vmatprep.subr.bf16.mxu0 %v8238_v47  ;;  %v8293_v47 = vld [vmem:[%s11442_s1 + $0x14d8] ss:$24 sps:$4 sm:$0xff]  }
 0x257   :  { %5289 = vmatpush1.bf16.msra.mxu1 %v8233_v51  ;;  %v8304_v51 = vld [vmem:[%s11442_s1 + $0xf14] ss:$24 sps:$4 sm:$0xff]  }
 0x258   :  { %5535 = vmatpush1.bf16.msra.mxu0 %v8236_v52  ;;  %5290 = vmatprep.subr.bf16.mxu1 %v8241_v54  ;;  %v5782_v52 = vmul.f32 1.442695, %v5776_v46  ;;  %v8299_v54 = vld [vmem:[%s11442_s1 + $0x1508] ss:$24 sps:$4 sm:$0xff]   ;;  %v8364_v46 = vld [vmem:[%s11442_s1 + $0x10f4] ss:$24 sps:$4 sm:$0xff]  }
 0x259   :  { %5536 = vmatprep.subr.bf16.mxu0 %v8244_v37  ;;  %v8302_v37 = vld [vmem:[%s11442_s1 + $0xf10] ss:$24 sps:$4 sm:$0xff]  }
 0x25a   :  { %8495 = vpow2.f32 %v5782_v52  ;;  %v8370_v52 = vld [vmem:[%s11442_s1 + $0x1124] ss:$24 sps:$4 sm:$0xff]  }
 0x25b   :  { %5291 = vmatpush1.bf16.msra.mxu1 %v8239_v58  ;;  %v8494_v58 = vpop.eup %8493 }
 0x25c   :  { %5537 = vmatpush1.bf16.msra.mxu0 %v8242_v39  ;;  %5292 = vmatprep.subr.bf16.mxu1 %v8247_v62  ;;  %v8307_v39 = vld [vmem:[%s11442_s1 + $0x153c] ss:$24 sps:$4 sm:$0xff]  }
 0x25d   :  { %5538 = vmatprep.subr.bf16.mxu0 %v8250_v16  ;;  %v8310_v62 = vld [vmem:[%s11442_s1 + $0xf44] ss:$24 sps:$4 sm:$0xff]   ;;  %v5803_v16 = vmul.f32 0.6931472, %v8494_v58  ;;  %v8368_v58 = vld [vmem:[%s11442_s1 + $0x1120] ss:$24 sps:$4 sm:$0xff]  }
 0x25f   :  { %5293 = vmatpush1.bf16.msra.mxu1 %v8245_v0  ;;  %v8308_v0 = vld [vmem:[%s11442_s1 + $0xf40] ss:$24 sps:$4 sm:$0xff]  }
 0x260   :  { %5539 = vmatpush1.bf16.msra.mxu0 %v8248_v24  ;;  %5294 = vmatprep.subr.bf16.mxu1 %v8253_v1  ;;  %v8313_v24 = vld [vmem:[%s11442_s1 + $0x156c] ss:$24 sps:$4 sm:$0xff]   ;;  %v5765_v1 = vmax.f32 %v10594_v56, 0.0 }
 0x261   :  { %5540 = vmatprep.subr.bf16.mxu0 %v8256_v2 }
 0x262   :  { %v5813_v2 = vadd.f32 %v5803_v16, %v5765_v1  ;;  %v8382_v1 = vld [vmem:[%s11442_s1 + $0x1184] ss:$24 sps:$4 sm:$0xff]  }
 0x263   :  { %5295 = vmatpush1.bf16.msra.mxu1 %v8251_v4  ;;  %v8314_v4 = vld [vmem:[%s11442_s1 + $0xf70] ss:$24 sps:$4 sm:$0xff]  }
 0x264   :  { %5541 = vmatpush1.bf16.msra.mxu0 %v8254_v5  ;;  %5296 = vmatprep.subr.bf16.mxu1 %v8259_v8  ;;  %v8319_v5 = vld [vmem:[%s11442_s1 + $0x159c] ss:$24 sps:$4 sm:$0xff]   ;;  %8497 = vtanh.f32 %v5813_v2  ;;  %v8317_v8 = vld [vmem:[%s11442_s1 + $0x1598] ss:$24 sps:$4 sm:$0xff]  }
 0x265   :  { %5542 = vmatprep.subr.bf16.mxu0 %v8262_v9  ;;  %v8320_v9 = vld [vmem:[%s11442_s1 + $0xfa0] ss:$24 sps:$4 sm:$0xff]  }
 0x267   :  { %5297 = vmatpush1.bf16.msra.mxu1 %v8257_v34  ;;  %v8328_v34 = vld [vmem:[%s11442_s1 + $0xfd4] ss:$24 sps:$4 sm:$0xff]  }
 0x268   :  { %5543 = vmatpush1.bf16.msra.mxu0 %v8260_v12  ;;  %5298 = vmatprep.subr.bf16.mxu1 %v8265_v13  ;;  %v8496_v12 = vpop.eup %8495  ;;  %v8323_v13 = vld [vmem:[%s11442_s1 + $0x15c8] ss:$24 sps:$4 sm:$0xff]  }
 0x269   :  { %5544 = vmatprep.subr.bf16.mxu0 %v8268_v57  ;;  %v8326_v57 = vld [vmem:[%s11442_s1 + $0xfd0] ss:$24 sps:$4 sm:$0xff]   ;;  %v5794_v53 = vadd.f32 1.0, %v8496_v12 }
 0x26a   :  { %v8386_v12 = vld [vmem:[%s11442_s1 + $0x11b0] ss:$24 sps:$4 sm:$0xff]  }
 0x26b   :  { %5299 = vmatpush1.bf16.msra.mxu1 %v8263_v14  ;;  %v8331_v14 = vld [vmem:[%s11442_s1 + $0x15fc] ss:$24 sps:$4 sm:$0xff]   ;;  %8499 = vlog2.f32 %v5794_v53  ;;  %v5884_v53 = vld [vmem:[%s11445_s4 + $0x88] sm:$0xff] }
 0x26c   :  { %5545 = vmatpush1.bf16.msra.mxu0 %v8266_v15  ;;  %5300 = vmatprep.subr.bf16.mxu1 %v8271_v17  ;;  %v8334_v15 = vld [vmem:[%s11442_s1 + $0x1004] ss:$24 sps:$4 sm:$0xff]   ;;  %v8329_v17 = vld [vmem:[%s11442_s1 + $0x15f8] ss:$24 sps:$4 sm:$0xff]  }
 0x26d   :  { %5546 = vmatprep.subr.bf16.mxu0 %v8274_v19  ;;  %v8332_v19 = vld [vmem:[%s11442_s1 + $0x1000] ss:$24 sps:$4 sm:$0xff]  }
 0x26f   :  { %5301 = vmatpush1.bf16.msra.mxu1 %v8269_v21  ;;  %v8340_v21 = vld [vmem:[%s11442_s1 + $0x1034] ss:$24 sps:$4 sm:$0xff]  }
 0x270   :  { %5547 = vmatpush1.bf16.msra.mxu0 %v8272_v26  ;;  %5302 = vmatprep.subr.bf16.mxu1 %v8277_v48  ;;  %v8498_v26 = vpop.eup %8497  ;;  %v8335_v48 = vld [vmem:[%s11442_s1 + $0x1628] ss:$24 sps:$4 sm:$0xff]  }
 0x271   :  { %5548 = vmatprep.subr.bf16.mxu0 %v8280_v27  ;;  %v8338_v27 = vld [vmem:[%s11442_s1 + $0x1030] ss:$24 sps:$4 sm:$0xff]   ;;  %v5825_v28 = vmul.f32 %v8498_v26, %v10594_v56  ;;  %v8344_v56 = vld [vmem:[%s11442_s1 + $0x1060] ss:$24 sps:$4 sm:$0xff]  }
 0x272   :  { %v5868_v26 = vld [vmem:[%s11445_s4 + $0x8] sm:$0xff] }
 0x273   :  { %5303 = vmatpush1.bf16.msra.mxu1 %v8275_v31  ;;  %v8341_v31 = vld [vmem:[%s11442_s1 + $0x1658] ss:$24 sps:$4 sm:$0xff]  }
 0x274   :  { %5549 = vmatpush1.bf16.msra.mxu0 %v8278_v33  ;;  %5304 = vmatprep.subr.bf16.mxu1 %v8283_v22  ;;  %v5831_v33 = vmax.f32 %v5825_v28, 1e-06  ;;  %v8349_v22 = vld [vmem:[%s11442_s1 + $0x168c] ss:$24 sps:$4 sm:$0xff]   ;;  %v8395_v28 = vld [vmem:[%s11442_s1 + $0x1210] ss:$24 sps:$4 sm:$0xff]  }
 0x275   :  { %5550 = vmatprep.subr.bf16.mxu0 %v8286_v32  ;;  %v8352_v32 = vld [vmem:[%s11442_s1 + $0x1094] ss:$24 sps:$4 sm:$0xff]   ;;  %v8500_v38 = vpop.eup %8499 }
 0x276   :  { %8501 = vlog2.f32 %v5831_v33  ;;  %v5801_v42 = vmul.f32 0.6931472, %v8500_v38 }
 0x277   :  { %5305 = vmatpush1.bf16.msra.mxu1 %v8281_v6  ;;  %v8347_v6 = vld [vmem:[%s11442_s1 + $0x1688] ss:$24 sps:$4 sm:$0xff]  }
 0x278   :  { %5551 = vmatpush1.bf16.msra.mxu0 %v8284_v40  ;;  %5306 = vmatprep.subr.bf16.mxu1 %v8289_v60  ;;  %v8350_v40 = vld [vmem:[%s11442_s1 + $0x1090] ss:$24 sps:$4 sm:$0xff]   ;;  %v8355_v60 = vld [vmem:[%s11442_s1 + $0x16bc] ss:$24 sps:$4 sm:$0xff]  }
 0x279   :  { %5552 = vmatprep.subr.bf16.mxu0 %v8292_v61  ;;  %v8358_v61 = vld [vmem:[%s11442_s1 + $0x10c4] ss:$24 sps:$4 sm:$0xff]  }
 0x27b   :  { %5307 = vmatpush1.bf16.msra.mxu1 %v8287_v43  ;;  %v5764_v43 = vmax.f32 %v10685_v23, 0.0 }
 0x27c   :  { %5553 = vmatpush1.bf16.msra.mxu0 %v8290_v35  ;;  %5308 = vmatprep.subr.bf16.mxu1 %v8295_v44  ;;  %v8353_v35 = vld [vmem:[%s11442_s1 + $0x16b8] ss:$24 sps:$4 sm:$0xff]  }
 0x27d   :  { %5554 = vmatprep.subr.bf16.mxu0 %v8298_v45  ;;  %v8356_v44 = vld [vmem:[%s11442_s1 + $0x10c0] ss:$24 sps:$4 sm:$0xff]   ;;  %v8361_v45 = vld [vmem:[%s11442_s1 + $0x16ec] ss:$24 sps:$4 sm:$0xff]  }
 0x27f   :  { %5309 = vmatpush1.bf16.msra.mxu1 %v8293_v47  ;;  %v5812_v47 = vadd.f32 %v5801_v42, %v5764_v43  ;;  %v5871_v42 = vld [vmem:[%s11445_s4 + $0x20] sm:$0xff]  ;;  %v5889_v43 = vld [vmem:[%s11445_s4 + $0xb0] sm:$0xff] }
 0x280   :  { %5555 = vmatpush1.bf16.msra.mxu0 %v8296_v49  ;;  %5319 = vmatprep.subr.bf16.mxu1 %v8301_v50  ;;  %v8359_v49 = vld [vmem:[%s11442_s1 + $0x16e8] ss:$24 sps:$4 sm:$0xff]  }
 0x281   :  { %5565 = vmatprep.subr.bf16.mxu0 %v8304_v51  ;;  %v8362_v50 = vld [vmem:[%s11442_s1 + $0x10f0] ss:$24 sps:$4 sm:$0xff]   ;;  %v8367_v51 = vld [vmem:[%s11442_s1 + $0x171c] ss:$24 sps:$4 sm:$0xff]   ;;  %8503 = vtanh.f32 %v5812_v47 }
 0x282   :  { %5311 = vmatmul.mubr.bf16.vlgmr.msra.gmra.mrb[4].mxu1 %v9500_v55  ;;  %v8406_v47 = vld [vmem:[%s11442_s1 + $0x12a4] ss:$24 sps:$4 sm:$0xff]  }
 0x283   :  { %5557 = vmatmul.mubr.bf16.vlgmr.msra.gmra.mrb[4].mxu0 %v9069_v18  ;;  %5320 = vmatpush1.bf16.msra.mxu1 %v8299_v54  ;;  %v8316_v18 = vld [vmem:[%s11442_s1 + $0xf74] ss:$24 sps:$4 sm:$0xff]   ;;  %v8502_v54 = vpop.eup %8501 }
 0x284   :  { %5566 = vmatpush1.bf16.msra.mxu0 %v8302_v37  ;;  %5321 = vmatprep.subr.bf16.mxu1 %v8307_v39  ;;  %v8365_v37 = vld [vmem:[%s11442_s1 + $0x1718] ss:$24 sps:$4 sm:$0xff]   ;;  %v8373_v39 = vld [vmem:[%s11442_s1 + $0x174c] ss:$24 sps:$4 sm:$0xff]   ;;  %v5839_v16 = vmul.f32 0.6931472, %v8502_v54 }
 0x285   :  { %5567 = vmatprep.subr.bf16.mxu0 %v8310_v62  ;;  %5351 = vmatprep.mubr.bf16.mxu1 %v9518_v59  ;;  %v8376_v62 = vld [vmem:[%s11442_s1 + $0x1154] ss:$24 sps:$4 sm:$0xff]  }
 0x286   :  { %5597 = vmatprep.mubr.bf16.mxu0 %v9096_v25  ;;  %v8322_v25 = vld [vmem:[%s11442_s1 + $0xfa4] ss:$24 sps:$4 sm:$0xff]  }
 0x287   :  { %5322 = vmatpush1.bf16.msra.mxu1 %v8305_v63  ;;  %v10878_v63 = vstv %s11448_s7 }
 0x288   :  { %5568 = vmatpush1.bf16.msra.mxu0 %v8308_v0  ;;  %5323 = vmatprep.subr.bf16.mxu1 %v8313_v24  ;;  %v8371_v0 = vld [vmem:[%s11442_s1 + $0x1748] ss:$24 sps:$4 sm:$0xff]   ;;  %v5850_v2 = vmul.f32 %v10878_v63, %v5839_v16 }
 0x289   :  { %5569 = vmatprep.subr.bf16.mxu0 %v8316_v18  ;;  %v8374_v24 = vld [vmem:[%s11442_s1 + $0x1150] ss:$24 sps:$4 sm:$0xff]   ;;  %v8379_v18 = vld [vmem:[%s11442_s1 + $0x177c] ss:$24 sps:$4 sm:$0xff]   ;;  %v5875_v16 = vld [vmem:[%s11445_s4 + $0x40] sm:$0xff] }
 0x28b   :  { %5324 = vmatpush1.bf16.msra.mxu1 %v8311_v3  ;;  %v8504_v3 = vpop.eup %8503 }
 0x28c   :  { %5570 = vmatpush1.bf16.msra.mxu0 %v8314_v4  ;;  %5325 = vmatprep.subr.bf16.mxu1 %v8319_v5  ;;  %v8377_v4 = vld [vmem:[%s11442_s1 + $0x1778] ss:$24 sps:$4 sm:$0xff]  }
 0x28d   :  { %5571 = vmatprep.subr.bf16.mxu0 %v8322_v25  ;;  %v8380_v5 = vld [vmem:[%s11442_s1 + $0x1180] ss:$24 sps:$4 sm:$0xff]   ;;  %v8385_v25 = vld [vmem:[%s11442_s1 + $0x17ac] ss:$24 sps:$4 sm:$0xff]  }
 0x28f   :  { %5326 = vmatpush1.bf16.msra.mxu1 %v8317_v8  ;;  %v8388_v8 = vld [vmem:[%s11442_s1 + $0x11b4] ss:$24 sps:$4 sm:$0xff]  }
 0x290   :  { %5572 = vmatpush1.bf16.msra.mxu0 %v8320_v9  ;;  %5327 = vmatprep.subr.bf16.mxu1 %v8325_v11  ;;  %v5857_v9 = vmul.f32 1.442695, %v5850_v2  ;;  %v5824_v11 = vmul.f32 %v8504_v3, %v10685_v23  ;;  %v8394_v23 = vld [vmem:[%s11442_s1 + $0x11e4] ss:$24 sps:$4 sm:$0xff]   ;;  %v8407_v2 = vld [vmem:[%s11442_s1 + $0x12d0] ss:$24 sps:$4 sm:$0xff]  }
 0x291   :  { %5573 = vmatprep.subr.bf16.mxu0 %v8328_v34  ;;  %v8383_v34 = vld [vmem:[%s11442_s1 + $0x17a8] ss:$24 sps:$4 sm:$0xff]  }
 0x292   :  { %8505 = vpow2.f32 %v5857_v9  ;;  %v5895_v9 = vld [vmem:[%s11445_s4 + $0xe0] sm:$0xff] }
 0x293   :  { %5328 = vmatpush1.bf16.msra.mxu1 %v8323_v13  ;;  %v8391_v13 = vld [vmem:[%s11442_s1 + $0x17dc] ss:$24 sps:$4 sm:$0xff]  }
 0x294   :  { %5574 = vmatpush1.bf16.msra.mxu0 %v8326_v57  ;;  %5329 = vmatprep.subr.bf16.mxu1 %v8331_v14  ;;  %v5883_v57 = vld [vmem:[%s11445_s4 + $0x80] sm:$0xff]  ;;  %v5830_v14 = vmax.f32 %v5824_v11, 1e-06  ;;  %v5896_v11 = vld [vmem:[%s11445_s4 + $0xe8] sm:$0xff] }
 0x295   :  { %5575 = vmatprep.subr.bf16.mxu0 %v8334_v15  ;;  %v8389_v15 = vld [vmem:[%s11442_s1 + $0x17d8] ss:$24 sps:$4 sm:$0xff]  }
 0x296   :  { %8507 = vlog2.f32 %v5830_v14  ;;  %v5880_v14 = vld [vmem:[%s11445_s4 + $0x68] sm:$0xff] }
 0x297   :  { %5330 = vmatpush1.bf16.msra.mxu1 %v8329_v17  ;;  %v8392_v17 = vld [vmem:[%s11442_s1 + $0x11e0] ss:$24 sps:$4 sm:$0xff]  }
 0x298   :  { %5576 = vmatpush1.bf16.msra.mxu0 %v8332_v19  ;;  %5331 = vmatprep.subr.bf16.mxu1 %v8337_v20  ;;  %v8397_v19 = vld [vmem:[%s11442_s1 + $0x1214] ss:$24 sps:$4 sm:$0xff]   ;;  %v7143_v20 = vpack.c.bf16 %v5884_v53, %v5883_v57  ;;  %v7167_v57 = vpack.c.bf16 %v5896_v11, %v5895_v9  ;;  %v5879_v53 = vld [vmem:[%s11445_s4 + $0x60] sm:$0xff]  ;;  %v8479_v9 = vld [vmem:[%s11442_s1 + $0x1750] ss:$24 sps:$4 sm:$0xff]  }
 0x299   :  { %5577 = vmatprep.subr.bf16.mxu0 %v8340_v21  ;;  %v5867_v21 = vld [vmem:[%s11445_s4] sm:$0xff] }
 0x29a   :  { %v8484_v11 = vld [vmem:[%s11442_s1 + $0x1784] ss:$24 sps:$4 sm:$0xff]  }
 0x29b   :  { %5332 = vmatpush1.bf16.msra.mxu1 %v8335_v48  ;;  %v5885_v48 = vld [vmem:[%s11445_s4 + $0x90] sm:$0xff] }
 0x29c   :  { %5578 = vmatpush1.bf16.msra.mxu0 %v8338_v27  ;;  %5333 = vmatprep.subr.bf16.mxu1 %v8343_v29  ;;  %v5886_v27 = vld [vmem:[%s11445_s4 + $0x98] sm:$0xff]  ;;  %v7145_v29 = vpack.c.bf16 %v5868_v26, %v5867_v21  ;;  %v8506_v38 = vpop.eup %8505 }
 0x29d   :  { %5579 = vmatprep.subr.bf16.mxu0 %v8346_v7  ;;  %v8400_v7 = vld [vmem:[%s11442_s1 + $0x1244] ss:$24 sps:$4 sm:$0xff]   ;;  %v7147_v33 = vpack.c.bf16 %v5886_v27, %v5885_v48  ;;  %v5881_v48 = vld [vmem:[%s11445_s4 + $0x70] sm:$0xff] }
 0x29e   :  { %v8418_v21 = vld [vmem:[%s11442_s1 + $0x1364] ss:$24 sps:$4 sm:$0xff]  }
 0x29f   :  { %5334 = vmatpush1.bf16.msra.mxu1 %v8341_v31  ;;  %v5869_v31 = vld [vmem:[%s11445_s4 + $0x10] sm:$0xff]  ;;  %v5882_v27 = vld [vmem:[%s11445_s4 + $0x78] sm:$0xff] }
 0x2a0   :  { %5580 = vmatpush1.bf16.msra.mxu0 %v8344_v56  ;;  %5335 = vmatprep.subr.bf16.mxu1 %v8349_v22  ;;  %v5870_v56 = vld [vmem:[%s11445_s4 + $0x18] sm:$0xff]  ;;  %v5887_v22 = vld [vmem:[%s11445_s4 + $0xa0] sm:$0xff] }
 0x2a1   :  { %5581 = vmatprep.subr.bf16.mxu0 %v8352_v32  ;;  %v5888_v32 = vld [vmem:[%s11445_s4 + $0xa8] sm:$0xff] }
 0x2a3   :  { %5336 = vmatpush1.bf16.msra.mxu1 %v8347_v6  ;;  %v8398_v6 = vld [vmem:[%s11442_s1 + $0x1240] ss:$24 sps:$4 sm:$0xff]  }
 0x2a4   :  { %5582 = vmatpush1.bf16.msra.mxu0 %v8350_v40  ;;  %5337 = vmatprep.subr.bf16.mxu1 %v8355_v60  ;;  %v7149_v40 = vpack.c.bf16 %v5870_v56, %v5869_v31  ;;  %v8403_v60 = vld [vmem:[%s11442_s1 + $0x1274] ss:$24 sps:$4 sm:$0xff]   ;;  %v8419_v31 = vld [vmem:[%s11442_s1 + $0x1390] ss:$24 sps:$4 sm:$0xff]   ;;  %v8424_v56 = vld [vmem:[%s11442_s1 + $0x13c4] ss:$24 sps:$4 sm:$0xff]  }
 0x2a5   :  { %5583 = vmatprep.subr.bf16.mxu0 %v8358_v61  ;;  %v7151_v61 = vpack.c.bf16 %v5888_v32, %v5887_v22  ;;  %v8422_v22 = vld [vmem:[%s11442_s1 + $0x13c0] ss:$24 sps:$4 sm:$0xff]   ;;  %v8427_v32 = vld [vmem:[%s11442_s1 + $0x13f4] ss:$24 sps:$4 sm:$0xff]  }
 0x2a7   :  { %5338 = vmatpush1.bf16.msra.mxu1 %v8353_v35  ;;  %v5890_v35 = vld [vmem:[%s11445_s4 + $0xb8] sm:$0xff] }
 0x2a8   :  { %5584 = vmatpush1.bf16.msra.mxu0 %v8356_v44  ;;  %5339 = vmatprep.subr.bf16.mxu1 %v8361_v45  ;;  %v8401_v44 = vld [vmem:[%s11442_s1 + $0x1270] ss:$24 sps:$4 sm:$0xff]  }
 0x2a9   :  { %5585 = vmatprep.subr.bf16.mxu0 %v8364_v46  ;;  %v8508_v46 = vpop.eup %8507 }
 0x2aa   :  { %v5837_v54 = vmul.f32 0.6931472, %v8508_v46  ;;  %v8445_v46 = vld [vmem:[%s11442_s1 + $0x1514] ss:$24 sps:$4 sm:$0xff]  }
 0x2ab   :  { %5340 = vmatpush1.bf16.msra.mxu1 %v8359_v49  ;;  %v7155_v49 = vpack.c.bf16 %v5890_v35, %v5889_v43  ;;  %v8439_v43 = vld [vmem:[%s11442_s1 + $0x14b4] ss:$24 sps:$4 sm:$0xff]   ;;  %v8437_v35 = vld [vmem:[%s11442_s1 + $0x14b0] ss:$24 sps:$4 sm:$0xff]  }
 0x2ac   :  { %5586 = vmatpush1.bf16.msra.mxu0 %v8362_v50  ;;  %5341 = vmatprep.subr.bf16.mxu1 %v8367_v51  ;;  %v5873_v50 = vld [vmem:[%s11445_s4 + $0x30] sm:$0xff]  ;;  %v5891_v51 = vld [vmem:[%s11445_s4 + $0xc0] sm:$0xff] }
 0x2ad   :  { %5587 = vmatprep.subr.bf16.mxu0 %v8370_v52  ;;  %v5892_v52 = vld [vmem:[%s11445_s4 + $0xc8] sm:$0xff] }
 0x2af   :  { %5342 = vmatpush1.bf16.msra.mxu1 %v8365_v37  ;;  %v8404_v37 = vld [vmem:[%s11442_s1 + $0x12a0] ss:$24 sps:$4 sm:$0xff]  }
 0x2b0   :  { %5588 = vmatpush1.bf16.msra.mxu0 %v8368_v58  ;;  %5343 = vmatprep.subr.bf16.mxu1 %v8373_v39  ;;  %v8409_v39 = vld [vmem:[%s11442_s1 + $0x12d4] ss:$24 sps:$4 sm:$0xff]  }
 0x2b1   :  { %5589 = vmatprep.subr.bf16.mxu0 %v8376_v62  ;;  %v7159_v62 = vpack.c.bf16 %v5892_v52, %v5891_v51  ;;  %v8449_v51 = vld [vmem:[%s11442_s1 + $0x1570] ss:$24 sps:$4 sm:$0xff]   ;;  %v8457_v52 = vld [vmem:[%s11442_s1 + $0x15d4] ss:$24 sps:$4 sm:$0xff]  }
 0x2b3   :  { %5344 = vmatpush1.bf16.msra.mxu1 %v8371_v0  ;;  %v5876_v0 = vld [vmem:[%s11445_s4 + $0x48] sm:$0xff] }
 0x2b4   :  { %5590 = vmatpush1.bf16.msra.mxu0 %v8374_v24  ;;  %5345 = vmatprep.subr.bf16.mxu1 %v8379_v18  ;;  %v5893_v24 = vld [vmem:[%s11445_s4 + $0xd0] sm:$0xff]  ;;  %v5894_v18 = vld [vmem:[%s11445_s4 + $0xd8] sm:$0xff]  ;;  %v7161_v3 = vpack.c.bf16 %v5876_v0, %v5875_v16 }
 0x2b5   :  { %5591 = vmatprep.subr.bf16.mxu0 %v8382_v1  ;;  %v5849_v1 = vmul.f32 %v10878_v63, %v5837_v54  ;;  %v8455_v54 = vld [vmem:[%s11442_s1 + $0x15d0] ss:$24 sps:$4 sm:$0xff]   ;;  %v8466_v16 = vld [vmem:[%s11442_s1 + $0x1664] ss:$24 sps:$4 sm:$0xff]   ;;  %v8464_v0 = vld [vmem:[%s11442_s1 + $0x1660] ss:$24 sps:$4 sm:$0xff]  }
 0x2b7   :  { %5346 = vmatpush1.bf16.msra.mxu1 %v8377_v4  ;;  %v8412_v4 = vld [vmem:[%s11442_s1 + $0x1304] ss:$24 sps:$4 sm:$0xff]  }
 0x2b8   :  { %5592 = vmatpush1.bf16.msra.mxu0 %v8380_v5  ;;  %5347 = vmatprep.subr.bf16.mxu1 %v8385_v25  ;;  %v7163_v5 = vpack.c.bf16 %v5894_v18, %v5893_v24  ;;  %v5877_v25 = vld [vmem:[%s11445_s4 + $0x50] sm:$0xff] }
 0x2b9   :  { %5593 = vmatprep.subr.bf16.mxu0 %v8388_v8  ;;  %v5878_v8 = vld [vmem:[%s11445_s4 + $0x58] sm:$0xff]  ;;  %v8469_v24 = vld [vmem:[%s11442_s1 + $0x1694] ss:$24 sps:$4 sm:$0xff]   ;;  %v8467_v18 = vld [vmem:[%s11442_s1 + $0x1690] ss:$24 sps:$4 sm:$0xff]  }
 0x2bb   :  { %5348 = vmatpush1.bf16.msra.mxu1 %v8383_v34  ;;  %v5855_v34 = vmul.f32 1.442695, %v5849_v1  ;;  %v8472_v1 = vld [vmem:[%s11442_s1 + $0x16c4] ss:$24 sps:$4 sm:$0xff]  }
 0x2bc   :  { %5594 = vmatpush1.bf16.msra.mxu0 %v8386_v12  ;;  %5349 = vmatprep.subr.bf16.mxu1 %v8391_v13  ;;  %v8410_v12 = vld [vmem:[%s11442_s1 + $0x1300] ss:$24 sps:$4 sm:$0xff]   ;;  %v7165_v13 = vpack.c.bf16 %v5878_v8, %v5877_v25  ;;  %v8481_v8 = vld [vmem:[%s11442_s1 + $0x1754] ss:$24 sps:$4 sm:$0xff]  }
 0x2bd   :  { %5595 = vmatprep.subr.bf16.mxu0 %v8394_v23  ;;  %v8415_v23 = vld [vmem:[%s11442_s1 + $0x1334] ss:$24 sps:$4 sm:$0xff]   ;;  %8509 = vpow2.f32 %v5855_v34  ;;  %v8476_v25 = vld [vmem:[%s11442_s1 + $0x1720] ss:$24 sps:$4 sm:$0xff]  }
 0x2be   :  { %v8482_v34 = vld [vmem:[%s11442_s1 + $0x1780] ss:$24 sps:$4 sm:$0xff]  }
 0x2bf   :  { %5350 = vmatpush1.bf16.msra.mxu1 %v8389_v15  ;;  %v5897_v15 = vld [vmem:[%s11445_s4 + $0xf0] sm:$0xff] }
 0x2c0   :  { %5596 = vmatpush1.bf16.msra.mxu0 %v8392_v17  ;;  %7144 = vmatprep.subr.bf16.mxu1 %v7143_v20  ;;  %v5898_v17 = vld [vmem:[%s11445_s4 + $0xf8] sm:$0xff]  ;;  %v7169_v20 = vpack.c.bf16 %v5880_v14, %v5879_v53  ;;  %v5915_v53 = vld [vmem:[%s11445_s4 + $0x180] sm:$0xff]  ;;  %v5916_v14 = vld [vmem:[%s11445_s4 + $0x188] sm:$0xff] }
 0x2c1   :  { %5606 = vmatprep.subr.bf16.mxu0 %v8397_v19  ;;  %v8413_v19 = vld [vmem:[%s11442_s1 + $0x1330] ss:$24 sps:$4 sm:$0xff]   ;;  %v7171_v26 = vpack.c.bf16 %v5898_v17, %v5897_v15  ;;  %v7175_v15 = vpack.c.bf16 %v5916_v14, %v5915_v53  ;;  %v5899_v17 = vld [vmem:[%s11445_s4 + $0x100] sm:$0xff] }
 0x2c2   :  { %5352 = vmatmul.mubr.bf16.vlgmr.msra.gmra.mrb[4].mxu1 %v9706_v10 }
 0x2c3   :  { %5598 = vmatmul.mubr.bf16.vlgmr.msra.gmra.mrb[4].mxu0 %v9288_v36  ;;  %7146 = vmatpush3.bf16.msra.mxu1 %v7145_v29  ;;  %v5872_v36 = vld [vmem:[%s11445_s4 + $0x28] sm:$0xff]  ;;  %v7173_v29 = vpack.c.bf16 %v5882_v27, %v5881_v48  ;;  %v5901_v48 = vld [vmem:[%s11445_s4 + $0x110] sm:$0xff]  ;;  %v5902_v27 = vld [vmem:[%s11445_s4 + $0x118] sm:$0xff] }
 0x2c4   :  { %5607 = vmatpush1.bf16.msra.mxu0 %v8395_v28  ;;  %6024 = vmatprep.mubr.f32.mxu1 %v8506_v38  ;;  %v7153_v45 = vpack.c.bf16 %v5872_v36, %v5871_v42  ;;  %v8416_v28 = vld [vmem:[%s11442_s1 + $0x1360] ss:$24 sps:$4 sm:$0xff]   ;;  %v8425_v38 = vld [vmem:[%s11442_s1 + $0x13f0] ss:$24 sps:$4 sm:$0xff]   ;;  %v8436_v42 = vld [vmem:[%s11442_s1 + $0x1484] ss:$24 sps:$4 sm:$0xff]  }
 0x2c5   :  { %5608 = vmatprep.subr.bf16.mxu0 %v8400_v7  ;;  %7148 = vmatprep.subr.bf16.mxu1 %v7147_v33  ;;  %v8421_v7 = vld [vmem:[%s11442_s1 + $0x1394] ss:$24 sps:$4 sm:$0xff]   ;;  %v8434_v36 = vld [vmem:[%s11442_s1 + $0x1480] ss:$24 sps:$4 sm:$0xff]  }
 0x2c6   :  { %5638 = vmatprep.mubr.bf16.mxu0 %v9309_v41  ;;  %v5874_v41 = vld [vmem:[%s11445_s4 + $0x38] sm:$0xff] }
 0x2c7   :  { %7150 = vmatpush3.bf16.msra.mxu1 %v7149_v40  ;;  %v7157_v58 = vpack.c.bf16 %v5874_v41, %v5873_v50  ;;  %v8510_v33 = vpop.eup %8509  ;;  %v8428_v40 = vld [vmem:[%s11442_s1 + $0x1420] ss:$24 sps:$4 sm:$0xff]   ;;  %v8451_v41 = vld [vmem:[%s11442_s1 + $0x1574] ss:$24 sps:$4 sm:$0xff]  }
 0x2c8   :  { %5609 = vmatpush1.bf16.msra.mxu0 %v8398_v6  ;;  %7152 = vmatprep.subr.bf16.mxu1 %v7151_v61  ;;  %v8430_v6 = vld [vmem:[%s11442_s1 + $0x1424] ss:$24 sps:$4 sm:$0xff]   ;;  %v8431_v61 = vld [vmem:[%s11442_s1 + $0x1450] ss:$24 sps:$4 sm:$0xff]   ;;  %v8446_v50 = vld [vmem:[%s11442_s1 + $0x1540] ss:$24 sps:$4 sm:$0xff]  }
 0x2c9   :  { %5610 = vmatprep.subr.bf16.mxu0 %v8403_v60  ;;  %v8433_v60 = vld [vmem:[%s11442_s1 + $0x1454] ss:$24 sps:$4 sm:$0xff]  }
 0x2cb   :  { %7154 = vmatpush3.bf16.msra.mxu1 %v7153_v45  ;;  %v8440_v45 = vld [vmem:[%s11442_s1 + $0x14e0] ss:$24 sps:$4 sm:$0xff]  }
 0x2cc   :  { %5611 = vmatpush1.bf16.msra.mxu0 %v8401_v44  ;;  %7156 = vmatprep.subr.bf16.mxu1 %v7155_v49  ;;  %v8442_v44 = vld [vmem:[%s11442_s1 + $0x14e4] ss:$24 sps:$4 sm:$0xff]  }
 0x2cd   :  { %5612 = vmatprep.subr.bf16.mxu0 %v8406_v47  ;;  %v8443_v47 = vld [vmem:[%s11442_s1 + $0x1510] ss:$24 sps:$4 sm:$0xff]   ;;  %v8448_v49 = vld [vmem:[%s11442_s1 + $0x1544] ss:$24 sps:$4 sm:$0xff]  }
 0x2cf   :  { %7158 = vmatpush3.bf16.msra.mxu1 %v7157_v58  ;;  %v8458_v58 = vld [vmem:[%s11442_s1 + $0x1600] ss:$24 sps:$4 sm:$0xff]  }
 0x2d0   :  { %5613 = vmatpush1.bf16.msra.mxu0 %v8404_v37  ;;  %7160 = vmatprep.subr.bf16.mxu1 %v7159_v62  ;;  %v8460_v37 = vld [vmem:[%s11442_s1 + $0x1604] ss:$24 sps:$4 sm:$0xff]   ;;  %v8461_v62 = vld [vmem:[%s11442_s1 + $0x1630] ss:$24 sps:$4 sm:$0xff]  }
 0x2d1   :  { %5614 = vmatprep.subr.bf16.mxu0 %v8409_v39  ;;  %v8463_v39 = vld [vmem:[%s11442_s1 + $0x1634] ss:$24 sps:$4 sm:$0xff]  }
 0x2d3   :  { %7162 = vmatpush3.bf16.msra.mxu1 %v7161_v3  ;;  %v8475_v3 = vld [vmem:[%s11442_s1 + $0x16f4] ss:$24 sps:$4 sm:$0xff]  }
 0x2d4   :  { %5615 = vmatpush1.bf16.msra.mxu0 %v8407_v2  ;;  %7164 = vmatprep.subr.bf16.mxu1 %v7163_v5  ;;  %v8470_v2 = vld [vmem:[%s11442_s1 + $0x16c0] ss:$24 sps:$4 sm:$0xff]   ;;  %v8478_v5 = vld [vmem:[%s11442_s1 + $0x1724] ss:$24 sps:$4 sm:$0xff]  }
 0x2d5   :  { %5616 = vmatprep.subr.bf16.mxu0 %v8412_v4  ;;  %v8473_v4 = vld [vmem:[%s11442_s1 + $0x16f0] ss:$24 sps:$4 sm:$0xff]  }
 0x2d7   :  { %7166 = vmatpush3.bf16.msra.mxu1 %v7165_v13  ;;  %v8485_v13 = vld [vmem:[%s11442_s1 + $0x17b0] ss:$24 sps:$4 sm:$0xff]  }
 0x2d8   :  { %5617 = vmatpush1.bf16.msra.mxu0 %v8410_v12  ;;  %7168 = vmatprep.subr.bf16.mxu1 %v7167_v57  ;;  %v8487_v12 = vld [vmem:[%s11442_s1 + $0x17b4] ss:$24 sps:$4 sm:$0xff]   ;;  %v8488_v57 = vld [vmem:[%s11442_s1 + $0x17e0] ss:$24 sps:$4 sm:$0xff]  }
 0x2d9   :  { %5618 = vmatprep.subr.bf16.mxu0 %v8415_v23  ;;  %v8490_v23 = vld [vmem:[%s11442_s1 + $0x17e4] ss:$24 sps:$4 sm:$0xff]  }
 0x2db   :  { %7170 = vmatpush3.bf16.msra.mxu1 %v7169_v20 }
 0x2dc   :  { %5619 = vmatpush1.bf16.msra.mxu0 %v8413_v19  ;;  %7172 = vmatprep.subr.bf16.mxu1 %v7171_v26  ;;  %v5900_v19 = vld [vmem:[%s11445_s4 + $0x108] sm:$0xff] }
 0x2dd   :  { %5620 = vmatprep.subr.bf16.mxu0 %v8418_v21  ;;  %v7177_v20 = vpack.c.bf16 %v5900_v19, %v5899_v17  ;;  %v5918_v21 = vld [vmem:[%s11445_s4 + $0x198] sm:$0xff] }
 0x2df   :  { %7174 = vmatpush3.bf16.msra.mxu1 %v7173_v29  ;;  %v5919_v29 = vld [vmem:[%s11445_s4 + $0x1a0] sm:$0xff] }
 0x2e0   :  { %5621 = vmatpush1.bf16.msra.mxu0 %v8416_v28  ;;  %7176 = vmatprep.subr.bf16.mxu1 %v7175_v15  ;;  %v7181_v28 = vpack.c.bf16 %v5902_v27, %v5901_v48 }
 0x2e1   :  { %5622 = vmatprep.subr.bf16.mxu0 %v8421_v7  ;;  %v5920_v7 = vld [vmem:[%s11445_s4 + $0x1a8] sm:$0xff] }
 0x2e2   :  { %6025 = vmatmul.mubr.f32.vlgmr.msra.gmra.mrb[8].mxu1 %v8510_v33  ;;  %v5904_v33 = vld [vmem:[%s11445_s4 + $0x128] sm:$0xff] }
 0x2e3   :  { %7178 = vmatpush3.bf16.msra.mxu1 %v7177_v20 }
 0x2e4   :  { %5623 = vmatpush1.bf16.msra.mxu0 %v8419_v31  ;;  %v7183_v31 = vpack.c.bf16 %v5920_v7, %v5919_v29 }
 0x2e5   :  { %5624 = vmatprep.subr.bf16.mxu0 %v8424_v56  ;;  %v5903_v56 = vld [vmem:[%s11445_s4 + $0x120] sm:$0xff] }
 0x2e8   :  { %5625 = vmatpush1.bf16.msra.mxu0 %v8422_v22  ;;  %v7185_v22 = vpack.c.bf16 %v5904_v33, %v5903_v56 }
 0x2e9   :  { %5626 = vmatprep.subr.bf16.mxu0 %v8427_v32  ;;  %v5921_v32 = vld [vmem:[%s11445_s4 + $0x1b0] sm:$0xff] }
 0x2ec   :  { %5627 = vmatpush1.bf16.msra.mxu0 %v8425_v38  ;;  %v5922_v38 = vld [vmem:[%s11445_s4 + $0x1b8] sm:$0xff] }
 0x2ed   :  { %5628 = vmatprep.subr.bf16.mxu0 %v8430_v6  ;;  %v7187_v6 = vpack.c.bf16 %v5922_v38, %v5921_v32 }
 0x2f0   :  { %5629 = vmatpush1.bf16.msra.mxu0 %v8428_v40  ;;  %v5905_v40 = vld [vmem:[%s11445_s4 + $0x130] sm:$0xff] }
 0x2f1   :  { %5630 = vmatprep.subr.bf16.mxu0 %v8433_v60  ;;  %v5906_v60 = vld [vmem:[%s11445_s4 + $0x138] sm:$0xff] }
 0x2f4   :  { %5631 = vmatpush1.bf16.msra.mxu0 %v8431_v61  ;;  %v7189_v61 = vpack.c.bf16 %v5906_v60, %v5905_v40 }
 0x2f5   :  { %5632 = vmatprep.subr.bf16.mxu0 %v8436_v42  ;;  %v5923_v42 = vld [vmem:[%s11445_s4 + $0x1c0] sm:$0xff] }
 0x2f8   :  { %5633 = vmatpush1.bf16.msra.mxu0 %v8434_v36  ;;  %v5924_v36 = vld [vmem:[%s11445_s4 + $0x1c8] sm:$0xff] }
 0x2f9   :  { %5634 = vmatprep.subr.bf16.mxu0 %v8439_v43  ;;  %v7191_v43 = vpack.c.bf16 %v5924_v36, %v5923_v42 }
 0x2fc   :  { %5635 = vmatpush1.bf16.msra.mxu0 %v8437_v35  ;;  %v5907_v35 = vld [vmem:[%s11445_s4 + $0x140] sm:$0xff] }
 0x2fd   :  { %5636 = vmatprep.subr.bf16.mxu0 %v8442_v44  ;;  %v5908_v44 = vld [vmem:[%s11445_s4 + $0x148] sm:$0xff] }
 0x300   :  { %5637 = vmatpush1.bf16.msra.mxu0 %v8440_v45  ;;  %v7193_v45 = vpack.c.bf16 %v5908_v44, %v5907_v35 }
 0x301   :  { %5647 = vmatprep.subr.bf16.mxu0 %v8445_v46  ;;  %v5925_v46 = vld [vmem:[%s11445_s4 + $0x1d0] sm:$0xff] }
 0x303   :  { %5639 = vmatmul.mubr.bf16.vlgmr.msra.gmra.mrb[4].mxu0 %v9500_v55  ;;  %v8454_v55 = vld [vmem:[%s11442_s1 + $0x15a4] ss:$24 sps:$4 sm:$0xff]  }
 0x304   :  { %5648 = vmatpush1.bf16.msra.mxu0 %v8443_v47  ;;  %5679 = vmatprep.mubr.bf16.mxu0 %v9518_v59  ;;  %v8452_v59 = vld [vmem:[%s11442_s1 + $0x15a0] ss:$24 sps:$4 sm:$0xff]   ;;  %s8586_s1 = smov [#allocation3]  }
 0x305   :  { %5649 = vmatprep.subr.bf16.mxu0 %v8448_v49  ;;  %v5926_v47 = vld [vmem:[%s11445_s4 + $0x1d8] sm:$0xff]  ;;  %s6269_s16 = sshll.u32 %s8586_s1, 4  ;;  %s6270_s16 = int_to_ptr.vmem [resolvable:$true] %s6269_s16 }
 0x306   :  { %v7195_v49 = vpack.c.bf16 %v5926_v47, %v5925_v46  ;;  %s8559_s0 = scalar_lea.vmem %s6270_s16, 128  ;;  %p8564_p1 = scmp.lt.s32.totalorder %s6270_s16, %s6270_s16 }
 0x307   :  { %p8560_p0 = scmp.ne.s32.totalorder %s6270_s16, %s8559_s0  ;;  %p8565_p2 = scmp.lt.s32.totalorder %s8559_s0, %s8559_s0 }
 0x308   :  { %5650 = vmatpush1.bf16.msra.mxu0 %v8446_v50  ;;  %v5909_v50 = vld [vmem:[%s11445_s4 + $0x150] sm:$0xff] }
 0x309   :  { %5651 = vmatprep.subr.bf16.mxu0 %v8451_v41  ;;  %v5910_v41 = vld [vmem:[%s11445_s4 + $0x158] sm:$0xff]  ;;  %p8566_p3 = por %p8565_p2, %p8564_p1 }
 0x30b   :  { %p8567_p4 = pnand %p8566_p3, %p8560_p0 }
 0x30c   :  { %5652 = vmatpush1.bf16.msra.mxu0 %v8449_v51  ;;  %v7197_v51 = vpack.c.bf16 %v5910_v41, %v5909_v50 }
 0x30d   :  { %5653 = vmatprep.subr.bf16.mxu0 %v8454_v55  ;;  %v5927_v55 = vld [vmem:[%s11445_s4 + $0x1e0] sm:$0xff] }
 0x310   :  { %5654 = vmatpush1.bf16.msra.mxu0 %v8452_v59  ;;  %v5928_v59 = vld [vmem:[%s11445_s4 + $0x1e8] sm:$0xff] }
 0x311   :  { %5655 = vmatprep.subr.bf16.mxu0 %v8457_v52  ;;  %v5911_v52 = vld [vmem:[%s11445_s4 + $0x160] sm:$0xff] }
 0x314   :  { %5656 = vmatpush1.bf16.msra.mxu0 %v8455_v54  ;;  %v7199_v54 = vpack.c.bf16 %v5928_v59, %v5927_v55 }
 0x315   :  { %5657 = vmatprep.subr.bf16.mxu0 %v8460_v37  ;;  %v5912_v37 = vld [vmem:[%s11445_s4 + $0x168] sm:$0xff] }
 0x318   :  { %5658 = vmatpush1.bf16.msra.mxu0 %v8458_v58  ;;  %v5929_v58 = vld [vmem:[%s11445_s4 + $0x1f0] sm:$0xff] }
 0x319   :  { %5659 = vmatprep.subr.bf16.mxu0 %v8463_v39  ;;  %v5930_v39 = vld [vmem:[%s11445_s4 + $0x1f8] sm:$0xff] }
 0x31c   :  { %5660 = vmatpush1.bf16.msra.mxu0 %v8461_v62  ;;  %v7201_v62 = vpack.c.bf16 %v5912_v37, %v5911_v52  ;;  %v5931_v52 = vld [vmem:[%s11445_s4 + $0x200] sm:$0xff] }
 0x31d   :  { %5661 = vmatprep.subr.bf16.mxu0 %v8466_v16  ;;  %v7203_v16 = vpack.c.bf16 %v5930_v39, %v5929_v58  ;;  %v5933_v39 = vld [vmem:[%s11445_s4 + $0x210] sm:$0xff] }
 0x320   :  { %5662 = vmatpush1.bf16.msra.mxu0 %v8464_v0  ;;  %v5913_v0 = vld [vmem:[%s11445_s4 + $0x170] sm:$0xff] }
 0x321   :  { %5663 = vmatprep.subr.bf16.mxu0 %v8469_v24  ;;  %v5914_v24 = vld [vmem:[%s11445_s4 + $0x178] sm:$0xff] }
 0x324   :  { %5664 = vmatpush1.bf16.msra.mxu0 %v8467_v18  ;;  %v7205_v18 = vpack.c.bf16 %v5914_v24, %v5913_v0  ;;  %v5935_v24 = vld [vmem:[%s11445_s4 + $0x220] sm:$0xff] }
 0x325   :  { %5665 = vmatprep.subr.bf16.mxu0 %v8472_v1  ;;  %v5700_v1 = vsub.s32 2, %v10528_v30 }
 0x328   :  { %5666 = vmatpush1.bf16.msra.mxu0 %v8470_v2  ;;  %v5704_v2 = vsub.s32 3, %v10528_v30 }
 0x329   :  { %5667 = vmatprep.subr.bf16.mxu0 %v8475_v3  ;;  %v11320_v3 = vld [vmem:[%s11443_s2] sm:$0x3f] }
 0x32c   :  { %5668 = vmatpush1.bf16.msra.mxu0 %v8473_v4  ;;  %v5701_v4 = vrot.slane %v11320_v3, %v5700_v1 }
 0x32d   :  { %5669 = vmatprep.subr.bf16.mxu0 %v8478_v5  ;;  %v5705_v5 = vrot.slane %v11320_v3, %v5704_v2 }
 0x330   :  { %5670 = vmatpush1.bf16.msra.mxu0 %v8476_v25  ;;  %v11327_v25 = vld [vmem:[%s11444_s3] sm:$0x3f] }
 0x331   :  { %5671 = vmatprep.subr.bf16.mxu0 %v8481_v8  ;;  %v5739_v8 = vrot.slane %v11327_v25, %v5700_v1 }
 0x334   :  { %5672 = vmatpush1.bf16.msra.mxu0 %v8479_v9 }
 0x335   :  { %5673 = vmatprep.subr.bf16.mxu0 %v8484_v11  ;;  %v5743_v11 = vrot.slane %v11327_v25, %v5704_v2  ;;  %v5937_v2 = vld [vmem:[%s11445_s4 + $0x230] sm:$0xff] }
 0x338   :  { %5674 = vmatpush1.bf16.msra.mxu0 %v8482_v34 }
 0x339   :  { %5675 = vmatprep.subr.bf16.mxu0 %v8487_v12 }
 0x33c   :  { %5676 = vmatpush1.bf16.msra.mxu0 %v8485_v13 }
 0x33d   :  { %5677 = vmatprep.subr.bf16.mxu0 %v8490_v23 }
 0x340   :  { %5678 = vmatpush1.bf16.msra.mxu0 %v8488_v57 }
 0x343   :  { %5680 = vmatmul.mubr.bf16.vlgmr.msra.gmra.mrb[4].mxu0 %v9706_v10  ;;  %v5917_v10 = vld [vmem:[%s11445_s4 + $0x190] sm:$0xff] }
 0x344   :  { %v7179_v26 = vpack.c.bf16 %v5918_v21, %v5917_v10 }
 0x346   :  { %7180 = vmatprep.subr.bf16.mxu1 %v7179_v26 }
 0x347   :  { %7182 = vmatpush3.bf16.msra.mxu1 %v7181_v28 }
 0x348   :  { %7184 = vmatprep.subr.bf16.mxu1 %v7183_v31 }
 0x34b   :  { %7186 = vmatpush3.bf16.msra.mxu1 %v7185_v22 }
 0x34c   :  { %7188 = vmatprep.subr.bf16.mxu1 %v7187_v6 }
 0x34f   :  { %7190 = vmatpush3.bf16.msra.mxu1 %v7189_v61  ;;  %v8583_v61 = vmov 0.0|0.0  }
 0x350   :  { %7192 = vmatprep.subr.bf16.mxu1 %v7191_v43 }
 0x353   :  { %7194 = vmatpush3.bf16.msra.mxu1 %v7193_v45 }
 0x354   :  { %7196 = vmatprep.subr.bf16.mxu1 %v7195_v49 }
 0x357   :  { %7198 = vmatpush3.bf16.msra.mxu1 %v7197_v51 }
 0x358   :  { %7200 = vmatprep.subr.bf16.mxu1 %v7199_v54  ;;  %v5932_v54 = vld [vmem:[%s11445_s4 + $0x208] sm:$0xff] }
 0x359   :  { %v7208_v37 = vpack.c.bf16 %v5932_v54, %v5931_v52 }
 0x35b   :  { %7202 = vmatpush3.bf16.msra.mxu1 %v7201_v62  ;;  %v5934_v62 = vld [vmem:[%s11445_s4 + $0x218] sm:$0xff] }
 0x35c   :  { %7204 = vmatprep.subr.bf16.mxu1 %v7203_v16  ;;  %v7211_v0 = vpack.c.bf16 %v5934_v62, %v5933_v39 }
 0x35f   :  { %7206 = vmatpush3.bf16.msra.mxu1 %v7205_v18  ;;  %v5936_v18 = vld [vmem:[%s11445_s4 + $0x228] sm:$0xff] }
 0x360   :  { %7207 = vmatprep.subr.bf16.mxu1 %v8583_v61  ;;  %v7214_v1 = vpack.c.bf16 %v5936_v18, %v5935_v24 }
 0x395   :  { %v5353_v9 = vpop.f32.mrb[4].mxu1 }
 0x396   :  { %v5722_v34 = vmul.f32 %v5701_v4, %v5353_v9  ;;  %v5355_v12 = vpop.f32.mrb[5].mxu1  ;;  %v5938_v4 = vld [vmem:[%s11445_s4 + $0x238] sm:$0xff]  ;;  %v5940_v9 = vld [vmem:[%s11445_s4 + $0x248] sm:$0xff] }
 0x397   :  { %v5723_v13 = vmul.f32 %v5705_v5, %v5355_v12  ;;  %v5357_v23 = vpop.f32.mrb[6].mxu1  ;;  %v7217_v5 = vpack.c.bf16 %v5938_v4, %v5937_v2  ;;  %v5942_v12 = vld [vmem:[%s11445_s4 + $0x258] sm:$0xff] }
 0x398   :  { %v5760_v57 = vadd.f32 %v5739_v8, %v5722_v34  ;;  %v5358_v53 = vpop.f32.mrb[7].mxu1  ;;  %v5939_v8 = vld [vmem:[%s11445_s4 + $0x240] sm:$0xff]  ;;  %v5941_v34 = vld [vmem:[%s11445_s4 + $0x250] sm:$0xff] }
 0x399   :  { %v5761_v14 = vadd.f32 %v5743_v11, %v5723_v13  ;;  %v7220_v11 = vpack.c.bf16 %v5940_v9, %v5939_v8  ;;  %v7223_v13 = vpack.c.bf16 %v5942_v12, %v5941_v34  ;;  %v5943_v23 = vld [vmem:[%s11445_s4 + $0x260] sm:$0xff] }
 0x39a   :  { %v5772_v15 = vand.u32 2147483647, %v5760_v57  ;;  %v5766_v22 = vmax.f32 %v5760_v57, 0.0 }
 0x39b   :  { %v5773_v17 = vand.u32 2147483647, %v5761_v14  ;;  %v5767_v38 = vmax.f32 %v5761_v14, 0.0 }
 0x39c   :  { %v5778_v19 = vsub.f32 0.0, %v5772_v15  ;;  %v5946_v15 = vld [vmem:[%s11445_s4 + $0x278] sm:$0xff] }
 0x39d   :  { %v5779_v20 = vsub.f32 0.0, %v5773_v17 }
 0x39e   :  { %v5786_v10 = vmul.f32 1.442695, %v5778_v19  ;;  %v5947_v19 = vld [vmem:[%s11445_s4 + $0x280] sm:$0xff] }
 0x39f   :  { %v5788_v21 = vmul.f32 1.442695, %v5779_v20  ;;  %v5948_v20 = vld [vmem:[%s11445_s4 + $0x288] sm:$0xff] }
 0x3a0   :  { %8511 = vpow2.f32 %v5786_v10  ;;  %v7232_v10 = vpack.c.bf16 %v5948_v20, %v5947_v19 }
 0x3a1   :  { %8513 = vpow2.f32 %v5788_v21  ;;  %v5949_v21 = vld [vmem:[%s11445_s4 + $0x290] sm:$0xff] }
 0x3aa   :  { %v8512_v26 = vpop.eup %8511 }
 0x3ab   :  { %v8514_v48 = vpop.eup %8513  ;;  %v5796_v27 = vadd.f32 1.0, %v8512_v26  ;;  %v5950_v26 = vld [vmem:[%s11445_s4 + $0x298] sm:$0xff] }
 0x3ac   :  { %v5797_v28 = vadd.f32 1.0, %v8514_v48  ;;  %v7235_v48 = vpack.c.bf16 %v5950_v26, %v5949_v21 }
 0x3ad   :  { %8515 = vlog2.f32 %v5796_v27  ;;  %v5708_v27 = vsub.s32 4, %v10528_v30 }
 0x3ae   :  { %8517 = vlog2.f32 %v5797_v28  ;;  %v5712_v28 = vsub.s32 5, %v10528_v30 }
 0x3b0   :  { %v5751_v30 = vrot.slane %v11327_v25, %v5712_v28 }
 0x3b5   :  { %v7098_v29 = vpop.f32.mrb[8].mxu1 }
 0x3b6   :  { %v7099_v7 = vpop.f32.mrb[9].mxu1 }
 0x3b7   :  { %v8516_v31 = vpop.eup %8515  ;;  %v11331_v56 = vadd.f32 %v7099_v7, %v7098_v29  ;;  %v8584_v29 = vmov 0.0   ;;  %v5951_v7 = vld [vmem:[%s11445_s4 + $0x2a0] sm:$0xf] }
 0x3b8   :  { %v8518_v33 = vpop.eup %8517  ;;  %v5805_v32 = vmul.f32 0.6931472, %v8516_v31  ;;  %v5709_v31 = vrot.slane %v11320_v3, %v5708_v27 }
 0x3b9   :  { %v5807_v6 = vmul.f32 0.6931472, %v8518_v33  ;;  %v5713_v33 = vrot.slane %v11320_v3, %v5712_v28  ;;  %v7063_v28 = vld [vmem:[%s11447_s6] ss:$0 sm:$0xff] }
 0x3ba   :  { %v5814_v40 = vadd.f32 %v5805_v32, %v5766_v22  ;;  %v5747_v22 = vrot.slane %v11327_v25, %v5708_v27 }
 0x3bb   :  { %v5815_v60 = vadd.f32 %v5807_v6, %v5767_v38 }
 0x3bc   :  { %8519 = vtanh.f32 %v5814_v40 }
 0x3bd   :  { %8521 = vtanh.f32 %v5815_v60 }
 0x3c6   :  { %v8520_v42 = vpop.eup %8519 }
 0x3c7   :  { %v8522_v36 = vpop.eup %8521  ;;  %v5826_v43 = vmul.f32 %v8520_v42, %v5760_v57  ;;  %v5944_v57 = vld [vmem:[%s11445_s4 + $0x268] sm:$0xff] }
 0x3c8   :  { %v5827_v35 = vmul.f32 %v8522_v36, %v5761_v14  ;;  %v7226_v53 = vpack.c.bf16 %v5944_v57, %v5943_v23  ;;  %v5945_v14 = vld [vmem:[%s11445_s4 + $0x270] sm:$0xff] }
 0x3c9   :  { %v5832_v44 = vmax.f32 %v5826_v43, 1e-06  ;;  %v7229_v17 = vpack.c.bf16 %v5946_v15, %v5945_v14  ;;  %v6176_v15 = vld [vmem:[%s11446_s5] sm:$0xf] }
 0x3ca   :  { %v5833_v45 = vmax.f32 %v5827_v35, 1e-06 }
 0x3cb   :  { %8523 = vlog2.f32 %v5832_v44 }
 0x3cc   :  { %8525 = vlog2.f32 %v5833_v45 }
 0x3d5   :  { %v8524_v46 = vpop.eup %8523 }
 0x3d6   :  { %v8526_v47 = vpop.eup %8525  ;;  %v5841_v49 = vmul.f32 0.6931472, %v8524_v46 }
 0x3d7   :  { %v5843_v50 = vmul.f32 0.6931472, %v8526_v47 }
 0x3d8   :  { %v5851_v41 = vmul.f32 %v10878_v63, %v5841_v49 }
 0x3d9   :  { %v5852_v51 = vmul.f32 %v10878_v63, %v5843_v50 }
 0x3da   :  { %v5859_v55 = vmul.f32 1.442695, %v5851_v41 }
 0x3db   :  { %v5861_v59 = vmul.f32 1.442695, %v5852_v51 }
 0x3dd   :  { %8527 = vpow2.f32 %v5861_v59 }
 0x3de   :  { %8529 = vpow2.f32 %v5859_v55 }
 0x3e7   :  { %v8528_v58 = vpop.eup %8527 }
 0x3e8   :  { %v8530_v16 = vpop.eup %8529  ;;  %6094 = vmatprep.mubr.f32.mxu1 %v8528_v58 }
 0x3e9   :  { %6095 = vmatmul.mubr.f32.vlgmr.msra.gmra.mrb[10].mxu1 %v8530_v16 }
 0x3ea   :  { %7209 = vmatpush1.bf16.msra.mxu1 %v7208_v37 }
 0x3eb   :  { %7210 = vmatprep.subr.bf16.mxu1 %v8583_v61 }
 0x3ee   :  { %7212 = vmatpush1.bf16.msra.mxu1 %v7211_v0 }
 0x3ef   :  { %7213 = vmatprep.subr.bf16.mxu1 %v8583_v61 }
 0x3f2   :  { %7215 = vmatpush1.bf16.msra.mxu1 %v7214_v1 }
 0x3f3   :  { %7216 = vmatprep.subr.bf16.mxu1 %v8583_v61 }
 0x3f6   :  { %7218 = vmatpush1.bf16.msra.mxu1 %v7217_v5 }
 0x3f7   :  { %7219 = vmatprep.subr.bf16.mxu1 %v8583_v61 }
 0x3fa   :  { %7221 = vmatpush1.bf16.msra.mxu1 %v7220_v11 }
 0x3fb   :  { %7222 = vmatprep.subr.bf16.mxu1 %v8583_v61 }
 0x3fe   :  { %7224 = vmatpush1.bf16.msra.mxu1 %v7223_v13 }
 0x3ff   :  { %7225 = vmatprep.subr.bf16.mxu1 %v8583_v61 }
 0x402   :  { %7227 = vmatpush1.bf16.msra.mxu1 %v7226_v53 }
 0x403   :  { %7228 = vmatprep.subr.bf16.mxu1 %v8583_v61 }
 0x406   :  { %7230 = vmatpush1.bf16.msra.mxu1 %v7229_v17 }
 0x407   :  { %7231 = vmatprep.subr.bf16.mxu1 %v8583_v61 }
 0x40a   :  { %7233 = vmatpush1.bf16.msra.mxu1 %v7232_v10 }
 0x40b   :  { %7234 = vmatprep.subr.bf16.mxu1 %v8583_v61 }
 0x40e   :  { %7236 = vmatpush1.bf16.msra.mxu1 %v7235_v48 }
 0x40f   :  { %6140 = vmatprep.subr.mxu1 %v8584_v29 }
 0x412   :  { %7061 = vmatpush1.msk.msra.mxu1 %vm5956_vm0, %v5951_v7 }
 0x413   :  { %7138 = vmatprep.subr.mxu1 %v8584_v29 }
 0x416   :  { %v5681_v32 = vpop.f32.mrb[4].mxu0 }
 0x417   :  { %v5724_v38 = vmul.f32 %v5709_v31, %v5681_v32  ;;  %v5683_v6 = vpop.f32.mrb[5].mxu0 }
 0x418   :  { %v5725_v40 = vmul.f32 %v5713_v33, %v5683_v6  ;;  %v5685_v60 = vpop.f32.mrb[6].mxu0 }
 0x419   :  { %v5762_v61 = vadd.f32 %v5747_v22, %v5724_v38  ;;  %v5686_v42 = vpop.f32.mrb[7].mxu0 }
 0x41a   :  { %v5763_v36 = vadd.f32 %v5751_v30, %v5725_v40 }
 0x41b   :  { %v5774_v43 = vand.u32 2147483647, %v5762_v61  ;;  %v5768_v55 = vmax.f32 %v5762_v61, 0.0 }
 0x41c   :  { %v5775_v35 = vand.u32 2147483647, %v5763_v36  ;;  %v5769_v52 = vmax.f32 %v5763_v36, 0.0 }
 0x41d   :  { %v5780_v44 = vsub.f32 0.0, %v5774_v43 }
 0x41e   :  { %v5781_v45 = vsub.f32 0.0, %v5775_v35 }
 0x41f   :  { %v5790_v46 = vmul.f32 1.442695, %v5780_v44 }
 0x420   :  { %v5792_v3 = vmul.f32 1.442695, %v5781_v45 }
 0x421   :  { %8531 = vpow2.f32 %v5790_v46 }
 0x422   :  { %8533 = vpow2.f32 %v5792_v3 }
 0x42b   :  { %v8532_v47 = vpop.eup %8531 }
 0x42c   :  { %v8534_v49 = vpop.eup %8533  ;;  %v5798_v50 = vadd.f32 1.0, %v8532_v47 }
 0x42d   :  { %v5799_v41 = vadd.f32 1.0, %v8534_v49 }
 0x42e   :  { %8535 = vlog2.f32 %v5798_v50 }
 0x42f   :  { %8537 = vlog2.f32 %v5799_v41 }
 0x438   :  { %v8536_v25 = vpop.eup %8535 }
 0x439   :  { %v8538_v51 = vpop.eup %8537  ;;  %v5809_v59 = vmul.f32 0.6931472, %v8536_v25 }
 0x43a   :  { %v5811_v54 = vmul.f32 0.6931472, %v8538_v51 }
 0x43b   :  { %v5816_v37 = vadd.f32 %v5809_v59, %v5768_v55 }
 0x43c   :  { %v5817_v58 = vadd.f32 %v5811_v54, %v5769_v52 }
 0x43d   :  { %8539 = vtanh.f32 %v5816_v37 }
 0x43e   :  { %8541 = vtanh.f32 %v5817_v58 }
 0x447   :  { %v8540_v39 = vpop.eup %8539 }
 0x448   :  { %v8542_v62 = vpop.eup %8541  ;;  %v5828_v16 = vmul.f32 %v8540_v39, %v5762_v61 }
 0x449   :  { %v5829_v0 = vmul.f32 %v8542_v62, %v5763_v36 }
 0x44a   :  { %v5834_v24 = vmax.f32 %v5828_v16, 1e-06 }
 0x44b   :  { %v5835_v18 = vmax.f32 %v5829_v0, 1e-06 }
 0x44c   :  { %8543 = vlog2.f32 %v5834_v24 }
 0x44d   :  { %8545 = vlog2.f32 %v5835_v18 }
 0x456   :  { %v8544_v1 = vpop.eup %8543 }
 0x457   :  { %v8546_v2 = vpop.eup %8545  ;;  %v5845_v4 = vmul.f32 0.6931472, %v8544_v1 }
 0x458   :  { %v5847_v5 = vmul.f32 0.6931472, %v8546_v2 }
 0x459   :  { %v5853_v8 = vmul.f32 %v10878_v63, %v5845_v4 }
 0x45a   :  { %v5854_v9 = vmul.f32 %v10878_v63, %v5847_v5 }
 0x45b   :  { %v5863_v11 = vmul.f32 1.442695, %v5853_v8 }
 0x45c   :  { %v5865_v34 = vmul.f32 1.442695, %v5854_v9 }
 0x45e   :  { %8547 = vpow2.f32 %v5865_v34 }
 0x45f   :  { %8549 = vpow2.f32 %v5863_v11 }
 0x460   :  { %8551 = vrcp.f32 %v10878_v63 }
 0x468   :  { %v8548_v12 = vpop.eup %8547 }
 0x469   :  { %v8550_v13 = vpop.eup %8549  ;;  %7062 = vmatprep.mubr.msk.f32.mxu1 %vm5952_vm1, %v8548_v12 }
 0x46a   :  { %6165 = vmatmul.mubr.f32.vlgmr.msra.gmra.mrb[12].mxu1 %v8550_v13  ;;  %v8552_v10 = vpop.eup %8551 }
 0x46b   :  { %7139 = vmatpush3.msk.msra.mxu1 %vm5956_vm0, %v6176_v15  ;;  %7140 = vmatprep.mubr.msk.f32.mxu1 %vm8585_vm2, %v8584_v29 }
 0x4bc   :  { %v7133_v23 = vpop.f32.mrb[10].mxu1 }
 0x4bd   :  { %v7134_v57 = vpop.f32.mrb[11].mxu1 }
 0x4be   :  { %v7135_v53 = vadd.f32 %v7134_v57, %v7133_v23 }
 0x4c0   :  { %v6097_v14 = vadd.f32 %v7135_v53, %v11331_v56 }
 0x53d   :  { %v6166_v17 = vpop.f32.mrb[12].mxu1 }
 0x53e   :  { %v6167_v19 = vadd.f32 %v6166_v17, %v6097_v14  ;;  %v6168_v20 = vpop.f32.mrb[13].mxu1 }
 0x540   :  { %8553 = vlog2.f32 %v6167_v19 }
 0x54a   :  { %v8554_v21 = vpop.eup %8553 }
 0x54b   :  { %v6171_v26 = vmul.f32 0.6931472, %v8554_v21 }
 0x54d   :  { %v6173_v48 = vmul.f32 %v8552_v10, %v6171_v26 }
 0x54f   :  { %v6174_v56 = vmul.f32 1.442695, %v6173_v48 }
 0x551   :  { %8555 = vpow2.f32 %v6174_v56 }
 0x55b   :  { %v8556_v27 = vpop.eup %8555 }
 0x55c   :  { %7141 = vmatmul.mubr.msk.f32.vlgmr.msra.gmra.mrb[14].mxu1 %vm6184_vm3, %v8556_v27 }
 0x62f   :  { %v6257_v29 = vpop.f32.mrb[14].mxu1 }
 0x630   :  { %v6258_v7 = vadd.f32 %v7063_v28, %v6257_v29  ;;  %v7142_v63 = vpop.f32.mrb[15].mxu1 }
 0x632   :  { %6262 = vst.msk [vmem:[#allocation3] sm:$0xff] %vm6261_vm4, %v6258_v7 }
 0x633   :  { %8570 = shalt.err (!%p8567_p4)
}
 0x634   :  { %s8571_s19 = scalar_lea.hbm %s11449_s8, 128 }
 0x635   :  { %p8572_p5 = scmp.ne.s32.totalorder %s11449_s8, %s8571_s19  ;;  %p8575_p6 = scmp.lt.u32.totalorder %s8571_s19, %s11449_s8 }
 0x637   :  { %p8577_p7 = pnand %p8575_p6, %p8572_p5 }
 0x639   :  { %8580 = shalt.err (!%p8577_p7)
}
 0x63a   :  { %6272 = dma.vmem_to_hbm [thread:$0]  %s6270_s16, 128, %s11449_s8, [#allocation4]  }
 0x63b   :  { %8581 = dma.done.wait [#allocation4], 128  }
 0x63c   :  { %8582 = vsyncadd [#allocation4], 4294967168 }
 0x63d   :  { %6276 = vsyncpa [#allocation4], 1 }

</bundles_post_ra>
